<compile_context>
chip_gen: v7x
topology: tpu7x:2x2x1
jax: 0.10.0
libtpu: 0.0.40
codegen_flags: <defaults>
</compile_context>

<pallas_src>
from functools import partial

import numpy as np
import jax
import jax.numpy as jnp
from jax import lax
from jax.experimental import pallas as pl
from jax.experimental.pallas import tpu as pltpu

SEQ_LEN = 50          # Conv1d in_channels (token positions)
C_IN_PAD = 64         # channel dim padded for lane alignment
EMB_DIM = 32          # embedding dim == Conv1d spatial length
K1 = 3                # conv kernel size
C1_OUT = 256
POOL_LEN = 11         # floor((32 + 2*1 - 3)/3) + 1
C2_OUT = 50
C2_PAD = 64           # conv2 out channels padded for lane alignment
FLAT = C2_OUT * POOL_LEN        # 550  (torch flatten size)
FLAT_PAD = C2_PAD * POOL_LEN    # 704  (kernel flatten size, l-major, padded channels)
D1 = 256
D2 = 10
D2_PAD = 128          # lane-dense output width (logits live in [:, :10])
BN_EPS = 1e-5


def _cnn_kernel(x_ref, w1_ref, b1_ref, w2_ref, b2_ref,
                wd1_ref, bd1_ref, wd2_ref, bd2_ref, out_ref):
    bt = out_ref.shape[0]                       # batch tile (multiple of 8)
    cin = x_ref.shape[-1]                       # 64 (padded channels)

    # ---- conv1 (k=3, pad=1): in-kernel im2col -> ONE matmul (32*bt, 192) @ (192, 256) ----
    # x rows are (l, b)-major: row l*bt + b holds the 64 (padded) channels at spatial pos l.
    zpad1 = jnp.zeros((bt, cin), x_ref.dtype)
    xp = jnp.concatenate([zpad1, x_ref[...], zpad1], axis=0)          # (34*bt, 64), l = -1..32
    x2c = jnp.concatenate([xp[0:EMB_DIM * bt, :],
                           xp[bt:(EMB_DIM + 1) * bt, :],
                           xp[2 * bt:(EMB_DIM + 2) * bt, :]], axis=-1)  # (32*bt, 192)
    h1 = jnp.dot(x2c, w1_ref[...], preferred_element_type=jnp.float32)
    h1 = jnp.maximum(h1 + b1_ref[...], 0.0).astype(jnp.bfloat16)       # (32*bt, 256) bf16

    # ---- maxpool1d (k=3, stride=3, pad=1) over l: 11 pooled planes of (bt, 256), bf16 ----
    # Window j covers rows 3j-1..3j+1 (torch -inf pad never wins; post-ReLU values >= 0).
    zpad2 = jnp.zeros((bt, C1_OUT), jnp.bfloat16)
    planes = [zpad2]                                                   # conv2 left zero pad
    for j in range(POOL_LEN):
        rows = [r for r in (3 * j - 1, 3 * j, 3 * j + 1) if 0 <= r < EMB_DIM]
        m = h1[rows[0] * bt:(rows[0] + 1) * bt, :]
        for r in rows[1:]:
            m = jnp.maximum(m, h1[r * bt:(r + 1) * bt, :])
        planes.append(m)
    planes.append(zpad2)                                               # conv2 right zero pad
    P = jnp.concatenate(planes, axis=0)                                # (13*bt, 256) bf16

    # ---- conv2 (k=3, pad=1): im2col matmul (11*bt, 768) @ (768, 64) ----
    x2 = jnp.concatenate([P[0:POOL_LEN * bt, :],
                          P[bt:(POOL_LEN + 1) * bt, :],
                          P[2 * bt:(POOL_LEN + 2) * bt, :]], axis=-1)  # (11*bt, 768)
    h2 = jnp.dot(x2, w2_ref[...], preferred_element_type=jnp.float32)
    h2 = jnp.maximum(h2 + b2_ref[...], 0.0).astype(jnp.bfloat16)       # (11*bt, 64) bf16

    # ---- Flatten (bt, 704) in (l, c)-order. Dropout = identity (eval).
    #      BatchNorm1d (eval) is folded into wd1/bd1 at prepare time. ----
    flat = jnp.concatenate([h2[l * bt:(l + 1) * bt, :] for l in range(POOL_LEN)],
                           axis=-1)                                    # (bt, 704) bf16

    # ---- dense1 (704 -> 256) + ReLU ----
    d1 = jnp.dot(flat, wd1_ref[...], preferred_element_type=jnp.float32)
    d1 = jnp.maximum(d1 + bd1_ref[...], 0.0).astype(jnp.bfloat16)      # (bt, 256)

    # ---- dense2 (256 -> 128-padded). Module returns pre-softmax logits. ----
    out = jnp.dot(d1, wd2_ref[...], preferred_element_type=jnp.float32)
    out_ref[...] = out + bd2_ref[...]                                  # (bt, 128) lane-dense


def prepare_params(params):
    """One-time re-layout of PyTorch-style params into kernel-friendly padded bf16 buffers.
    Call once when weights are loaded; the result is reused on every forward call."""
    (emb_tbl, W1, b1, W2, b2,
     gamma, beta, rmean, rvar,
     Wd1, bd1, Wd2, bd2) = params

    emb_bf = emb_tbl.astype(jnp.bfloat16)                              # (1000, 32)

    # conv1 weight -> (k*64 + c, out), channels padded 50->64 with zeros
    w1t = jnp.transpose(W1, (2, 1, 0))                                 # (3, 50, 256)
    w1u = jnp.pad(w1t, ((0, 0), (0, C_IN_PAD - SEQ_LEN), (0, 0))) \
             .reshape(K1 * C_IN_PAD, C1_OUT).astype(jnp.bfloat16)      # (192, 256)
    b1r = b1.reshape(1, C1_OUT).astype(jnp.float32)

    # conv2 weight -> (k*256 + c1, c2), out channels padded 50->64 with zeros
    w2t = jnp.transpose(W2, (2, 1, 0))                                 # (3, 256, 50)
    w2u = jnp.pad(w2t, ((0, 0), (0, 0), (0, C2_PAD - C2_OUT))) \
             .reshape(K1 * C1_OUT, C2_PAD).astype(jnp.bfloat16)        # (768, 64)
    b2r = jnp.zeros((1, C2_PAD), jnp.float32).at[0, :C2_OUT].set(b2)

    # BatchNorm1d (eval) folded into dense1: y = (f*s + t) @ Wd1^T + bd1
    #   = f @ (Wd1 * s)^T + (bd1 + Wd1 @ t).  Torch flat index = c*11 + l;
    #   kernel flat index = l*64 + c (padded channels -> zero rows).
    s = gamma / jnp.sqrt(rvar + BN_EPS)                                # (550,)
    t = beta - rmean * s
    Wd1s = (Wd1 * s[None, :]).reshape(D1, C2_OUT, POOL_LEN)            # (256, 50, 11)
    Wd1r = jnp.transpose(Wd1s, (2, 1, 0))                              # (11, 50, 256)
    wd1u = jnp.pad(Wd1r, ((0, 0), (0, C2_PAD - C2_OUT), (0, 0))) \
              .reshape(FLAT_PAD, D1).astype(jnp.bfloat16)              # (704, 256)
    bd1f = (bd1 + Wd1 @ t).reshape(1, D1).astype(jnp.float32)

    # dense2 padded to 128 lanes (lane-dense output store)
    wd2p = jnp.zeros((D1, D2_PAD), jnp.bfloat16).at[:, :D2].set(Wd2.T.astype(jnp.bfloat16))
    bd2p = jnp.zeros((1, D2_PAD), jnp.float32).at[0, :D2].set(bd2)

    return (emb_bf, w1u, b1r, w2u, b2r, wd1u, bd1f, wd2p, bd2p)


@partial(jax.jit, static_argnames=("batch_tile",))
def cnn_forward(tokens, prep, batch_tile=32):
    (emb_bf, w1u, b1r, w2u, b2r, wd1u, bd1f, wd2p, bd2p) = prep
    bt = batch_tile
    assert bt % 8 == 0, "batch_tile must be a multiple of 8 (sublane tile)"
    B = tokens.shape[0]
    nblk = -(-B // bt)
    B_pad = nblk * bt
    if B_pad != B:
        tokens = jnp.pad(tokens, ((0, B_pad - B), (0, 0)))   # pad batch with token id 0

    # ---- glue: embedding gather + (l, b)-major row layout, bf16, channels padded to 64 ----
    # TODO(synk): the data-dependent embedding row gather stays in the XLA wrapper
    # (no clean rectangular BlockSpec / reliable in-kernel gather at this table size).
    emb = emb_bf[tokens]                                     # (B_pad, 50, 32)
    x = jnp.transpose(emb, (0, 2, 1))                        # (B_pad, 32, 50) length-major
    x = jnp.pad(x, ((0, 0), (0, 0), (0, C_IN_PAD - SEQ_LEN)))  # (B_pad, 32, 64)
    x_prep = (x.reshape(nblk, bt, EMB_DIM, C_IN_PAD)
               .transpose(0, 2, 1, 3)
               .reshape(nblk * EMB_DIM * bt, C_IN_PAD))      # row = blk*32*bt + l*bt + b

    grid_spec = pltpu.PrefetchScalarGridSpec(
        num_scalar_prefetch=0,
        grid=(nblk,),
        in_specs=[
            pl.BlockSpec((EMB_DIM * bt, C_IN_PAD), lambda i: (i, 0)),    # x (l,b)-major tile
            pl.BlockSpec((K1 * C_IN_PAD, C1_OUT), lambda i: (0, 0)),     # conv1 W
            pl.BlockSpec((1, C1_OUT), lambda i: (0, 0)),                 # conv1 b
            pl.BlockSpec((K1 * C1_OUT, C2_PAD), lambda i: (0, 0)),       # conv2 W (padded)
            pl.BlockSpec((1, C2_PAD), lambda i: (0, 0)),                 # conv2 b (padded)
            pl.BlockSpec((FLAT_PAD, D1), lambda i: (0, 0)),              # dense1 W (BN folded)
            pl.BlockSpec((1, D1), lambda i: (0, 0)),                     # dense1 b (BN folded)
            pl.BlockSpec((D1, D2_PAD), lambda i: (0, 0)),                # dense2 W (padded)
            pl.BlockSpec((1, D2_PAD), lambda i: (0, 0)),                 # dense2 b (padded)
        ],
        out_specs=pl.BlockSpec((bt, D2_PAD), lambda i: (i, 0)),
    )
    out = pl.pallas_call(
        _cnn_kernel,
        out_shape=jax.ShapeDtypeStruct((B_pad, D2_PAD), jnp.float32),
        grid_spec=grid_spec,
        compiler_params=pltpu.CompilerParams(dimension_semantics=("parallel",)),
    )(x_prep, w1u, b1r, w2u, b2r, wd1u, bd1f, wd2p, bd2p)
    return out[:B, :D2]


def cnn_reference(tokens, params):
    """Pure-JAX f32 reference mirroring the PyTorch forward (eval mode)."""
    (emb_tbl, W1, b1, W2, b2,
     gamma, beta, rmean, rvar,
     Wd1, bd1, Wd2, bd2) = params
    B = tokens.shape[0]
    x = emb_tbl[tokens]                                  # (B, 50, 32) NCL

    def conv1d(v, w, b):
        y = lax.conv_general_dilated(v, w, window_strides=(1,), padding=((1, 1),),
                                     dimension_numbers=('NCH', 'OIH', 'NCH'))
        return y + b[None, :, None]

    h1 = jax.nn.relu(conv1d(x, W1, b1))                  # (B, 256, 32)
    hp = jnp.pad(h1, ((0, 0), (0, 0), (1, 1)), constant_values=-jnp.inf)
    p = lax.reduce_window(hp, -jnp.inf, lax.max, (1, 1, 3), (1, 1, 3), 'VALID')  # (B,256,11)
    h2 = jax.nn.relu(conv1d(p, W2, b2))                  # (B, 50, 11)
    f = h2.reshape(B, FLAT)
    scale = gamma / jnp.sqrt(rvar + BN_EPS)
    f = (f - rmean) * scale + beta
    d1 = jax.nn.relu(f @ Wd1.T + bd1)
    return d1 @ Wd2.T + bd2


if __name__ == "__main__":
    key = jax.random.PRNGKey(0)
    ks = jax.random.split(key, 10)
    B = 64                                               # 2 batch tiles of 32 -> 2 parallel grid steps
    tokens = jax.random.randint(ks[0], (B, SEQ_LEN), 0, 1000)   # (64, 50) token ids

    params = (
        jax.random.normal(ks[1], (1000, EMB_DIM), jnp.float32) * 0.1,        # embedding table
        jax.random.normal(ks[2], (C1_OUT, SEQ_LEN, 3), jnp.float32) * 0.08,  # conv1 weight
        jax.random.normal(ks[3], (C1_OUT,), jnp.float32) * 0.05,             # conv1 bias
        jax.random.normal(ks[4], (C2_OUT, C1_OUT, 3), jnp.float32) * 0.03,   # conv2 weight
        jax.random.normal(ks[5], (C2_OUT,), jnp.float32) * 0.05,             # conv2 bias
        jnp.ones((FLAT,), jnp.float32),                                      # bn gamma
        jnp.zeros((FLAT,), jnp.float32),                                     # bn beta
        jnp.zeros((FLAT,), jnp.float32),                                     # bn running_mean
        jnp.ones((FLAT,), jnp.float32),                                      # bn running_var
        jax.random.normal(ks[6], (D1, FLAT), jnp.float32) * 0.04,            # dense1 weight
        jax.random.normal(ks[7], (D1,), jnp.float32) * 0.05,                 # dense1 bias
        jax.random.normal(ks[8], (D2, D1), jnp.float32) * 0.06,              # dense2 weight
        jax.random.normal(ks[9], (D2,), jnp.float32) * 0.05,                 # dense2 bias
    )

    prep = jax.block_until_ready(prepare_params(params))      # one-time weight re-layout
    out = jax.block_until_ready(cnn_forward(tokens, prep, batch_tile=32))
    ref = jax.block_until_ready(cnn_reference(tokens, params))
    np.testing.assert_allclose(np.asarray(out), np.asarray(ref), rtol=2e-2, atol=2e-2)
    print("KERNEL_OK")
</pallas_src>

<mosaic_0001>
module attributes {stable_mosaic.version = 11 : i64} {
  func.func @_cnn_kernel(%arg0: i32, %arg1: memref<1024x64xbf16, #tpu.memory_space<vmem>>, %arg2: memref<192x256xbf16, #tpu.memory_space<vmem>>, %arg3: memref<1x256xf32, #tpu.memory_space<vmem>>, %arg4: memref<768x64xbf16, #tpu.memory_space<vmem>>, %arg5: memref<1x64xf32, #tpu.memory_space<vmem>>, %arg6: memref<704x256xbf16, #tpu.memory_space<vmem>>, %arg7: memref<1x256xf32, #tpu.memory_space<vmem>>, %arg8: memref<256x128xbf16, #tpu.memory_space<vmem>>, %arg9: memref<1x128xf32, #tpu.memory_space<vmem>>, %arg10: memref<32x128xf32, #tpu.memory_space<vmem>>) attributes {dimension_semantics = [#tpu.dimension_semantics<parallel>], iteration_bounds = array<i64: 2>, scalar_prefetch = 0 : i64, scratch_operands = 0 : i64, tpu.core_type = #tpu.core_type<tc>, window_params = [{transform_indices = @transform_0, window_bounds = array<i64: 1024, 64>}, {pipeline_mode = #tpu.pipeline_mode<synchronous>, transform_indices = @transform_1, window_bounds = array<i64: 192, 256>}, {pipeline_mode = #tpu.pipeline_mode<synchronous>, transform_indices = @transform_2, window_bounds = array<i64: 1, 256>}, {pipeline_mode = #tpu.pipeline_mode<synchronous>, transform_indices = @transform_3, window_bounds = array<i64: 768, 64>}, {pipeline_mode = #tpu.pipeline_mode<synchronous>, transform_indices = @transform_4, window_bounds = array<i64: 1, 64>}, {pipeline_mode = #tpu.pipeline_mode<synchronous>, transform_indices = @transform_5, window_bounds = array<i64: 704, 256>}, {pipeline_mode = #tpu.pipeline_mode<synchronous>, transform_indices = @transform_6, window_bounds = array<i64: 1, 256>}, {pipeline_mode = #tpu.pipeline_mode<synchronous>, transform_indices = @transform_7, window_bounds = array<i64: 256, 128>}, {pipeline_mode = #tpu.pipeline_mode<synchronous>, transform_indices = @transform_8, window_bounds = array<i64: 1, 128>}, {transform_indices = @transform_9, window_bounds = array<i64: 32, 128>}]} {
    %cst = arith.constant 0.000000e+00 : bf16
    %0 = vector.broadcast %cst : bf16 to vector<32x64xbf16>
    %c0 = arith.constant 0 : index
    %c0_0 = arith.constant 0 : index
    %1 = vector.load %arg1[%c0, %c0_0] : memref<1024x64xbf16, #tpu.memory_space<vmem>>, vector<1024x64xbf16>
    %2 = tpu.concatenate %0, %1, %0 in 0 : vector<32x64xbf16>, vector<1024x64xbf16>, vector<32x64xbf16> -> vector<1088x64xbf16>
    %3 = vector.extract_strided_slice %2 {offsets = [0, 0], sizes = [1024, 64], strides = [1, 1]} : vector<1088x64xbf16> to vector<1024x64xbf16>
    %4 = vector.extract_strided_slice %2 {offsets = [32, 0], sizes = [1024, 64], strides = [1, 1]} : vector<1088x64xbf16> to vector<1024x64xbf16>
    %5 = vector.extract_strided_slice %2 {offsets = [64, 0], sizes = [1024, 64], strides = [1, 1]} : vector<1088x64xbf16> to vector<1024x64xbf16>
    %6 = tpu.concatenate %3, %4, %5 in 1 : vector<1024x64xbf16>, vector<1024x64xbf16>, vector<1024x64xbf16> -> vector<1024x192xbf16>
    %c0_1 = arith.constant 0 : index
    %c0_2 = arith.constant 0 : index
    %7 = vector.load %arg2[%c0_1, %c0_2] : memref<192x256xbf16, #tpu.memory_space<vmem>>, vector<192x256xbf16>
    %cst_3 = arith.constant dense<0.000000e+00> : vector<1024x256xf32>
    %8 = tpu.matmul %6, %7, %cst_3 {dimension_numbers = #tpu.dot_dimension_numbers<[1], [0], [0], [1], [0, 0, 1, 1], [], []>} : vector<1024x192xbf16>, vector<192x256xbf16>, vector<1024x256xf32> -> vector<1024x256xf32>
    %c0_4 = arith.constant 0 : index
    %c0_5 = arith.constant 0 : index
    %9 = vector.load %arg3[%c0_4, %c0_5] : memref<1x256xf32, #tpu.memory_space<vmem>>, vector<1x256xf32>
    %10 = vector.broadcast %9 : vector<1x256xf32> to vector<1024x256xf32>
    %11 = arith.addf %8, %10 : vector<1024x256xf32>
    %cst_6 = arith.constant 0.000000e+00 : f32
    %12 = vector.broadcast %cst_6 : f32 to vector<1024x256xf32>
    %13 = arith.maximumf %11, %12 : vector<1024x256xf32>
    %14 = arith.truncf %13 : vector<1024x256xf32> to vector<1024x256xbf16>
    %cst_7 = arith.constant 0.000000e+00 : bf16
    %15 = vector.broadcast %cst_7 : bf16 to vector<32x256xbf16>
    %16 = vector.extract_strided_slice %14 {offsets = [0, 0], sizes = [32, 256], strides = [1, 1]} : vector<1024x256xbf16> to vector<32x256xbf16>
    %17 = vector.extract_strided_slice %14 {offsets = [32, 0], sizes = [32, 256], strides = [1, 1]} : vector<1024x256xbf16> to vector<32x256xbf16>
    %18 = arith.maximumf %16, %17 : vector<32x256xbf16>
    %19 = vector.extract_strided_slice %14 {offsets = [64, 0], sizes = [32, 256], strides = [1, 1]} : vector<1024x256xbf16> to vector<32x256xbf16>
    %20 = vector.extract_strided_slice %14 {offsets = [96, 0], sizes = [32, 256], strides = [1, 1]} : vector<1024x256xbf16> to vector<32x256xbf16>
    %21 = arith.maximumf %19, %20 : vector<32x256xbf16>
    %22 = vector.extract_strided_slice %14 {offsets = [128, 0], sizes = [32, 256], strides = [1, 1]} : vector<1024x256xbf16> to vector<32x256xbf16>
    %23 = arith.maximumf %21, %22 : vector<32x256xbf16>
    %24 = vector.extract_strided_slice %14 {offsets = [160, 0], sizes = [32, 256], strides = [1, 1]} : vector<1024x256xbf16> to vector<32x256xbf16>
    %25 = vector.extract_strided_slice %14 {offsets = [192, 0], sizes = [32, 256], strides = [1, 1]} : vector<1024x256xbf16> to vector<32x256xbf16>
    %26 = arith.maximumf %24, %25 : vector<32x256xbf16>
    %27 = vector.extract_strided_slice %14 {offsets = [224, 0], sizes = [32, 256], strides = [1, 1]} : vector<1024x256xbf16> to vector<32x256xbf16>
    %28 = arith.maximumf %26, %27 : vector<32x256xbf16>
    %29 = vector.extract_strided_slice %14 {offsets = [256, 0], sizes = [32, 256], strides = [1, 1]} : vector<1024x256xbf16> to vector<32x256xbf16>
    %30 = vector.extract_strided_slice %14 {offsets = [288, 0], sizes = [32, 256], strides = [1, 1]} : vector<1024x256xbf16> to vector<32x256xbf16>
    %31 = arith.maximumf %29, %30 : vector<32x256xbf16>
    %32 = vector.extract_strided_slice %14 {offsets = [320, 0], sizes = [32, 256], strides = [1, 1]} : vector<1024x256xbf16> to vector<32x256xbf16>
    %33 = arith.maximumf %31, %32 : vector<32x256xbf16>
    %34 = vector.extract_strided_slice %14 {offsets = [352, 0], sizes = [32, 256], strides = [1, 1]} : vector<1024x256xbf16> to vector<32x256xbf16>
    %35 = vector.extract_strided_slice %14 {offsets = [384, 0], sizes = [32, 256], strides = [1, 1]} : vector<1024x256xbf16> to vector<32x256xbf16>
    %36 = arith.maximumf %34, %35 : vector<32x256xbf16>
    %37 = vector.extract_strided_slice %14 {offsets = [416, 0], sizes = [32, 256], strides = [1, 1]} : vector<1024x256xbf16> to vector<32x256xbf16>
    %38 = arith.maximumf %36, %37 : vector<32x256xbf16>
    %39 = vector.extract_strided_slice %14 {offsets = [448, 0], sizes = [32, 256], strides = [1, 1]} : vector<1024x256xbf16> to vector<32x256xbf16>
    %40 = vector.extract_strided_slice %14 {offsets = [480, 0], sizes = [32, 256], strides = [1, 1]} : vector<1024x256xbf16> to vector<32x256xbf16>
    %41 = arith.maximumf %39, %40 : vector<32x256xbf16>
    %42 = vector.extract_strided_slice %14 {offsets = [512, 0], sizes = [32, 256], strides = [1, 1]} : vector<1024x256xbf16> to vector<32x256xbf16>
    %43 = arith.maximumf %41, %42 : vector<32x256xbf16>
    %44 = vector.extract_strided_slice %14 {offsets = [544, 0], sizes = [32, 256], strides = [1, 1]} : vector<1024x256xbf16> to vector<32x256xbf16>
    %45 = vector.extract_strided_slice %14 {offsets = [576, 0], sizes = [32, 256], strides = [1, 1]} : vector<1024x256xbf16> to vector<32x256xbf16>
    %46 = arith.maximumf %44, %45 : vector<32x256xbf16>
    %47 = vector.extract_strided_slice %14 {offsets = [608, 0], sizes = [32, 256], strides = [1, 1]} : vector<1024x256xbf16> to vector<32x256xbf16>
    %48 = arith.maximumf %46, %47 : vector<32x256xbf16>
    %49 = vector.extract_strided_slice %14 {offsets = [640, 0], sizes = [32, 256], strides = [1, 1]} : vector<1024x256xbf16> to vector<32x256xbf16>
    %50 = vector.extract_strided_slice %14 {offsets = [672, 0], sizes = [32, 256], strides = [1, 1]} : vector<1024x256xbf16> to vector<32x256xbf16>
    %51 = arith.maximumf %49, %50 : vector<32x256xbf16>
    %52 = vector.extract_strided_slice %14 {offsets = [704, 0], sizes = [32, 256], strides = [1, 1]} : vector<1024x256xbf16> to vector<32x256xbf16>
    %53 = arith.maximumf %51, %52 : vector<32x256xbf16>
    %54 = vector.extract_strided_slice %14 {offsets = [736, 0], sizes = [32, 256], strides = [1, 1]} : vector<1024x256xbf16> to vector<32x256xbf16>
    %55 = vector.extract_strided_slice %14 {offsets = [768, 0], sizes = [32, 256], strides = [1, 1]} : vector<1024x256xbf16> to vector<32x256xbf16>
    %56 = arith.maximumf %54, %55 : vector<32x256xbf16>
    %57 = vector.extract_strided_slice %14 {offsets = [800, 0], sizes = [32, 256], strides = [1, 1]} : vector<1024x256xbf16> to vector<32x256xbf16>
    %58 = arith.maximumf %56, %57 : vector<32x256xbf16>
    %59 = vector.extract_strided_slice %14 {offsets = [832, 0], sizes = [32, 256], strides = [1, 1]} : vector<1024x256xbf16> to vector<32x256xbf16>
    %60 = vector.extract_strided_slice %14 {offsets = [864, 0], sizes = [32, 256], strides = [1, 1]} : vector<1024x256xbf16> to vector<32x256xbf16>
    %61 = arith.maximumf %59, %60 : vector<32x256xbf16>
    %62 = vector.extract_strided_slice %14 {offsets = [896, 0], sizes = [32, 256], strides = [1, 1]} : vector<1024x256xbf16> to vector<32x256xbf16>
    %63 = arith.maximumf %61, %62 : vector<32x256xbf16>
    %64 = vector.extract_strided_slice %14 {offsets = [928, 0], sizes = [32, 256], strides = [1, 1]} : vector<1024x256xbf16> to vector<32x256xbf16>
    %65 = vector.extract_strided_slice %14 {offsets = [960, 0], sizes = [32, 256], strides = [1, 1]} : vector<1024x256xbf16> to vector<32x256xbf16>
    %66 = arith.maximumf %64, %65 : vector<32x256xbf16>
    %67 = vector.extract_strided_slice %14 {offsets = [992, 0], sizes = [32, 256], strides = [1, 1]} : vector<1024x256xbf16> to vector<32x256xbf16>
    %68 = arith.maximumf %66, %67 : vector<32x256xbf16>
    %69 = tpu.concatenate %15, %18, %23, %28, %33, %38, %43, %48, %53, %58, %63, %68, %15 in 0 : vector<32x256xbf16>, vector<32x256xbf16>, vector<32x256xbf16>, vector<32x256xbf16>, vector<32x256xbf16>, vector<32x256xbf16>, vector<32x256xbf16>, vector<32x256xbf16>, vector<32x256xbf16>, vector<32x256xbf16>, vector<32x256xbf16>, vector<32x256xbf16>, vector<32x256xbf16> -> vector<416x256xbf16>
    %70 = vector.extract_strided_slice %69 {offsets = [0, 0], sizes = [352, 256], strides = [1, 1]} : vector<416x256xbf16> to vector<352x256xbf16>
    %71 = vector.extract_strided_slice %69 {offsets = [32, 0], sizes = [352, 256], strides = [1, 1]} : vector<416x256xbf16> to vector<352x256xbf16>
    %72 = vector.extract_strided_slice %69 {offsets = [64, 0], sizes = [352, 256], strides = [1, 1]} : vector<416x256xbf16> to vector<352x256xbf16>
    %73 = tpu.concatenate %70, %71, %72 in 1 : vector<352x256xbf16>, vector<352x256xbf16>, vector<352x256xbf16> -> vector<352x768xbf16>
    %c0_8 = arith.constant 0 : index
    %c0_9 = arith.constant 0 : index
    %74 = vector.load %arg4[%c0_8, %c0_9] : memref<768x64xbf16, #tpu.memory_space<vmem>>, vector<768x64xbf16>
    %cst_10 = arith.constant dense<0.000000e+00> : vector<352x64xf32>
    %75 = tpu.matmul %73, %74, %cst_10 {dimension_numbers = #tpu.dot_dimension_numbers<[1], [0], [0], [1], [0, 0, 1, 1], [], []>} : vector<352x768xbf16>, vector<768x64xbf16>, vector<352x64xf32> -> vector<352x64xf32>
    %c0_11 = arith.constant 0 : index
    %c0_12 = arith.constant 0 : index
    %76 = vector.load %arg5[%c0_11, %c0_12] : memref<1x64xf32, #tpu.memory_space<vmem>>, vector<1x64xf32>
    %77 = vector.broadcast %76 : vector<1x64xf32> to vector<352x64xf32>
    %78 = arith.addf %75, %77 : vector<352x64xf32>
    %cst_13 = arith.constant 0.000000e+00 : f32
    %79 = vector.broadcast %cst_13 : f32 to vector<352x64xf32>
    %80 = arith.maximumf %78, %79 : vector<352x64xf32>
    %81 = arith.truncf %80 : vector<352x64xf32> to vector<352x64xbf16>
    %82 = vector.extract_strided_slice %81 {offsets = [0, 0], sizes = [32, 64], strides = [1, 1]} : vector<352x64xbf16> to vector<32x64xbf16>
    %83 = vector.extract_strided_slice %81 {offsets = [32, 0], sizes = [32, 64], strides = [1, 1]} : vector<352x64xbf16> to vector<32x64xbf16>
    %84 = vector.extract_strided_slice %81 {offsets = [64, 0], sizes = [32, 64], strides = [1, 1]} : vector<352x64xbf16> to vector<32x64xbf16>
    %85 = vector.extract_strided_slice %81 {offsets = [96, 0], sizes = [32, 64], strides = [1, 1]} : vector<352x64xbf16> to vector<32x64xbf16>
    %86 = vector.extract_strided_slice %81 {offsets = [128, 0], sizes = [32, 64], strides = [1, 1]} : vector<352x64xbf16> to vector<32x64xbf16>
    %87 = vector.extract_strided_slice %81 {offsets = [160, 0], sizes = [32, 64], strides = [1, 1]} : vector<352x64xbf16> to vector<32x64xbf16>
    %88 = vector.extract_strided_slice %81 {offsets = [192, 0], sizes = [32, 64], strides = [1, 1]} : vector<352x64xbf16> to vector<32x64xbf16>
    %89 = vector.extract_strided_slice %81 {offsets = [224, 0], sizes = [32, 64], strides = [1, 1]} : vector<352x64xbf16> to vector<32x64xbf16>
    %90 = vector.extract_strided_slice %81 {offsets = [256, 0], sizes = [32, 64], strides = [1, 1]} : vector<352x64xbf16> to vector<32x64xbf16>
    %91 = vector.extract_strided_slice %81 {offsets = [288, 0], sizes = [32, 64], strides = [1, 1]} : vector<352x64xbf16> to vector<32x64xbf16>
    %92 = vector.extract_strided_slice %81 {offsets = [320, 0], sizes = [32, 64], strides = [1, 1]} : vector<352x64xbf16> to vector<32x64xbf16>
    %93 = tpu.concatenate %82, %83, %84, %85, %86, %87, %88, %89, %90, %91, %92 in 1 : vector<32x64xbf16>, vector<32x64xbf16>, vector<32x64xbf16>, vector<32x64xbf16>, vector<32x64xbf16>, vector<32x64xbf16>, vector<32x64xbf16>, vector<32x64xbf16>, vector<32x64xbf16>, vector<32x64xbf16>, vector<32x64xbf16> -> vector<32x704xbf16>
    %c0_14 = arith.constant 0 : index
    %c0_15 = arith.constant 0 : index
    %94 = vector.load %arg6[%c0_14, %c0_15] : memref<704x256xbf16, #tpu.memory_space<vmem>>, vector<704x256xbf16>
    %cst_16 = arith.constant dense<0.000000e+00> : vector<32x256xf32>
    %95 = tpu.matmul %93, %94, %cst_16 {dimension_numbers = #tpu.dot_dimension_numbers<[1], [0], [0], [1], [0, 0, 1, 1], [], []>} : vector<32x704xbf16>, vector<704x256xbf16>, vector<32x256xf32> -> vector<32x256xf32>
    %c0_17 = arith.constant 0 : index
    %c0_18 = arith.constant 0 : index
    %96 = vector.load %arg7[%c0_17, %c0_18] : memref<1x256xf32, #tpu.memory_space<vmem>>, vector<1x256xf32>
    %97 = vector.broadcast %96 : vector<1x256xf32> to vector<32x256xf32>
    %98 = arith.addf %95, %97 : vector<32x256xf32>
    %cst_19 = arith.constant 0.000000e+00 : f32
    %99 = vector.broadcast %cst_19 : f32 to vector<32x256xf32>
    %100 = arith.maximumf %98, %99 : vector<32x256xf32>
    %101 = arith.truncf %100 : vector<32x256xf32> to vector<32x256xbf16>
    %c0_20 = arith.constant 0 : index
    %c0_21 = arith.constant 0 : index
    %102 = vector.load %arg8[%c0_20, %c0_21] : memref<256x128xbf16, #tpu.memory_space<vmem>>, vector<256x128xbf16>
    %cst_22 = arith.constant dense<0.000000e+00> : vector<32x128xf32>
    %103 = tpu.matmul %101, %102, %cst_22 {dimension_numbers = #tpu.dot_dimension_numbers<[1], [0], [0], [1], [0, 0, 1, 1], [], []>} : vector<32x256xbf16>, vector<256x128xbf16>, vector<32x128xf32> -> vector<32x128xf32>
    %c0_23 = arith.constant 0 : index
    %c0_24 = arith.constant 0 : index
    %104 = vector.load %arg9[%c0_23, %c0_24] : memref<1x128xf32, #tpu.memory_space<vmem>>, vector<1x128xf32>
    %105 = vector.broadcast %104 : vector<1x128xf32> to vector<32x128xf32>
    %106 = arith.addf %103, %105 : vector<32x128xf32>
    %c0_25 = arith.constant 0 : index
    %c0_26 = arith.constant 0 : index
    %107 = vector.load %arg10[%c0_25, %c0_26] : memref<32x128xf32, #tpu.memory_space<vmem>>, vector<32x128xf32>
    tpu.vector_store %arg10[%c0_25, %c0_26], %106 {strides = array<i32>} : memref<32x128xf32, #tpu.memory_space<vmem>>, vector<32x128xf32>,
    return
  }
  func.func @transform_0(%arg0: i32) -> (i32, i32) {
    %c0_i32 = arith.constant 0 : i32
    %c0_i32_0 = arith.constant 0 : i32
    return %arg0, %c0_i32 : i32, i32
  }
  func.func @transform_1(%arg0: i32) -> (i32, i32) {
    %c0_i32 = arith.constant 0 : i32
    %c0_i32_0 = arith.constant 0 : i32
    %c0_i32_1 = arith.constant 0 : i32
    return %c0_i32, %c0_i32_0 : i32, i32
  }
  func.func @transform_2(%arg0: i32) -> (i32, i32) {
    %c0_i32 = arith.constant 0 : i32
    %c0_i32_0 = arith.constant 0 : i32
    %c0_i32_1 = arith.constant 0 : i32
    return %c0_i32, %c0_i32_0 : i32, i32
  }
  func.func @transform_3(%arg0: i32) -> (i32, i32) {
    %c0_i32 = arith.constant 0 : i32
    %c0_i32_0 = arith.constant 0 : i32
    %c0_i32_1 = arith.constant 0 : i32
    return %c0_i32, %c0_i32_0 : i32, i32
  }
  func.func @transform_4(%arg0: i32) -> (i32, i32) {
    %c0_i32 = arith.constant 0 : i32
    %c0_i32_0 = arith.constant 0 : i32
    %c0_i32_1 = arith.constant 0 : i32
    return %c0_i32, %c0_i32_0 : i32, i32
  }
  func.func @transform_5(%arg0: i32) -> (i32, i32) {
    %c0_i32 = arith.constant 0 : i32
    %c0_i32_0 = arith.constant 0 : i32
    %c0_i32_1 = arith.constant 0 : i32
    return %c0_i32, %c0_i32_0 : i32, i32
  }
  func.func @transform_6(%arg0: i32) -> (i32, i32) {
    %c0_i32 = arith.constant 0 : i32
    %c0_i32_0 = arith.constant 0 : i32
    %c0_i32_1 = arith.constant 0 : i32
    return %c0_i32, %c0_i32_0 : i32, i32
  }
  func.func @transform_7(%arg0: i32) -> (i32, i32) {
    %c0_i32 = arith.constant 0 : i32
    %c0_i32_0 = arith.constant 0 : i32
    %c0_i32_1 = arith.constant 0 : i32
    return %c0_i32, %c0_i32_0 : i32, i32
  }
  func.func @transform_8(%arg0: i32) -> (i32, i32) {
    %c0_i32 = arith.constant 0 : i32
    %c0_i32_0 = arith.constant 0 : i32
    %c0_i32_1 = arith.constant 0 : i32
    return %c0_i32, %c0_i32_0 : i32, i32
  }
  func.func @transform_9(%arg0: i32) -> (i32, i32) {
    %c0_i32 = arith.constant 0 : i32
    %c0_i32_0 = arith.constant 0 : i32
    return %arg0, %c0_i32 : i32, i32
  }
}

</mosaic_0001>

<bundles_post_ra>
// kernel: cnn_forward.1
= control target key start
LH: loop header
LB: loop body
LE: loop exit
PB: predicated region body
PF: predicated region fallthrough
CT: control target
= control target key end

     0   :  { %s5680_s30 = smov 0   ;;  %s7587_s0 = inlined_call_operand.vmem [shape: bf16[2048,64], index: 0, kind: input, shape index: {}]   ;;  %s7588_s1 = inlined_call_operand.vmem [shape: bf16[192,256], index: 1, kind: input, shape index: {}]   ;;  %s7589_s2 = inlined_call_operand.vmem [shape: f32[1,256], index: 2, kind: input, shape index: {}]   ;;  %s7590_s3 = inlined_call_operand.vmem [shape: bf16[768,64], index: 3, kind: input, shape index: {}]   ;;  %s7591_s4 = inlined_call_operand.vmem [shape: f32[1,64], index: 4, kind: input, shape index: {}]   ;;  %s7592_s5 = inlined_call_operand.vmem [shape: bf16[704,256], index: 5, kind: input, shape index: {}]   ;;  %s7593_s6 = inlined_call_operand.vmem [shape: f32[1,256], index: 6, kind: input, shape index: {}]   ;;  %s7594_s7 = inlined_call_operand.vmem [shape: bf16[256,128], index: 7, kind: input, shape index: {}]   ;;  %s7595_s8 = inlined_call_operand.vmem [shape: f32[1,128], index: 8, kind: input, shape index: {}]   ;;  %s7596_s9 = inlined_call_operand.vmem [shape: f32[64,128], index: 9, kind: output, shape index: {}]  }
   0x1 LB: > { %s4709_s10 = sadd.s32 4294967295, %s5626_s30   ;;  %p4713_p0 = scmp.ge.s32.totalorder %s5626_s30, 1  ;;  %s5626_s30 = sphi %s5680_s30, %s19_s30  }
   0x2   : > { %p288_p1 = scmp.lt.s32.totalorder %s5626_s30, 3 }
   0x4   : > { %p289_p2 = pnand %p4713_p0, %p288_p1 }
   0x5   : > { %s4714_s11 = sshll.u32 (!%p289_p2), %s4709_s10, 7  ;;  %v5321_v0 = vld [vmem:[%s7588_s1 + $0x4] ss:$8 sps:$4 sm:$0xff] (!%p289_p2)   ;;  %v5323_v1 = vld [vmem:[%s7588_s1] ss:$8 sps:$4 sm:$0xff] (!%p289_p2)   ;;  %vm913_vm0 = vcmask (!%p289_p2), 523264  }
   0x6   : > { %292 = sbr.rel (%p289_p2) target bundleno = 1943 (0x797), region = 56  ;;  %p325_p3 = scmp.lt.s32.totalorder (!%p289_p2), %s4714_s11, 255  ;;  %1453 = vmatprep.subr.bf16.mxu0 (!%p289_p2), %v5321_v0  ;;  %v5324_v2 = vld [vmem:[%s7588_s1 + $0x14] ss:$8 sps:$4 sm:$0xff] (!%p289_p2)   ;;  %v5327_v3 = vld [vmem:[%s7588_s1 + $0x10] ss:$8 sps:$4 sm:$0xff] (!%p289_p2)   ;;  %vm4807_vm1 = vmneg (!%p289_p2), %vm913_vm0 }
   0x7   : > { %1454 = vmatpush1.bf16.msra.mxu0 (!%p289_p2), %v5323_v1  ;;  %v5328_v4 = vld [vmem:[%s7588_s1 + $0x24] ss:$8 sps:$4 sm:$0xff] (!%p289_p2)   ;;  %v5330_v5 = vld [vmem:[%s7588_s1 + $0x20] ss:$8 sps:$4 sm:$0xff] (!%p289_p2)   ;;  %v5331_v6 = vld [vmem:[%s7588_s1 + $0x34] ss:$8 sps:$4 sm:$0xff] (!%p289_p2)  }
   0x8   : > { %1455 = vmatprep.subr.bf16.mxu0 (!%p289_p2), %v5324_v2  ;;  %v5334_v10 = vld [vmem:[%s7588_s1 + $0x30] ss:$8 sps:$4 sm:$0xff] (!%p289_p2)   ;;  %v5335_v12 = vld [vmem:[%s7588_s1 + $0x44] ss:$8 sps:$4 sm:$0xff] (!%p289_p2)   ;;  %v5337_v14 = vld [vmem:[%s7588_s1 + $0x40] ss:$8 sps:$4 sm:$0xff] (!%p289_p2)  }
   0x9   : > { %v5338_v17 = vld [vmem:[%s7588_s1 + $0x54] ss:$8 sps:$4 sm:$0xff] (!%p289_p2)   ;;  %v5341_v19 = vld [vmem:[%s7588_s1 + $0x50] ss:$8 sps:$4 sm:$0xff] (!%p289_p2)   ;;  %v5342_v20 = vld [vmem:[%s7588_s1 + $0x64] ss:$8 sps:$4 sm:$0xff] (!%p289_p2)  }
   0xa   : > { %v5344_v23 = vld [vmem:[%s7588_s1 + $0x60] ss:$8 sps:$4 sm:$0xff] (!%p289_p2)   ;;  %v5345_v24 = vld [vmem:[%s7588_s1 + $0x74] ss:$8 sps:$4 sm:$0xff] (!%p289_p2)   ;;  %v5348_v27 = vld [vmem:[%s7588_s1 + $0x70] ss:$8 sps:$4 sm:$0xff] (!%p289_p2)  }
   0xb   : > { %1456 = vmatpush1.bf16.msra.mxu0 (!%p289_p2), %v5327_v3  ;;  %v5349_v28 = vld [vmem:[%s7588_s1 + $0x84] ss:$8 sps:$4 sm:$0xff] (!%p289_p2)   ;;  %v5351_v30 = vld [vmem:[%s7588_s1 + $0x80] ss:$8 sps:$4 sm:$0xff] (!%p289_p2)   ;;  %v5352_v32 = vld [vmem:[%s7588_s1 + $0x94] ss:$8 sps:$4 sm:$0xff] (!%p289_p2)  }
   0xc   : > { %1457 = vmatprep.subr.bf16.mxu0 (!%p289_p2), %v5328_v4  ;;  %v5355_v33 = vld [vmem:[%s7588_s1 + $0x90] ss:$8 sps:$4 sm:$0xff] (!%p289_p2)   ;;  %v5356_v35 = vld [vmem:[%s7588_s1 + $0xa4] ss:$8 sps:$4 sm:$0xff] (!%p289_p2)   ;;  %v5358_v38 = vld [vmem:[%s7588_s1 + $0xa0] ss:$8 sps:$4 sm:$0xff] (!%p289_p2)  }
   0xd   : > { %s7600_s11 = smov (!%p325_p3, %s4714_s11), 255  ;;  %v5359_v40 = vld [vmem:[%s7588_s1 + $0xb4] ss:$8 sps:$4 sm:$0xff]   ;;  %v5362_v42 = vld [vmem:[%s7588_s1 + $0xb0] ss:$8 sps:$4 sm:$0xff]   ;;  %v5383_v3 = vld [vmem:[%s7590_s3] sm:$0xff]  }
   0xe   : > { %s4715_s22 = sshll.u32 %s7600_s11, 2  ;;  %s5628_s11 = smov 64   ;;  %v5629_v4 = vmov 0  }
   0xf   : > { %s5708_s25 = scalar_lea.vmem %s7587_s0, %s4715_s22  ;;  %1458 = vmatpush1.bf16.msra.mxu0 %v5330_v5  ;;  %2985 = vmatprep.subr.bf16.mxu1 %v5629_v4  ;;  %s4716_s13 = sshll.u32 %s4709_s10, 2 }
  0x10   : > { %v5717_v7 = vld [vmem:[%s5708_s25] sm:$0xff]   ;;  %v5720_v8 = vld [vmem:[%s5708_s25 + $0x8] sm:$0xff]   ;;  %v5725_v9 = vld [vmem:[%s5708_s25 + $0x10] sm:$0xff]   ;;  %1459 = vmatprep.subr.bf16.mxu0 %v5331_v6  ;;  %2986 = vmatpush1.bf16.msra.mxu1 %v5383_v3  ;;  %p331_p4 = scmp.lt.s32.totalorder %s4716_s13, 7 }
  0x11   : > { %785 = vrot.lane.b32.xlu0 %v5717_v7, %s5628_s11  ;;  %789 = vrot.lane.b32.xlu1 %v5725_v9, %s5628_s11  ;;  %v5733_v11 = vld [vmem:[%s5708_s25 + $0x18] sm:$0xff]   ;;  %v5743_v13 = vld [vmem:[%s5708_s25 + $0x20] sm:$0xff]  }
  0x12   : > { %4806 = vmatprep.mubr.msk.bf16.mxu0 %vm913_vm0, %v5725_v9  ;;  %v5751_v15 = vld [vmem:[%s5708_s25 + $0x28] sm:$0xff]   ;;  %v5756_v16 = vld [vmem:[%s5708_s25 + $0x30] sm:$0xff]   ;;  %v5764_v18 = vld [vmem:[%s5708_s25 + $0x38] sm:$0xff]   ;;  %2987 = vmatprep.subr.bf16.mxu1 %v5629_v4  ;;  %s7602_s13 = smov (!%p331_p4, %s4716_s13), 7 }
  0x13   : > { %1460 = vmatpush1.bf16.msra.mxu0 %v5334_v10  ;;  %v5775_v21 = vld [vmem:[%s5708_s25 + $0x40] sm:$0xff]   ;;  %v5780_v22 = vld [vmem:[%s5708_s25 + $0x48] sm:$0xff]   ;;  %v5791_v25 = vld [vmem:[%s5708_s25 + $0x50] sm:$0xff]   ;;  %3017 = vmatprep.mubr.bf16.mxu1 %v5629_v4  ;;  %s4717_s14 = sshll.u32 %s7602_s13, 3 }
  0x14   : > { %1461 = vmatprep.subr.bf16.mxu0 %v5335_v12  ;;  %v5794_v26 = vld [vmem:[%s5708_s25 + $0x58] sm:$0xff]   ;;  %v5807_v29 = vld [vmem:[%s5708_s25 + $0x60] sm:$0xff]   ;;  %v5815_v31 = vld [vmem:[%s5708_s25 + $0x68] sm:$0xff]   ;;  %s334_s19 = scalar_lea.vmem %s7596_s9, %s4717_s14 }
  0x15   : > { %787 = vrot.lane.b32.xlu0 %v5720_v8, %s5628_s11  ;;  %791 = vrot.lane.b32.xlu1 %v5733_v11, %s5628_s11  ;;  %v5826_v34 = vld [vmem:[%s5708_s25 + $0x70] sm:$0xff]   ;;  %v5834_v36 = vld [vmem:[%s5708_s25 + $0x78] sm:$0xff]  }
  0x16   : > { %v5837_v37 = vld [vmem:[%s5708_s25 + $0x80] sm:$0xff]   ;;  %v5845_v39 = vld [vmem:[%s5708_s25 + $0x88] sm:$0xff]   ;;  %v5853_v41 = vld [vmem:[%s5708_s25 + $0x90] sm:$0xff]  }
  0x17   : > { %1462 = vmatpush1.bf16.msra.mxu0 %v5337_v14  ;;  %v5861_v43 = vld [vmem:[%s5708_s25 + $0x98] sm:$0xff]   ;;  %v5866_v44 = vld [vmem:[%s5708_s25 + $0xa0] sm:$0xff]   ;;  %v5871_v45 = vld [vmem:[%s5708_s25 + $0xa8] sm:$0xff]  }
  0x18   : > { %1463 = vmatprep.subr.bf16.mxu0 %v5338_v17  ;;  %v5880_v46 = vld [vmem:[%s5708_s25 + $0xb0] sm:$0xff]   ;;  %v5885_v47 = vld [vmem:[%s5708_s25 + $0xb8] sm:$0xff]   ;;  %v5890_v48 = vld [vmem:[%s5708_s25 + $0xc0] sm:$0xff]  }
  0x19   : > { %793 = vrot.lane.b32.xlu0 %v5743_v13, %s5628_s11  ;;  %795 = vrot.lane.b32.xlu1 %v5751_v15, %s5628_s11  ;;  %v5895_v49 = vld [vmem:[%s5708_s25 + $0xc8] sm:$0xff]   ;;  %v5900_v50 = vld [vmem:[%s5708_s25 + $0xd0] sm:$0xff]  }
  0x1a   : > { %v5905_v51 = vld [vmem:[%s5708_s25 + $0xd8] sm:$0xff]   ;;  %v5910_v52 = vld [vmem:[%s5708_s25 + $0xe0] sm:$0xff]   ;;  %v5915_v53 = vld [vmem:[%s5708_s25 + $0xe8] sm:$0xff]  }
  0x1b   : > { %1464 = vmatpush1.bf16.msra.mxu0 %v5341_v19  ;;  %v5921_v54 = vld [vmem:[%s5708_s25 + $0xf0] sm:$0xff]   ;;  %v5926_v56 = vld [vmem:[%s5708_s25 + $0xf8] sm:$0xff]   ;;  %v5933_v58 = vld [vmem:[%s5708_s25 + $0x100] sm:$0xff]  }
  0x1c   : > { %1465 = vmatprep.subr.bf16.mxu0 %v5342_v20  ;;  %v5942_v61 = vld [vmem:[%s5708_s25 + $0x108] sm:$0xff]   ;;  %v5951_v0 = vld [vmem:[%s5708_s25 + $0x110] sm:$0xff]   ;;  %v5964_v5 = vld [vmem:[%s5708_s25 + $0x118] sm:$0xff]  }
  0x1d   : > { %797 = vrot.lane.b32.xlu0 %v5756_v16, %s5628_s11  ;;  %799 = vrot.lane.b32.xlu1 %v5764_v18, %s5628_s11  ;;  %v5385_v6 = vld [vmem:[%s7590_s3 + $0x8] sm:$0xff]   ;;  %v5982_v10 = vld [vmem:[%s5708_s25 + $0x120] sm:$0xff]  }
  0x1e   : > { %2988 = vmatpush1.bf16.msra.mxu1 %v5385_v6  ;;  %v5388_v12 = vld [vmem:[%s7590_s3 + $0x18] sm:$0xff]   ;;  %v5389_v17 = vld [vmem:[%s7590_s3 + $0x20] sm:$0xff]   ;;  %v5999_v19 = vld [vmem:[%s5708_s25 + $0x128] sm:$0xff]  }
  0x1f   : > { %1466 = vmatpush1.bf16.msra.mxu0 %v5344_v23  ;;  %2989 = vmatprep.subr.bf16.mxu1 %v5629_v4  ;;  %v5391_v20 = vld [vmem:[%s7590_s3 + $0x28] sm:$0xff]  }
  0x20   : > { %1467 = vmatprep.subr.bf16.mxu0 %v5345_v24  ;;  %v5392_v24 = vld [vmem:[%s7590_s3 + $0x30] sm:$0xff]  }
  0x21   : > { %801 = vrot.lane.b32.xlu0 %v5775_v21, %s5628_s11  ;;  %803 = vrot.lane.b32.xlu1 %v5780_v22, %s5628_s11 }
  0x23   : > { %1468 = vmatpush1.bf16.msra.mxu0 %v5348_v27  ;;  %v6016_v27 = vld [vmem:[%s5708_s25 + $0x130] sm:$0xff]  }
  0x24   : > { %1469 = vmatprep.subr.bf16.mxu0 %v5349_v28  ;;  %v5394_v28 = vld [vmem:[%s7590_s3 + $0x38] sm:$0xff]  }
  0x25   : > { %805 = vrot.lane.b32.xlu0 %v5791_v25, %s5628_s11  ;;  %807 = vrot.lane.b32.xlu1 %v5794_v26, %s5628_s11 }
  0x27   : > { %1470 = vmatpush1.bf16.msra.mxu0 %v5351_v30 }
  0x28   : > { %1471 = vmatprep.subr.bf16.mxu0 %v5352_v32  ;;  %v5395_v32 = vld [vmem:[%s7590_s3 + $0x40] sm:$0xff]  }
  0x29   : > { %809 = vrot.lane.b32.xlu0 %v5807_v29, %s5628_s11  ;;  %811 = vrot.lane.b32.xlu1 %v5815_v31, %s5628_s11 }
  0x2b   : > { %1472 = vmatpush1.bf16.msra.mxu0 %v5355_v33  ;;  %v6033_v33 = vld [vmem:[%s5708_s25 + $0x138] sm:$0xff]  }
  0x2c   : > { %1473 = vmatprep.subr.bf16.mxu0 %v5356_v35  ;;  %v5397_v35 = vld [vmem:[%s7590_s3 + $0x48] sm:$0xff]  }
  0x2d   : > { %813 = vrot.lane.b32.xlu0 %v5826_v34, %s5628_s11  ;;  %815 = vrot.lane.b32.xlu1 %v5834_v36, %s5628_s11 }
  0x2f   : > { %1474 = vmatpush1.bf16.msra.mxu0 %v5358_v38 }
  0x30   : > { %1475 = vmatprep.subr.bf16.mxu0 %v5359_v40  ;;  %v6050_v40 = vld [vmem:[%s5708_s25 + $0x140] sm:$0xff]  }
  0x31   : > { %817 = vrot.lane.b32.xlu0 %v5837_v37, %s5628_s11  ;;  %819 = vrot.lane.b32.xlu1 %v5845_v39, %s5628_s11 }
  0x33   : > { %1476 = vmatpush1.bf16.msra.mxu0 %v5362_v42  ;;  %v5400_v42 = vld [vmem:[%s7590_s3 + $0x58] sm:$0xff]  }
  0x35   : > { %821 = vrot.lane.b32.xlu0 %v5853_v41, %s5628_s11  ;;  %823 = vrot.lane.b32.xlu1 %v5861_v43, %s5628_s11 }
  0x39   : > { %825 = vrot.lane.b32.xlu0 %v5866_v44, %s5628_s11  ;;  %827 = vrot.lane.b32.xlu1 %v5871_v45, %s5628_s11 }
  0x3d   : > { %829 = vrot.lane.b32.xlu0 %v5880_v46, %s5628_s11  ;;  %831 = vrot.lane.b32.xlu1 %v5885_v47, %s5628_s11 }
  0x41   : > { %833 = vrot.lane.b32.xlu0 %v5890_v48, %s5628_s11  ;;  %835 = vrot.lane.b32.xlu1 %v5895_v49, %s5628_s11 }
  0x45   : > { %837 = vrot.lane.b32.xlu0 %v5900_v50, %s5628_s11  ;;  %839 = vrot.lane.b32.xlu1 %v5905_v51, %s5628_s11 }
  0x49   : > { %841 = vrot.lane.b32.xlu0 %v5910_v52, %s5628_s11  ;;  %843 = vrot.lane.b32.xlu1 %v5915_v53, %s5628_s11 }
  0x4d   : > { %845 = vrot.lane.b32.xlu0 %v5921_v54, %s5628_s11  ;;  %847 = vrot.lane.b32.xlu1 %v5926_v56, %s5628_s11 }
  0x51   : > { %849 = vrot.lane.b32.xlu0 %v5933_v58, %s5628_s11  ;;  %851 = vrot.lane.b32.xlu1 %v5942_v61, %s5628_s11 }
  0x55   : > { %853 = vrot.lane.b32.xlu0 %v5951_v0, %s5628_s11  ;;  %855 = vrot.lane.b32.xlu1 %v5964_v5, %s5628_s11 }
  0x59   : > { %857 = vrot.lane.b32.xlu0 %v5982_v10, %s5628_s11  ;;  %859 = vrot.lane.b32.xlu1 %v5999_v19, %s5628_s11 }
  0x5d   : > { %861 = vrot.lane.b32.xlu0 %v6016_v27, %s5628_s11  ;;  %863 = vrot.lane.b32.xlu1 %v6033_v33, %s5628_s11 }
  0x61   : > { %865 = vrot.lane.b32.xlu0 %v6050_v40, %s5628_s11 }
  0x83   : > { %v786_v55 = vpop.permute.xlu0 %785  ;;  %v790_v59 = vpop.permute.xlu1 %789 }
  0x84   : > { %4808 = vmatmul.mubr.msk.bf16.vlgmr.msra.gmra.mrb[0].mxu0 %vm4807_vm1, %v786_v55  ;;  %v923_v60 = vsel %vm913_vm0, %v5717_v7, %v790_v59 }
  0x85   : > { %4809 = vmatprep.mubr.msk.bf16.mxu0 %vm913_vm0, %v5733_v11 }
  0x87   : > { %v788_v57 = vpop.permute.xlu0 %787  ;;  %v792_v62 = vpop.permute.xlu1 %791 }
  0x88   : > { %v927_v63 = vsel %vm913_vm0, %v5720_v8, %v792_v62 }
  0x8b   : > { %v794_v1 = vpop.permute.xlu0 %793  ;;  %v796_v7 = vpop.permute.xlu1 %795 }
  0x8c   : > { %4811 = vmatmul.mubr.msk.bf16.gmra.mrb[4].mxu0 %vm4807_vm1, %v788_v57  ;;  %v931_v2 = vsel %vm913_vm0, %v5725_v9, %v794_v1  ;;  %v935_v8 = vsel %vm913_vm0, %v5733_v11, %v796_v7  ;;  %v5386_v9 = vld [vmem:[%s7590_s3 + $0x10] sm:$0xff]   ;;  %v5401_v57 = vld [vmem:[%s7590_s3 + $0x60] sm:$0xff]   ;;  %v6102_v7 = vld [vmem:[%s5708_s25 + $0x158] sm:$0xff]  }
  0x8d   : > { %4812 = vmatprep.mubr.msk.bf16.mxu0 %vm913_vm0, %v5743_v13  ;;  %2990 = vmatpush1.bf16.msra.mxu1 %v5386_v9 }
  0x8e   : > { %2991 = vmatprep.subr.bf16.mxu1 %v5629_v4 }
  0x8f   : > { %v798_v11 = vpop.permute.xlu0 %797 }
  0x90   : > { %v939_v14 = vsel %vm913_vm0, %v5743_v13, %v798_v11  ;;  %v800_v13 = vpop.permute.xlu1 %799 }
  0x91   : > { %2992 = vmatpush1.bf16.msra.mxu1 %v5388_v12  ;;  %v943_v23 = vsel %vm913_vm0, %v5751_v15, %v800_v13  ;;  %v6112_v12 = vld [vmem:[%s5708_s25 + $0x160] sm:$0xff]   ;;  %v6130_v13 = vld [vmem:[%s5708_s25 + $0x170] sm:$0xff]  }
  0x92   : > { %2993 = vmatprep.subr.bf16.mxu1 %v5629_v4 }
  0x94   : > { %1506 = vmatmul.mubr.bf16.gmra.mrb[8].mxu0 %v923_v60  ;;  %v6070_v60 = vld [vmem:[%s5708_s25 + $0x148] sm:$0xff]  }
  0x95   : > { %4813 = vmatprep.mubr.msk.bf16.mxu0 %vm913_vm0, %v5751_v15  ;;  %2994 = vmatpush1.bf16.msra.mxu1 %v5389_v17  ;;  %v802_v15 = vpop.permute.xlu0 %801  ;;  %v6121_v17 = vld [vmem:[%s5708_s25 + $0x168] sm:$0xff]  }
  0x96   : > { %2995 = vmatprep.subr.bf16.mxu1 %v5629_v4  ;;  %v947_v30 = vsel %vm913_vm0, %v5756_v16, %v802_v15  ;;  %867 = vrot.lane.b32.xlu1 %v6070_v60, %s5628_s11  ;;  %v6148_v15 = vld [vmem:[%s5708_s25 + $0x180] sm:$0xff]  }
  0x99   : > { %2996 = vmatpush1.bf16.msra.mxu1 %v5391_v20 }
  0x9a   : > { %2997 = vmatprep.subr.bf16.mxu1 %v5629_v4  ;;  %871 = vrot.lane.b32.xlu1 %v6102_v7, %s5628_s11 }
  0x9c   : > { %1516 = vmatmul.mubr.bf16.gmra.mrb[12].mxu0 %v927_v63  ;;  %v5404_v63 = vld [vmem:[%s7590_s3 + $0x70] sm:$0xff]  }
  0x9d   : > { %4814 = vmatprep.mubr.msk.bf16.mxu0 %vm913_vm0, %v5756_v16  ;;  %2998 = vmatpush1.bf16.msra.mxu1 %v5392_v24  ;;  %v804_v16 = vpop.permute.xlu1 %803  ;;  %v6139_v24 = vld [vmem:[%s5708_s25 + $0x178] sm:$0xff]  }
  0x9e   : > { %2999 = vmatprep.subr.bf16.mxu1 %v5629_v4  ;;  %v951_v38 = vsel %vm913_vm0, %v5764_v18, %v804_v16  ;;  %875 = vrot.lane.b32.xlu1 %v6121_v17, %s5628_s11  ;;  %v6166_v16 = vld [vmem:[%s5708_s25 + $0x190] sm:$0xff]  }
  0xa1   : > { %3000 = vmatpush1.bf16.msra.mxu1 %v5394_v28  ;;  %v808_v59 = vpop.permute.xlu1 %807 }
  0xa2   : > { %3001 = vmatprep.subr.bf16.mxu1 %v5629_v4  ;;  %v959_v62 = vsel %vm913_vm0, %v5780_v22, %v808_v59  ;;  %879 = vrot.lane.b32.xlu1 %v6139_v24, %s5628_s11 }
  0xa4   : > { %1526 = vmatmul.mubr.bf16.gmra.mrb[16].mxu0 %v931_v2  ;;  %v6087_v2 = vld [vmem:[%s5708_s25 + $0x150] sm:$0xff]  }
  0xa5   : > { %4815 = vmatprep.mubr.msk.bf16.mxu0 %vm913_vm0, %v5764_v18  ;;  %3002 = vmatpush1.bf16.msra.mxu1 %v5395_v32  ;;  %v806_v18 = vpop.permute.xlu0 %805  ;;  %v812_v6 = vpop.permute.xlu1 %811  ;;  %v6157_v32 = vld [vmem:[%s5708_s25 + $0x188] sm:$0xff]  }
  0xa6   : > { %3003 = vmatprep.subr.bf16.mxu1 %v5629_v4  ;;  %v955_v55 = vsel %vm913_vm0, %v5775_v21, %v806_v18  ;;  %869 = vrot.lane.b32.xlu0 %v6087_v2, %s5628_s11  ;;  %v6184_v18 = vld [vmem:[%s5708_s25 + $0x1a0] sm:$0xff]  }
  0xa7   : > { %883 = vrot.lane.b32.xlu1 %v6157_v32, %s5628_s11 }
  0xa9   : > { %3004 = vmatpush1.bf16.msra.mxu1 %v5397_v35  ;;  %v810_v1 = vpop.permute.xlu0 %809 }
  0xaa   : > { %3005 = vmatprep.subr.bf16.mxu1 %v5629_v4  ;;  %v963_v3 = vsel %vm913_vm0, %v5791_v25, %v810_v1  ;;  %873 = vrot.lane.b32.xlu0 %v6112_v12, %s5628_s11  ;;  %v5419_v1 = vld [vmem:[%s5708_s25 + $0x1b8] sm:$0xff]  }
  0xac   : > { %1536 = vmatmul.mubr.bf16.gmra.mrb[20].mxu0 %v935_v8 }
  0xad   : > { %4816 = vmatprep.mubr.msk.bf16.mxu0 %vm913_vm0, %v5775_v21  ;;  %v5403_v21 = vld [vmem:[%s7590_s3 + $0x68] sm:$0xff]   ;;  %v814_v9 = vpop.permute.xlu0 %813 }
  0xae   : > { %v971_v11 = vsel %vm913_vm0, %v5807_v29, %v814_v9  ;;  %877 = vrot.lane.b32.xlu0 %v6130_v13, %s5628_s11 }
  0xb2   : > { %881 = vrot.lane.b32.xlu0 %v6148_v15, %s5628_s11 }
  0xb4   : > { %1546 = vmatmul.mubr.bf16.gmra.mrb[24].mxu0 %v939_v14  ;;  %v816_v14 = vpop.permute.xlu1 %815 }
  0xb5   : > { %4817 = vmatprep.mubr.msk.bf16.mxu0 %vm913_vm0, %v5780_v22  ;;  %v5406_v22 = vld [vmem:[%s7590_s3 + $0x78] sm:$0xff]   ;;  %v975_v20 = vsel %vm913_vm0, %v5815_v31, %v816_v14 }
  0xb6   : > { %885 = vrot.lane.b32.xlu0 %v6166_v16, %s5628_s11 }
  0xba   : > { %889 = vrot.lane.b32.xlu0 %v6184_v18, %s5628_s11 }
  0xbc   : > { %1556 = vmatmul.mubr.bf16.gmra.mrb[28].mxu0 %v943_v23 }
  0xbd   : > { %4818 = vmatprep.mubr.msk.bf16.mxu0 %vm913_vm0, %v5791_v25  ;;  %v5608_v25 = vld [vmem:[%s5708_s25 + $0x58] sm:$0xff]  }
  0xbe   : > { %v967_v8 = vsel %vm913_vm0, %v5608_v25, %v812_v6  ;;  %v5420_v6 = vld [vmem:[%s5708_s25 + $0x1c0] sm:$0xff]  }
  0xc4   : > { %1566 = vmatmul.mubr.bf16.gmra.mrb[32].mxu0 %v947_v30 }
  0xc5   : > { %4819 = vmatprep.mubr.msk.bf16.mxu0 %vm913_vm0, %v5794_v26  ;;  %v5398_v26 = vld [vmem:[%s7590_s3 + $0x50] sm:$0xff]  }
  0xc6   : > { %3006 = vmatpush1.bf16.msra.mxu1 %v5398_v26  ;;  %v6175_v26 = vld [vmem:[%s5708_s25 + $0x198] sm:$0xff]  }
  0xc7   : > { %3007 = vmatprep.subr.bf16.mxu1 %v5629_v4  ;;  %887 = vrot.lane.b32.xlu1 %v6175_v26, %s5628_s11 }
  0xca   : > { %3008 = vmatpush1.bf16.msra.mxu1 %v5400_v42 }
  0xcb   : > { %3009 = vmatprep.subr.bf16.mxu1 %v5629_v4 }
  0xcc   : > { %1576 = vmatmul.mubr.bf16.gmra.mrb[36].mxu0 %v951_v38 }
  0xcd   : > { %4820 = vmatprep.mubr.msk.bf16.mxu0 %vm913_vm0, %v5807_v29  ;;  %v818_v29 = vpop.permute.xlu0 %817 }
  0xce   : > { %3010 = vmatpush1.bf16.msra.mxu1 %v5401_v57  ;;  %v979_v23 = vsel %vm913_vm0, %v5826_v34, %v818_v29  ;;  %v5417_v57 = vld [vmem:[%s5708_s25 + $0x1a8] sm:$0xff]  }
  0xcf   : > { %3011 = vmatprep.subr.bf16.mxu1 %v5629_v4  ;;  %891 = vrot.lane.b32.xlu1 %v5417_v57, %s5628_s11 }
  0xd2   : > { %3012 = vmatpush1.bf16.msra.mxu1 %v5403_v21 }
  0xd3   : > { %3013 = vmatprep.subr.bf16.mxu1 %v5629_v4  ;;  %895 = vrot.lane.b32.xlu1 %v5419_v1, %s5628_s11 }
  0xd4   : > { %1586 = vmatmul.mubr.bf16.gmra.mrb[40].mxu0 %v955_v55 }
  0xd5   : > { %4821 = vmatprep.mubr.msk.bf16.mxu0 %vm913_vm0, %v5815_v31  ;;  %v820_v31 = vpop.permute.xlu1 %819 }
  0xd6   : > { %3014 = vmatpush1.bf16.msra.mxu1 %v5404_v63  ;;  %v983_v28 = vsel %vm913_vm0, %v5834_v36, %v820_v31 }
  0xd7   : > { %3015 = vmatprep.subr.bf16.mxu1 %v5629_v4 }
  0xda   : > { %3016 = vmatpush1.bf16.msra.mxu1 %v5406_v22  ;;  %v1195_v22 = vlaneseq }
  0xdb   : > { %3194 = vmatprep.subr.bf16.mxu1 %v5629_v4 }
  0xdc   : > { %1596 = vmatmul.mubr.bf16.gmra.mrb[44].mxu0 %v959_v62  ;;  %v5418_v62 = vld [vmem:[%s5708_s25 + $0x1b0] sm:$0xff]  }
  0xdd   : > { %4822 = vmatprep.mubr.msk.bf16.mxu0 %vm913_vm0, %v5826_v34  ;;  %3018 = vmatmul.mubr.bf16.vlgmr.msra.gmra.mrb[0].mxu1 %v5629_v4  ;;  %v822_v34 = vpop.permute.xlu0 %821 }
  0xde   : > { %3025 = vmatprep.mubr.bf16.mxu1 %v5629_v4  ;;  %v987_v30 = vsel %vm913_vm0, %v5837_v37, %v822_v34  ;;  %893 = vrot.lane.b32.xlu0 %v5418_v62, %s5628_s11 }
  0xe2   : > { %897 = vrot.lane.b32.xlu0 %v5420_v6, %s5628_s11 }
  0xe4   : > { %1606 = vmatmul.mubr.bf16.gmra.mrb[48].mxu0 %v963_v3  ;;  %v6208_v3 = vshrl.u32 %v1195_v22, 7 }
  0xe5   : > { %4823 = vmatprep.mubr.msk.bf16.mxu0 %vm913_vm0, %v5834_v36  ;;  %3026 = vmatmul.mubr.bf16.gmra.mrb[4].mxu1 %v5629_v4  ;;  %v824_v36 = vpop.permute.xlu1 %823 }
  0xe6   : > { %v991_v35 = vsel %vm913_vm0, %v5845_v39, %v824_v36  ;;  %v1197_v25 = vsub.s32 0, %v6208_v3  ;;  %v7597_v9 = vsub.s32 1, %v6208_v3 }
  0xec   : > { %1616 = vmatmul.mubr.bf16.gmra.mrb[52].mxu0 %v967_v8 }
  0xed   : > { %4824 = vmatprep.mubr.msk.bf16.mxu0 %vm913_vm0, %v5837_v37  ;;  %v826_v37 = vpop.permute.xlu0 %825 }
  0xee   : > { %v995_v38 = vsel %vm913_vm0, %v5853_v41, %v826_v37 }
  0xf4   : > { %1626 = vmatmul.mubr.bf16.gmra.mrb[56].mxu0 %v971_v11 }
  0xf5   : > { %4825 = vmatprep.mubr.msk.bf16.mxu0 %vm913_vm0, %v5845_v39  ;;  %v828_v39 = vpop.permute.xlu1 %827 }
  0xf6   : > { %v999_v42 = vsel %vm913_vm0, %v5861_v43, %v828_v39 }
  0xfc   : > { %1636 = vmatmul.mubr.bf16.gmra.mrb[60].mxu0 %v975_v20 }
  0xfd   : > { %4826 = vmatprep.mubr.msk.bf16.mxu0 %vm913_vm0, %v5853_v41  ;;  %v830_v41 = vpop.permute.xlu0 %829 }
  0xfe   : > { %v1003_v55 = vsel %vm913_vm0, %v5866_v44, %v830_v41 }
 0x101   : > { %v834_v21 = vpop.permute.xlu0 %833 }
 0x104   : > { %1646 = vmatmul.mubr.bf16.gmra.mrb[64].mxu0 %v979_v23 }
 0x105   : > { %4827 = vmatprep.mubr.msk.bf16.mxu0 %vm913_vm0, %v5861_v43  ;;  %v832_v43 = vpop.permute.xlu1 %831 }
 0x106   : > { %v1007_v59 = vsel %vm913_vm0, %v5871_v45, %v832_v43 }
 0x109   : > { %v836_v63 = vpop.permute.xlu1 %835 }
 0x10c   : > { %1656 = vmatmul.mubr.bf16.gmra.mrb[68].mxu0 %v983_v28 }
 0x10d   : > { %4828 = vmatprep.mubr.msk.bf16.mxu0 %vm913_vm0, %v5866_v44  ;;  %v1011_v44 = vsel %vm913_vm0, %v5880_v46, %v834_v21  ;;  %v840_v20 = vpop.permute.xlu1 %839 }
 0x114   : > { %1666 = vmatmul.mubr.bf16.gmra.mrb[72].mxu0 %v987_v30  ;;  %v1023_v30 = vsel %vm913_vm0, %v5895_v49, %v840_v20  ;;  %v844_v20 = vpop.permute.xlu1 %843 }
 0x115   : > { %4829 = vmatprep.mubr.msk.bf16.mxu0 %vm913_vm0, %v5871_v45  ;;  %v1015_v45 = vsel %vm913_vm0, %v5885_v47, %v836_v63 }
 0x11c   : > { %1676 = vmatmul.mubr.bf16.gmra.mrb[76].mxu0 %v991_v35 }
 0x11d   : > { %4830 = vmatprep.mubr.msk.bf16.mxu0 %vm913_vm0, %v5880_v46  ;;  %v838_v46 = vpop.permute.xlu0 %837 }
 0x11e   : > { %v1019_v8 = vsel %vm913_vm0, %v5890_v48, %v838_v46 }
 0x124   : > { %1686 = vmatmul.mubr.bf16.gmra.mrb[80].mxu0 %v995_v38 }
 0x125   : > { %4831 = vmatprep.mubr.msk.bf16.mxu0 %vm913_vm0, %v5885_v47  ;;  %v1193_v47 = vld [vmem:[%s7589_s2] sm:$0x3] }
 0x126   : > { %v6223_v11 = vrot.slane %v1193_v47, %v1197_v25  ;;  %v6227_v14 = vrot.slane %v1193_v47, %v7597_v9 }
 0x12c   : > { %1696 = vmatmul.mubr.bf16.gmra.mrb[84].mxu0 %v999_v42 }
 0x12d   : > { %4832 = vmatprep.mubr.msk.bf16.mxu0 %vm913_vm0, %v5890_v48  ;;  %v5421_v48 = vld [vmem:[%s5708_s25 + $0x1c8] sm:$0xff]  }
 0x12e   : > { %899 = vrot.lane.b32.xlu1 %v5421_v48, %s5628_s11 }
 0x134   : > { %1706 = vmatmul.mubr.bf16.gmra.mrb[88].mxu0 %v1003_v55  ;;  %v842_v55 = vpop.permute.xlu0 %841 }
 0x135   : > { %4833 = vmatprep.mubr.msk.bf16.mxu0 %vm913_vm0, %v5895_v49  ;;  %v1027_v63 = vsel %vm913_vm0, %v5900_v50, %v842_v55 }
 0x13c   : > { %1716 = vmatmul.mubr.bf16.gmra.mrb[92].mxu0 %v1007_v59 }
 0x13d   : > { %4834 = vmatprep.mubr.msk.bf16.mxu0 %vm913_vm0, %v5900_v50 }
 0x144   : > { %1726 = vmatmul.mubr.bf16.gmra.mrb[96].mxu0 %v1011_v44 }
 0x145   : > { %4835 = vmatprep.mubr.msk.bf16.mxu0 %vm913_vm0, %v5905_v51 }
 0x14c   : > { %1736 = vmatmul.mubr.bf16.gmra.mrb[100].mxu0 %v1015_v45 }
 0x14d   : > { %4836 = vmatprep.mubr.msk.bf16.mxu0 %vm913_vm0, %v5910_v52 }
 0x154   : > { %1746 = vmatmul.mubr.bf16.gmra.mrb[104].mxu0 %v1019_v8 }
 0x155   : > { %4837 = vmatprep.mubr.msk.bf16.mxu0 %vm913_vm0, %v5915_v53 }
 0x157   : > { %v1487_v29 = vpop.f32.mrb[0].mxu0 }
 0x158   : > { %v1488_v23 = vadd.f32 %v1487_v29, %v6223_v11  ;;  %v1489_v31 = vpop.f32.mrb[1].mxu0 }
 0x159   : > { %v1490_v28 = vadd.f32 %v1489_v31, %v6227_v14  ;;  %v1491_v34 = vpop.f32.mrb[2].mxu0 }
 0x15a   : > { %v1492_v36 = vadd.f32 %v1491_v34, %v6223_v11  ;;  %v1493_v35 = vpop.f32.mrb[3].mxu0  ;;  %v2126_v38 = vmax.f32 %v1488_v23, 0.0 }
 0x15b   : > { %v1494_v37 = vadd.f32 %v1493_v35, %v6227_v14  ;;  %v2127_v42 = vmax.f32 %v1490_v28, 0.0 }
 0x15c   : > { %v2128_v39 = vmax.f32 %v1492_v36, 0.0  ;;  %1756 = vmatmul.mubr.bf16.gmra.mrb[108].mxu0 %v1023_v30  ;;  %v1031_v30 = vsel %vm913_vm0, %v5905_v51, %v844_v20 }
 0x15d   : > { %v2129_v41 = vmax.f32 %v1494_v37, 0.0  ;;  %4838 = vmatprep.mubr.msk.bf16.mxu0 %vm913_vm0, %v5921_v54 }
 0x15e   : > { %v2382_v43 = vpack.c.bf16 %v2128_v39, %v2126_v38 }
 0x15f   : > { %v1497_v57 = vpop.f32.mrb[4].mxu0  ;;  %v2383_v59 = vpack.c.bf16 %v2129_v41, %v2127_v42 }
 0x160   : > { %v1498_v21 = vadd.f32 %v1497_v57, %v6223_v11  ;;  %v1499_v49 = vpop.f32.mrb[5].mxu0  ;;  %v846_v57 = vpop.permute.xlu0 %845 }
 0x161   : > { %v1500_v62 = vadd.f32 %v1499_v49, %v6227_v14  ;;  %v1501_v44 = vpop.f32.mrb[6].mxu0 }
 0x162   : > { %v1502_v1 = vadd.f32 %v1501_v44, %v6223_v11  ;;  %v1503_v22 = vpop.f32.mrb[7].mxu0  ;;  %v2130_v46 = vmax.f32 %v1498_v21, 0.0 }
 0x163   : > { %v1504_v45 = vadd.f32 %v1503_v22, %v6227_v14  ;;  %v2131_v8 = vmax.f32 %v1500_v62, 0.0 }
 0x164   : > { %v2132_v6 = vmax.f32 %v1502_v1, 0.0  ;;  %1766 = vmatmul.mubr.bf16.gmra.mrb[112].mxu0 %v1027_v63 }
 0x165   : > { %v2133_v47 = vmax.f32 %v1504_v45, 0.0  ;;  %4839 = vmatprep.mubr.msk.bf16.mxu0 %vm913_vm0, %v5926_v56  ;;  %v1035_v45 = vsel %vm913_vm0, %v5910_v52, %v846_v57 }
 0x166   : > { %v2384_v48 = vpack.c.bf16 %v2132_v6, %v2130_v46 }
 0x167   : > { %v1507_v29 = vpop.f32.mrb[8].mxu0  ;;  %v2385_v23 = vpack.c.bf16 %v2133_v47, %v2131_v8 }
 0x168   : > { %v1508_v31 = vadd.f32 %v1507_v29, %v6223_v11  ;;  %v1509_v50 = vpop.f32.mrb[9].mxu0 }
 0x169   : > { %v1510_v28 = vadd.f32 %v1509_v50, %v6227_v14  ;;  %v1511_v34 = vpop.f32.mrb[10].mxu0 }
 0x16a   : > { %v1512_v36 = vadd.f32 %v1511_v34, %v6223_v11  ;;  %v1513_v35 = vpop.f32.mrb[11].mxu0  ;;  %v2134_v38 = vmax.f32 %v1508_v31, 0.0  ;;  %v848_v31 = vpop.permute.xlu1 %847 }
 0x16b   : > { %v1514_v37 = vadd.f32 %v1513_v35, %v6227_v14  ;;  %v2135_v42 = vmax.f32 %v1510_v28, 0.0 }
 0x16c   : > { %v2136_v39 = vmax.f32 %v1512_v36, 0.0  ;;  %1776 = vmatmul.mubr.bf16.gmra.mrb[116].mxu0 %v1031_v30 }
 0x16d   : > { %v2137_v41 = vmax.f32 %v1514_v37, 0.0  ;;  %4840 = vmatprep.mubr.msk.bf16.mxu0 %vm913_vm0, %v5933_v58 }
 0x16e   : > { %v2386_v55 = vpack.c.bf16 %v2136_v39, %v2134_v38  ;;  %v1039_v38 = vsel %vm913_vm0, %v5915_v53, %v848_v31  ;;  %v850_v53 = vpop.permute.xlu0 %849 }
 0x16f   : > { %v2387_v21 = vpack.c.bf16 %v2137_v41, %v2135_v42  ;;  %v1517_v49 = vpop.f32.mrb[12].mxu0 }
 0x170   : > { %v1518_v62 = vadd.f32 %v1517_v49, %v6223_v11  ;;  %v1519_v51 = vpop.f32.mrb[13].mxu0  ;;  %v6258_v44 = vmax.bf16 %v2386_v55, %v2382_v43 }
 0x171   : > { %v1520_v63 = vadd.f32 %v1519_v51, %v6227_v14  ;;  %v1521_v1 = vpop.f32.mrb[14].mxu0  ;;  %v6261_v22 = vmax.bf16 %v2387_v21, %v2383_v59 }
 0x172   : > { %v1522_v46 = vadd.f32 %v1521_v1, %v6223_v11  ;;  %v1523_v6 = vpop.f32.mrb[15].mxu0  ;;  %v2138_v47 = vmax.f32 %v1518_v62, 0.0 }
 0x173   : > { %v1524_v8 = vadd.f32 %v1523_v6, %v6227_v14  ;;  %3033 = vmatprep.mubr.bf16.mxu1 %v6261_v22  ;;  %v2139_v43 = vmax.f32 %v1520_v63, 0.0 }
 0x174   : > { %v2140_v20 = vmax.f32 %v1522_v46, 0.0  ;;  %1786 = vmatmul.mubr.bf16.gmra.mrb[120].mxu0 %v1035_v45  ;;  %3034 = vmatmul.mubr.bf16.gmra.mrb[8].mxu1 %v6258_v44  ;;  %v1043_v46 = vsel %vm913_vm0, %v5921_v54, %v850_v53 }
 0x175   : > { %v2141_v29 = vmax.f32 %v1524_v8, 0.0  ;;  %4841 = vmatprep.mubr.msk.bf16.mxu0 %vm913_vm0, %v5942_v61 }
 0x176   : > { %v2388_v59 = vpack.c.bf16 %v2140_v20, %v2138_v47 }
 0x177   : > { %v2389_v52 = vpack.c.bf16 %v2141_v29, %v2139_v43  ;;  %v1527_v50 = vpop.f32.mrb[16].mxu0 }
 0x178   : > { %v1528_v28 = vadd.f32 %v1527_v50, %v6223_v11  ;;  %v1529_v34 = vpop.f32.mrb[17].mxu0  ;;  %v6272_v30 = vmax.bf16 %v2388_v59, %v2384_v48 }
 0x179   : > { %v1530_v36 = vadd.f32 %v1529_v34, %v6227_v14  ;;  %v1531_v35 = vpop.f32.mrb[18].mxu0  ;;  %v6275_v37 = vmax.bf16 %v2389_v52, %v2385_v23  ;;  %v852_v52 = vpop.permute.xlu1 %851 }
 0x17a   : > { %v1532_v39 = vadd.f32 %v1531_v35, %v6223_v11  ;;  %v1533_v42 = vpop.f32.mrb[19].mxu0  ;;  %v2142_v55 = vmax.f32 %v1528_v28, 0.0 }
 0x17b   : > { %v1534_v41 = vadd.f32 %v1533_v42, %v6227_v14  ;;  %3041 = vmatprep.mubr.bf16.mxu1 %v6275_v37  ;;  %v2143_v48 = vmax.f32 %v1530_v36, 0.0 }
 0x17c   : > { %v2144_v57 = vmax.f32 %v1532_v39, 0.0  ;;  %1796 = vmatmul.mubr.bf16.gmra.mrb[124].mxu0 %v1039_v38  ;;  %3042 = vmatmul.mubr.bf16.gmra.mrb[12].mxu1 %v6272_v30  ;;  %v1047_v38 = vsel %vm913_vm0, %v5926_v56, %v852_v52 }
 0x17d   : > { %v2145_v21 = vmax.f32 %v1534_v41, 0.0  ;;  %4842 = vmatprep.mubr.msk.bf16.mxu0 %vm913_vm0, %v5951_v0 }
 0x17e   : > { %v6285_v23 = vpack.c.bf16 %v2144_v57, %v2142_v55 }
 0x17f   : > { %v6287_v49 = vpack.c.bf16 %v2145_v21, %v2143_v48  ;;  %v1537_v62 = vpop.f32.mrb[20].mxu0 }
 0x180   : > { %v1538_v51 = vadd.f32 %v1537_v62, %v6223_v11  ;;  %v1539_v63 = vpop.f32.mrb[21].mxu0  ;;  %v854_v62 = vpop.permute.xlu0 %853 }
 0x181   : > { %v1540_v1 = vadd.f32 %v1539_v63, %v6227_v14  ;;  %v1541_v45 = vpop.f32.mrb[22].mxu0 }
 0x182   : > { %v1542_v6 = vadd.f32 %v1541_v45, %v6223_v11  ;;  %v1543_v8 = vpop.f32.mrb[23].mxu0  ;;  %v2146_v20 = vmax.f32 %v1538_v51, 0.0 }
 0x183   : > { %v1544_v47 = vadd.f32 %v1543_v8, %v6227_v14  ;;  %v2147_v29 = vmax.f32 %v1540_v1, 0.0 }
 0x184   : > { %v2148_v43 = vmax.f32 %v1542_v6, 0.0  ;;  %1806 = vmatmul.mubr.bf16.gmra.mrb[128].mxu0 %v1043_v46 }
 0x185   : > { %v2149_v59 = vmax.f32 %v1544_v47, 0.0  ;;  %4843 = vmatprep.mubr.msk.bf16.mxu0 %vm913_vm0, %v5964_v5  ;;  %v1051_v47 = vsel %vm913_vm0, %v5933_v58, %v854_v62 }
 0x186   : > { %v6297_v31 = vpack.c.bf16 %v2148_v43, %v2146_v20 }
 0x187   : > { %v6299_v50 = vpack.c.bf16 %v2149_v59, %v2147_v29  ;;  %v1547_v28 = vpop.f32.mrb[24].mxu0 }
 0x188   : > { %v1548_v54 = vadd.f32 %v1547_v28, %v6223_v11  ;;  %v1549_v34 = vpop.f32.mrb[25].mxu0 }
 0x189   : > { %v1550_v36 = vadd.f32 %v1549_v34, %v6227_v14  ;;  %v1551_v35 = vpop.f32.mrb[26].mxu0 }
 0x18a   : > { %v1552_v39 = vadd.f32 %v1551_v35, %v6223_v11  ;;  %v1553_v42 = vpop.f32.mrb[27].mxu0  ;;  %v2150_v55 = vmax.f32 %v1548_v54, 0.0  ;;  %v856_v54 = vpop.permute.xlu1 %855 }
 0x18b   : > { %v1554_v41 = vadd.f32 %v1553_v42, %v6227_v14  ;;  %v2151_v48 = vmax.f32 %v1550_v36, 0.0 }
 0x18c   : > { %v2152_v57 = vmax.f32 %v1552_v39, 0.0  ;;  %1816 = vmatmul.mubr.bf16.gmra.mrb[132].mxu0 %v1047_v38 }
 0x18d   : > { %v2153_v21 = vmax.f32 %v1554_v41, 0.0  ;;  %4844 = vmatprep.mubr.msk.bf16.mxu0 %vm913_vm0, %v5982_v10 }
 0x18e   : > { %v2394_v53 = vpack.c.bf16 %v2152_v57, %v2150_v55  ;;  %v1055_v55 = vsel %vm913_vm0, %v5942_v61, %v856_v54 }
 0x18f   : > { %v2395_v51 = vpack.c.bf16 %v2153_v21, %v2151_v48  ;;  %v1557_v63 = vpop.f32.mrb[28].mxu0 }
 0x190   : > { %v2514_v1 = vmax.bf16 %v2394_v53, %v6285_v23  ;;  %v1558_v56 = vadd.f32 %v1557_v63, %v6223_v11  ;;  %v1559_v45 = vpop.f32.mrb[29].mxu0  ;;  %v858_v63 = vpop.permute.xlu0 %857 }
 0x191   : > { %v2515_v46 = vmax.bf16 %v2395_v51, %v6287_v49  ;;  %v1560_v6 = vadd.f32 %v1559_v45, %v6227_v14  ;;  %v1561_v8 = vpop.f32.mrb[30].mxu0 }
 0x192   : > { %v1562_v20 = vadd.f32 %v1561_v8, %v6223_v11  ;;  %v1563_v43 = vpop.f32.mrb[31].mxu0  ;;  %v2154_v59 = vmax.f32 %v1558_v56, 0.0 }
 0x193   : > { %v1564_v29 = vadd.f32 %v1563_v43, %v6227_v14  ;;  %v2155_v23 = vmax.f32 %v1560_v6, 0.0 }
 0x194   : > { %v2156_v52 = vmax.f32 %v1562_v20, 0.0  ;;  %1826 = vmatmul.mubr.bf16.gmra.mrb[136].mxu0 %v1051_v47 }
 0x195   : > { %v2157_v28 = vmax.f32 %v1564_v29, 0.0  ;;  %4845 = vmatprep.mubr.msk.bf16.mxu0 %vm913_vm0, %v5999_v19  ;;  %v1059_v29 = vsel %vm913_vm0, %v5951_v0, %v858_v63 }
 0x196   : > { %v2396_v49 = vpack.c.bf16 %v2156_v52, %v2154_v59 }
 0x197   : > { %v2397_v34 = vpack.c.bf16 %v2157_v28, %v2155_v23  ;;  %v1567_v36 = vpop.f32.mrb[32].mxu0 }
 0x198   : > { %v2516_v35 = vmax.bf16 %v2396_v49, %v6297_v31  ;;  %v1568_v58 = vadd.f32 %v1567_v36, %v6223_v11  ;;  %v1569_v38 = vpop.f32.mrb[33].mxu0 }
 0x199   : > { %v2517_v39 = vmax.bf16 %v2397_v34, %v6299_v50  ;;  %v1570_v42 = vadd.f32 %v1569_v38, %v6227_v14  ;;  %v1571_v41 = vpop.f32.mrb[34].mxu0  ;;  %v860_v34 = vpop.permute.xlu1 %859 }
 0x19a   : > { %v1572_v57 = vadd.f32 %v1571_v41, %v6223_v11  ;;  %v1573_v48 = vpop.f32.mrb[35].mxu0  ;;  %v2158_v53 = vmax.f32 %v1568_v58, 0.0 }
 0x19b   : > { %v1574_v21 = vadd.f32 %v1573_v48, %v6227_v14  ;;  %v2159_v31 = vmax.f32 %v1570_v42, 0.0  ;;  %v1063_v48 = vsel %vm913_vm0, %v5964_v5, %v860_v34  ;;  %v862_v5 = vpop.permute.xlu0 %861 }
 0x19c   : > { %v2160_v62 = vmax.f32 %v1572_v57, 0.0  ;;  %1836 = vmatmul.mubr.bf16.gmra.mrb[140].mxu0 %v1055_v55 }
 0x19d   : > { %v2161_v51 = vmax.f32 %v1574_v21, 0.0  ;;  %4846 = vmatprep.mubr.msk.bf16.mxu0 %vm913_vm0, %v6016_v27 }
 0x19e   : > { %v2398_v50 = vpack.c.bf16 %v2160_v62, %v2158_v53 }
 0x19f   : > { %v2399_v56 = vpack.c.bf16 %v2161_v51, %v2159_v31  ;;  %v1577_v45 = vpop.f32.mrb[36].mxu0 }
 0x1a0   : > { %v1578_v6 = vadd.f32 %v1577_v45, %v6223_v11  ;;  %v1579_v61 = vpop.f32.mrb[37].mxu0  ;;  %v6330_v8 = vmax.bf16 %v2514_v1, %v2398_v50 }
 0x1a1   : > { %v1580_v47 = vadd.f32 %v1579_v61, %v6227_v14  ;;  %v1581_v20 = vpop.f32.mrb[38].mxu0  ;;  %v6333_v43 = vmax.bf16 %v2515_v46, %v2399_v56 }
 0x1a2   : > { %v1582_v59 = vadd.f32 %v1581_v20, %v6223_v11  ;;  %v1583_v52 = vpop.f32.mrb[39].mxu0  ;;  %v2162_v28 = vmax.f32 %v1578_v6, 0.0  ;;  %v1067_v20 = vsel %vm913_vm0, %v5982_v10, %v862_v5  ;;  %v866_v5 = vpop.permute.xlu0 %865 }
 0x1a3   : > { %v1584_v23 = vadd.f32 %v1583_v52, %v6227_v14  ;;  %3049 = vmatprep.mubr.bf16.mxu1 %v6333_v43  ;;  %v2163_v1 = vmax.f32 %v1580_v47, 0.0 }
 0x1a4   : > { %v2164_v49 = vmax.f32 %v1582_v59, 0.0  ;;  %1846 = vmatmul.mubr.bf16.gmra.mrb[144].mxu0 %v1059_v29  ;;  %3050 = vmatmul.mubr.bf16.gmra.mrb[16].mxu1 %v6330_v8 }
 0x1a5   : > { %v2165_v54 = vmax.f32 %v1584_v23, 0.0  ;;  %4847 = vmatprep.mubr.msk.bf16.mxu0 %vm913_vm0, %v6033_v33 }
 0x1a6   : > { %v2400_v46 = vpack.c.bf16 %v2164_v49, %v2162_v28 }
 0x1a7   : > { %v2401_v0 = vpack.c.bf16 %v2165_v54, %v2163_v1  ;;  %v1587_v36 = vpop.f32.mrb[40].mxu0 }
 0x1a8   : > { %v1588_v58 = vadd.f32 %v1587_v36, %v6223_v11  ;;  %v1589_v38 = vpop.f32.mrb[41].mxu0  ;;  %v6344_v42 = vmax.bf16 %v2516_v35, %v2400_v46  ;;  %v864_v46 = vpop.permute.xlu1 %863 }
 0x1a9   : > { %v1590_v41 = vadd.f32 %v1589_v38, %v6227_v14  ;;  %v1591_v55 = vpop.f32.mrb[42].mxu0  ;;  %v6347_v57 = vmax.bf16 %v2517_v39, %v2401_v0 }
 0x1aa   : > { %v1592_v21 = vadd.f32 %v1591_v55, %v6223_v11  ;;  %v1593_v53 = vpop.f32.mrb[43].mxu0  ;;  %v2166_v31 = vmax.f32 %v1588_v58, 0.0 }
 0x1ab   : > { %v1594_v62 = vadd.f32 %v1593_v53, %v6227_v14  ;;  %3057 = vmatprep.mubr.bf16.mxu1 %v6347_v57  ;;  %v2167_v35 = vmax.f32 %v1590_v41, 0.0  ;;  %v1071_v41 = vsel %vm913_vm0, %v5999_v19, %v864_v46 }
 0x1ac   : > { %v2168_v51 = vmax.f32 %v1592_v21, 0.0  ;;  %1856 = vmatmul.mubr.bf16.gmra.mrb[148].mxu0 %v1063_v48  ;;  %3058 = vmatmul.mubr.bf16.gmra.mrb[20].mxu1 %v6344_v42 }
 0x1ad   : > { %v2169_v50 = vmax.f32 %v1594_v62, 0.0  ;;  %4848 = vmatprep.mubr.msk.bf16.mxu0 %vm913_vm0, %v6050_v40 }
 0x1ae   : > { %v6357_v39 = vpack.c.bf16 %v2168_v51, %v2166_v31 }
 0x1af   : > { %v6359_v63 = vpack.c.bf16 %v2169_v50, %v2167_v35  ;;  %v1597_v56 = vpop.f32.mrb[44].mxu0  ;;  %v6382_v35 = vld [vmem:[%s5708_s25 + $0x1d0] sm:$0xff]  }
 0x1b0   : > { %v1598_v45 = vadd.f32 %v1597_v56, %v6223_v11  ;;  %v1599_v6 = vpop.f32.mrb[45].mxu0  ;;  %901 = vrot.lane.b32.xlu0 %v6382_v35, %s5628_s11 }
 0x1b1   : > { %v1600_v61 = vadd.f32 %v1599_v6, %v6227_v14  ;;  %v1601_v47 = vpop.f32.mrb[46].mxu0 }
 0x1b2   : > { %v1602_v29 = vadd.f32 %v1601_v47, %v6223_v11  ;;  %v1603_v59 = vpop.f32.mrb[47].mxu0  ;;  %v2170_v23 = vmax.f32 %v1598_v45, 0.0 }
 0x1b3   : > { %v1604_v52 = vadd.f32 %v1603_v59, %v6227_v14  ;;  %v2171_v49 = vmax.f32 %v1600_v61, 0.0  ;;  %v1075_v59 = vsel %vm913_vm0, %v6016_v27, %v866_v5 }
 0x1b4   : > { %v2172_v28 = vmax.f32 %v1602_v29, 0.0  ;;  %1866 = vmatmul.mubr.bf16.gmra.mrb[152].mxu0 %v1067_v20 }
 0x1b5   : > { %v2173_v1 = vmax.f32 %v1604_v52, 0.0  ;;  %4849 = vmatprep.mubr.msk.bf16.mxu0 %vm913_vm0, %v6070_v60 }
 0x1b6   : > { %v6369_v54 = vpack.c.bf16 %v2172_v28, %v2170_v23 }
 0x1b7   : > { %v6371_v34 = vpack.c.bf16 %v2173_v1, %v2171_v49  ;;  %v1607_v10 = vpop.f32.mrb[48].mxu0 }
 0x1b8   : > { %v1608_v0 = vadd.f32 %v1607_v10, %v6223_v11  ;;  %v1609_v36 = vpop.f32.mrb[49].mxu0 }
 0x1b9   : > { %v1610_v58 = vadd.f32 %v1609_v36, %v6227_v14  ;;  %v1611_v38 = vpop.f32.mrb[50].mxu0 }
 0x1ba   : > { %v1612_v55 = vadd.f32 %v1611_v38, %v6223_v11  ;;  %v1613_v48 = vpop.f32.mrb[51].mxu0  ;;  %v2174_v53 = vmax.f32 %v1608_v0, 0.0  ;;  %v868_v0 = vpop.permute.xlu1 %867 }
 0x1bb   : > { %v1614_v21 = vadd.f32 %v1613_v48, %v6227_v14  ;;  %v2175_v31 = vmax.f32 %v1610_v58, 0.0 }
 0x1bc   : > { %v2176_v62 = vmax.f32 %v1612_v55, 0.0  ;;  %1876 = vmatmul.mubr.bf16.gmra.mrb[156].mxu0 %v1071_v41 }
 0x1bd   : > { %v2177_v51 = vmax.f32 %v1614_v21, 0.0  ;;  %4850 = vmatprep.mubr.msk.bf16.mxu0 %vm913_vm0, %v6087_v2 }
 0x1be   : > { %v2406_v50 = vpack.c.bf16 %v2176_v62, %v2174_v53  ;;  %v1079_v53 = vsel %vm913_vm0, %v6033_v33, %v868_v0 }
 0x1bf   : > { %v2407_v56 = vpack.c.bf16 %v2177_v51, %v2175_v31  ;;  %v1617_v45 = vpop.f32.mrb[52].mxu0 }
 0x1c0   : > { %v2522_v19 = vmax.bf16 %v2406_v50, %v6357_v39  ;;  %v1618_v6 = vadd.f32 %v1617_v45, %v6223_v11  ;;  %v1619_v61 = vpop.f32.mrb[53].mxu0 }
 0x1c1   : > { %v2523_v47 = vmax.bf16 %v2407_v56, %v6359_v63  ;;  %v1620_v20 = vadd.f32 %v1619_v61, %v6227_v14  ;;  %v1621_v29 = vpop.f32.mrb[54].mxu0  ;;  %v6397_v63 = vld [vmem:[%s5708_s25 + $0x1d8] sm:$0xff]  }
 0x1c2   : > { %v1622_v52 = vadd.f32 %v1621_v29, %v6223_v11  ;;  %v1623_v23 = vpop.f32.mrb[55].mxu0  ;;  %v2178_v49 = vmax.f32 %v1618_v6, 0.0  ;;  %903 = vrot.lane.b32.xlu1 %v6397_v63, %s5628_s11  ;;  %v870_v6 = vpop.permute.xlu0 %869 }
 0x1c3   : > { %v1624_v28 = vadd.f32 %v1623_v23, %v6227_v14  ;;  %v2179_v39 = vmax.f32 %v1620_v20, 0.0 }
 0x1c4   : > { %v2180_v1 = vmax.f32 %v1622_v52, 0.0  ;;  %1886 = vmatmul.mubr.bf16.gmra.mrb[160].mxu0 %v1075_v59 }
 0x1c5   : > { %v2181_v46 = vmax.f32 %v1624_v28, 0.0  ;;  %4851 = vmatprep.mubr.msk.bf16.mxu0 %vm913_vm0, %v6102_v7 }
 0x1c6   : > { %v2408_v10 = vpack.c.bf16 %v2180_v1, %v2178_v49  ;;  %v1083_v49 = vsel %vm913_vm0, %v6050_v40, %v870_v6 }
 0x1c7   : > { %v2409_v36 = vpack.c.bf16 %v2181_v46, %v2179_v39  ;;  %v1627_v58 = vpop.f32.mrb[56].mxu0 }
 0x1c8   : > { %v2524_v27 = vmax.bf16 %v2408_v10, %v6369_v54  ;;  %v1628_v38 = vadd.f32 %v1627_v58, %v6223_v11  ;;  %v1629_v41 = vpop.f32.mrb[57].mxu0  ;;  %v872_v58 = vpop.permute.xlu1 %871 }
 0x1c9   : > { %v2525_v55 = vmax.bf16 %v2409_v36, %v6371_v34  ;;  %v1630_v48 = vadd.f32 %v1629_v41, %v6227_v14  ;;  %v1631_v21 = vpop.f32.mrb[58].mxu0  ;;  %v6412_v34 = vld [vmem:[%s5708_s25 + $0x1e0] sm:$0xff]  }
 0x1ca   : > { %v1632_v62 = vadd.f32 %v1631_v21, %v6223_v11  ;;  %v1633_v31 = vpop.f32.mrb[59].mxu0  ;;  %v2182_v50 = vmax.f32 %v1628_v38, 0.0  ;;  %905 = vrot.lane.b32.xlu0 %v6412_v34, %s5628_s11 }
 0x1cb   : > { %v1634_v51 = vadd.f32 %v1633_v31, %v6227_v14  ;;  %v2183_v54 = vmax.f32 %v1630_v48, 0.0 }
 0x1cc   : > { %v2184_v5 = vmax.f32 %v1632_v62, 0.0  ;;  %1896 = vmatmul.mubr.bf16.gmra.mrb[164].mxu0 %v1079_v53 }
 0x1cd   : > { %v2185_v56 = vmax.f32 %v1634_v51, 0.0  ;;  %4852 = vmatprep.mubr.msk.bf16.mxu0 %vm913_vm0, %v6112_v12 }
 0x1ce   : > { %v2410_v45 = vpack.c.bf16 %v2184_v5, %v2182_v50  ;;  %v1087_v50 = vsel %vm913_vm0, %v6070_v60, %v872_v58 }
 0x1cf   : > { %v2411_v61 = vpack.c.bf16 %v2185_v56, %v2183_v54  ;;  %v1637_v20 = vpop.f32.mrb[60].mxu0 }
 0x1d0   : > { %v1638_v33 = vadd.f32 %v1637_v20, %v6223_v11  ;;  %v1639_v29 = vpop.f32.mrb[61].mxu0  ;;  %v6417_v59 = vmax.bf16 %v2522_v19, %v2410_v45  ;;  %v874_v20 = vpop.permute.xlu0 %873 }
 0x1d1   : > { %v1640_v52 = vadd.f32 %v1639_v29, %v6227_v14  ;;  %v1641_v23 = vpop.f32.mrb[62].mxu0  ;;  %v6420_v28 = vmax.bf16 %v2523_v47, %v2411_v61  ;;  %v6431_v47 = vld [vmem:[%s5708_s25 + $0x1e8] sm:$0xff]  }
 0x1d2   : > { %v1642_v1 = vadd.f32 %v1641_v23, %v6223_v11  ;;  %v1643_v39 = vpop.f32.mrb[63].mxu0  ;;  %v2186_v10 = vmax.f32 %v1638_v33, 0.0  ;;  %907 = vrot.lane.b32.xlu1 %v6431_v47, %s5628_s11 }
 0x1d3   : > { %v1644_v46 = vadd.f32 %v1643_v39, %v6227_v14  ;;  %3065 = vmatprep.mubr.bf16.mxu1 %v6420_v28  ;;  %v2187_v19 = vmax.f32 %v1640_v52, 0.0  ;;  %v1091_v39 = vsel %vm913_vm0, %v6087_v2, %v874_v20 }
 0x1d4   : > { %v2188_v0 = vmax.f32 %v1642_v1, 0.0  ;;  %1906 = vmatmul.mubr.bf16.gmra.mrb[168].mxu0 %v1083_v49  ;;  %3066 = vmatmul.mubr.bf16.gmra.mrb[24].mxu1 %v6417_v59 }
 0x1d5   : > { %v2189_v36 = vmax.f32 %v1644_v46, 0.0  ;;  %4853 = vmatprep.mubr.msk.bf16.mxu0 %vm913_vm0, %v6121_v17 }
 0x1d6   : > { %v2412_v40 = vpack.c.bf16 %v2188_v0, %v2186_v10 }
 0x1d7   : > { %v2413_v38 = vpack.c.bf16 %v2189_v36, %v2187_v19  ;;  %v1647_v41 = vpop.f32.mrb[64].mxu0 }
 0x1d8   : > { %v1648_v48 = vadd.f32 %v1647_v41, %v6223_v11  ;;  %v1649_v21 = vpop.f32.mrb[65].mxu0  ;;  %v6436_v53 = vmax.bf16 %v2524_v27, %v2412_v40 }
 0x1d9   : > { %v1650_v62 = vadd.f32 %v1649_v21, %v6227_v14  ;;  %v1651_v31 = vpop.f32.mrb[66].mxu0  ;;  %v6439_v51 = vmax.bf16 %v2525_v55, %v2413_v38  ;;  %v6450_v55 = vld [vmem:[%s5708_s25 + $0x1f0] sm:$0xff]   ;;  %v6467_v38 = vld [vmem:[%s5708_s25 + $0x1f8] sm:$0xff]  }
 0x1da   : > { %v1652_v5 = vadd.f32 %v1651_v31, %v6223_v11  ;;  %v1653_v54 = vpop.f32.mrb[67].mxu0  ;;  %v2190_v45 = vmax.f32 %v1648_v48, 0.0  ;;  %909 = vrot.lane.b32.xlu0 %v6450_v55, %s5628_s11  ;;  %v876_v48 = vpop.permute.xlu1 %875  ;;  %911 = vrot.lane.b32.xlu1 %v6467_v38, %s5628_s11 }
 0x1db   : > { %v1654_v56 = vadd.f32 %v1653_v54, %v6227_v14  ;;  %3073 = vmatprep.mubr.bf16.mxu1 %v6439_v51  ;;  %v2191_v27 = vmax.f32 %v1650_v62, 0.0 }
 0x1dc   : > { %v2192_v6 = vmax.f32 %v1652_v5, 0.0  ;;  %1916 = vmatmul.mubr.bf16.gmra.mrb[172].mxu0 %v1087_v50  ;;  %3074 = vmatmul.mubr.bf16.gmra.mrb[28].mxu1 %v6436_v53 }
 0x1dd   : > { %v2193_v61 = vmax.f32 %v1654_v56, 0.0  ;;  %4854 = vmatprep.mubr.msk.bf16.mxu0 %vm913_vm0, %v6130_v13 }
 0x1de   : > { %v6452_v60 = vpack.c.bf16 %v2192_v6, %v2190_v45 }
 0x1df   : > { %v6454_v33 = vpack.c.bf16 %v2193_v61, %v2191_v27  ;;  %v1657_v29 = vpop.f32.mrb[68].mxu0 }
 0x1e0   : > { %v1658_v52 = vadd.f32 %v1657_v29, %v6223_v11  ;;  %v1659_v23 = vpop.f32.mrb[69].mxu0 }
 0x1e1   : > { %v1660_v49 = vadd.f32 %v1659_v23, %v6227_v14  ;;  %v1661_v1 = vpop.f32.mrb[70].mxu0 }
 0x1e2   : > { %v1662_v46 = vadd.f32 %v1661_v1, %v6223_v11  ;;  %v1663_v10 = vpop.f32.mrb[71].mxu0  ;;  %v2194_v19 = vmax.f32 %v1658_v52, 0.0  ;;  %v878_v52 = vpop.permute.xlu0 %877 }
 0x1e3   : > { %v1664_v0 = vadd.f32 %v1663_v10, %v6227_v14  ;;  %v2195_v40 = vmax.f32 %v1660_v49, 0.0 }
 0x1e4   : > { %v2196_v36 = vmax.f32 %v1662_v46, 0.0  ;;  %1926 = vmatmul.mubr.bf16.gmra.mrb[176].mxu0 %v1091_v39 }
 0x1e5   : > { %v2197_v58 = vmax.f32 %v1664_v0, 0.0  ;;  %4855 = vmatprep.mubr.msk.bf16.mxu0 %vm913_vm0, %v6139_v24  ;;  %v1095_v24 = vsel %vm913_vm0, %v6102_v7, %v876_v48 }
 0x1e6   : > { %v6469_v41 = vpack.c.bf16 %v2196_v36, %v2194_v19  ;;  %v1099_v19 = vsel %vm913_vm0, %v6112_v12, %v878_v52 }
 0x1e7   : > { %v6471_v21 = vpack.c.bf16 %v2197_v58, %v2195_v40  ;;  %v1667_v2 = vpop.f32.mrb[72].mxu0 }
 0x1e8   : > { %v1668_v62 = vadd.f32 %v1667_v2, %v6223_v11  ;;  %v1669_v31 = vpop.f32.mrb[73].mxu0 }
 0x1e9   : > { %v1670_v50 = vadd.f32 %v1669_v31, %v6227_v14  ;;  %v1671_v5 = vpop.f32.mrb[74].mxu0 }
 0x1ea   : > { %v1672_v54 = vadd.f32 %v1671_v5, %v6223_v11  ;;  %v1673_v56 = vpop.f32.mrb[75].mxu0  ;;  %v2198_v6 = vmax.f32 %v1668_v62, 0.0  ;;  %v880_v62 = vpop.permute.xlu1 %879 }
 0x1eb   : > { %v1674_v45 = vadd.f32 %v1673_v56, %v6227_v14  ;;  %v2199_v61 = vmax.f32 %v1670_v50, 0.0 }
 0x1ec   : > { %v2200_v27 = vmax.f32 %v1672_v54, 0.0  ;;  %1936 = vmatmul.mubr.bf16.gmra.mrb[180].mxu0 %v1095_v24 }
 0x1ed   : > { %v2201_v20 = vmax.f32 %v1674_v45, 0.0  ;;  %4856 = vmatprep.mubr.msk.bf16.mxu0 %vm913_vm0, %v6148_v15 }
 0x1ee   : > { %v2418_v29 = vpack.c.bf16 %v2200_v27, %v2198_v6  ;;  %v1103_v6 = vsel %vm913_vm0, %v6121_v17, %v880_v62 }
 0x1ef   : > { %v2419_v23 = vpack.c.bf16 %v2201_v20, %v2199_v61  ;;  %v1677_v49 = vpop.f32.mrb[76].mxu0 }
 0x1f0   : > { %v2530_v1 = vmax.bf16 %v2418_v29, %v6452_v60  ;;  %v1678_v7 = vadd.f32 %v1677_v49, %v6223_v11  ;;  %v1679_v39 = vpop.f32.mrb[77].mxu0 }
 0x1f1   : > { %v2531_v46 = vmax.bf16 %v2419_v23, %v6454_v33  ;;  %v1680_v10 = vadd.f32 %v1679_v39, %v6227_v14  ;;  %v1681_v0 = vpop.f32.mrb[78].mxu0  ;;  %v882_v23 = vpop.permute.xlu0 %881 }
 0x1f2   : > { %v1682_v36 = vadd.f32 %v1681_v0, %v6223_v11  ;;  %v1683_v15 = vpop.f32.mrb[79].mxu0  ;;  %v2202_v58 = vmax.f32 %v1678_v7, 0.0 }
 0x1f3   : > { %v1684_v40 = vadd.f32 %v1683_v15, %v6227_v14  ;;  %v2203_v60 = vmax.f32 %v1680_v10, 0.0  ;;  %v1107_v15 = vsel %vm913_vm0, %v6130_v13, %v882_v23  ;;  %v884_v13 = vpop.permute.xlu1 %883 }
 0x1f4   : > { %v2204_v48 = vmax.f32 %v1682_v36, 0.0  ;;  %1946 = vmatmul.mubr.bf16.gmra.mrb[184].mxu0 %v1099_v19 }
 0x1f5   : > { %v2205_v2 = vmax.f32 %v1684_v40, 0.0  ;;  %4857 = vmatprep.mubr.msk.bf16.mxu0 %vm913_vm0, %v6157_v32 }
 0x1f6   : > { %v2420_v33 = vpack.c.bf16 %v2204_v48, %v2202_v58 }
 0x1f7   : > { %v2421_v31 = vpack.c.bf16 %v2205_v2, %v2203_v60  ;;  %v1687_v50 = vpop.f32.mrb[80].mxu0 }
 0x1f8   : > { %v2532_v5 = vmax.bf16 %v2420_v33, %v6469_v41  ;;  %v1688_v12 = vadd.f32 %v1687_v50, %v6223_v11  ;;  %v1689_v24 = vpop.f32.mrb[81].mxu0 }
 0x1f9   : > { %v2533_v54 = vmax.bf16 %v2421_v31, %v6471_v21  ;;  %v1690_v56 = vadd.f32 %v1689_v24, %v6227_v14  ;;  %v1691_v45 = vpop.f32.mrb[82].mxu0 }
 0x1fa   : > { %v1692_v27 = vadd.f32 %v1691_v45, %v6223_v11  ;;  %v1693_v32 = vpop.f32.mrb[83].mxu0  ;;  %v2206_v20 = vmax.f32 %v1688_v12, 0.0 }
 0x1fb   : > { %v1694_v61 = vadd.f32 %v1693_v32, %v6227_v14  ;;  %v2207_v41 = vmax.f32 %v1690_v56, 0.0 }
 0x1fc   : > { %v2208_v29 = vmax.f32 %v1692_v27, 0.0  ;;  %1956 = vmatmul.mubr.bf16.gmra.mrb[188].mxu0 %v1103_v6  ;;  %v5609_v6 = vld [vmem:[%s5708_s25 + $0x178] sm:$0xff]  }
 0x1fd   : > { %v2209_v52 = vmax.f32 %v1694_v61, 0.0  ;;  %4858 = vmatprep.mubr.msk.bf16.mxu0 %vm913_vm0, %v6166_v16  ;;  %v1111_v27 = vsel %vm913_vm0, %v5609_v6, %v884_v13 }
 0x1fe   : > { %v2422_v21 = vpack.c.bf16 %v2208_v29, %v2206_v20 }
 0x1ff   : > { %v2423_v49 = vpack.c.bf16 %v2209_v52, %v2207_v41  ;;  %v1697_v7 = vpop.f32.mrb[84].mxu0 }
 0x200   : > { %v1698_v39 = vadd.f32 %v1697_v7, %v6223_v11  ;;  %v1699_v17 = vpop.f32.mrb[85].mxu0  ;;  %v6504_v10 = vmax.bf16 %v2530_v1, %v2422_v21  ;;  %v886_v21 = vpop.permute.xlu0 %885 }
 0x201   : > { %v1700_v0 = vadd.f32 %v1699_v17, %v6227_v14  ;;  %v1701_v19 = vpop.f32.mrb[86].mxu0  ;;  %v6507_v36 = vmax.bf16 %v2531_v46, %v2423_v49 }
 0x202   : > { %v1702_v40 = vadd.f32 %v1701_v19, %v6223_v11  ;;  %v1703_v16 = vpop.f32.mrb[87].mxu0  ;;  %v2210_v48 = vmax.f32 %v1698_v39, 0.0  ;;  %v5610_v19 = vld [vmem:[%s5708_s25 + $0x180] sm:$0xff]  }
 0x203   : > { %v1704_v58 = vadd.f32 %v1703_v16, %v6227_v14  ;;  %3081 = vmatprep.mubr.bf16.mxu1 %v6507_v36  ;;  %v2211_v1 = vmax.f32 %v1700_v0, 0.0  ;;  %v5429_v16 = vld [vmem:[%s7590_s3 + $0x88] sm:$0xff]  }
 0x204   : > { %v2212_v60 = vmax.f32 %v1702_v40, 0.0  ;;  %1966 = vmatmul.mubr.bf16.gmra.mrb[192].mxu0 %v1107_v15  ;;  %3082 = vmatmul.mubr.bf16.gmra.mrb[32].mxu1 %v6504_v10  ;;  %v1115_v15 = vsel %vm913_vm0, %v5610_v19, %v886_v21  ;;  %v6565_v21 = vld [vmem:[%s5708_s25 + $0x1b0] sm:$0xff]  }
 0x205   : > { %v2213_v2 = vmax.f32 %v1704_v58, 0.0  ;;  %4859 = vmatprep.mubr.msk.bf16.mxu0 %vm913_vm0, %v6175_v26  ;;  %v5428_v26 = vld [vmem:[%s7590_s3 + $0x80] sm:$0xff]  }
 0x206   : > { %v2424_v46 = vpack.c.bf16 %v2212_v60, %v2210_v48  ;;  %3195 = vmatpush1.bf16.msra.mxu1 %v5428_v26 }
 0x207   : > { %v2425_v33 = vpack.c.bf16 %v2213_v2, %v2211_v1  ;;  %v1707_v62 = vpop.f32.mrb[88].mxu0  ;;  %3196 = vmatprep.subr.bf16.mxu1 %v5629_v4 }
 0x208   : > { %v1708_v31 = vadd.f32 %v1707_v62, %v6223_v11  ;;  %v1709_v50 = vpop.f32.mrb[89].mxu0  ;;  %v6518_v12 = vmax.bf16 %v2532_v5, %v2424_v46  ;;  %v6549_v46 = vld [vmem:[%s5708_s25 + $0x1a8] sm:$0xff]  }
 0x209   : > { %v1710_v24 = vadd.f32 %v1709_v50, %v6227_v14  ;;  %v1711_v56 = vpop.f32.mrb[90].mxu0  ;;  %v6521_v45 = vmax.bf16 %v2533_v54, %v2425_v33  ;;  %v888_v33 = vpop.permute.xlu1 %887 }
 0x20a   : > { %v1712_v32 = vadd.f32 %v1711_v56, %v6223_v11  ;;  %v1713_v61 = vpop.f32.mrb[91].mxu0  ;;  %v2214_v5 = vmax.f32 %v1708_v31, 0.0  ;;  %3197 = vmatpush1.bf16.msra.mxu1 %v5429_v16 }
 0x20b   : > { %v1714_v20 = vadd.f32 %v1713_v61, %v6227_v14  ;;  %3089 = vmatprep.mubr.bf16.mxu1 %v6521_v45  ;;  %v2215_v54 = vmax.f32 %v1710_v24, 0.0  ;;  %3198 = vmatprep.subr.bf16.mxu1 %v5629_v4 }
 0x20c   : > { %v2216_v29 = vmax.f32 %v1712_v32, 0.0  ;;  %1976 = vmatmul.mubr.bf16.gmra.mrb[196].mxu0 %v1111_v27  ;;  %3090 = vmatmul.mubr.bf16.gmra.mrb[36].mxu1 %v6518_v12  ;;  %v5612_v27 = vld [vmem:[%s5708_s25 + $0x188] sm:$0xff]  }
 0x20d   : > { %v2217_v41 = vmax.f32 %v1714_v20, 0.0  ;;  %4860 = vmatprep.mubr.msk.bf16.mxu0 %vm913_vm0, %v6184_v18  ;;  %v1119_v26 = vsel %vm913_vm0, %v5612_v27, %v888_v33 }
 0x20e   : > { %v6535_v52 = vpack.c.bf16 %v2216_v29, %v2214_v5 }
 0x20f   : > { %v6537_v23 = vpack.c.bf16 %v2217_v41, %v2215_v54  ;;  %v1717_v49 = vpop.f32.mrb[92].mxu0 }
 0x210   : > { %v1718_v7 = vadd.f32 %v1717_v49, %v6223_v11  ;;  %v1719_v39 = vpop.f32.mrb[93].mxu0 }
 0x211   : > { %v1720_v17 = vadd.f32 %v1719_v39, %v6227_v14  ;;  %v1721_v0 = vpop.f32.mrb[94].mxu0 }
 0x212   : > { %v1722_v18 = vadd.f32 %v1721_v0, %v6223_v11  ;;  %v1723_v40 = vpop.f32.mrb[95].mxu0  ;;  %v2218_v48 = vmax.f32 %v1718_v7, 0.0  ;;  %v890_v7 = vpop.permute.xlu0 %889  ;;  %v5430_v0 = vld [vmem:[%s7590_s3 + $0x90] sm:$0xff]  }
 0x213   : > { %v1724_v58 = vadd.f32 %v1723_v40, %v6227_v14  ;;  %v2219_v1 = vmax.f32 %v1720_v17, 0.0  ;;  %3199 = vmatpush1.bf16.msra.mxu1 %v5430_v0 }
 0x214   : > { %v2220_v60 = vmax.f32 %v1722_v18, 0.0  ;;  %1986 = vmatmul.mubr.bf16.gmra.mrb[200].mxu0 %v1115_v15  ;;  %3200 = vmatprep.subr.bf16.mxu1 %v5629_v4 }
 0x215   : > { %v2221_v2 = vmax.f32 %v1724_v58, 0.0  ;;  %4861 = vmatprep.mubr.msk.bf16.mxu0 %vm913_vm0, %v6549_v46 }
 0x216   : > { %v6554_v13 = vpack.c.bf16 %v2220_v60, %v2218_v48  ;;  %v5614_v48 = vld [vmem:[%s5708_s25 + $0x190] sm:$0xff]  }
 0x217   : > { %v6556_v62 = vpack.c.bf16 %v2221_v2, %v2219_v1  ;;  %v1727_v31 = vpop.f32.mrb[96].mxu0  ;;  %v1123_v60 = vsel %vm913_vm0, %v5614_v48, %v890_v7  ;;  %v894_v48 = vpop.permute.xlu0 %893 }
 0x218   : > { %v1728_v50 = vadd.f32 %v1727_v31, %v6223_v11  ;;  %v1729_v24 = vpop.f32.mrb[97].mxu0 }
 0x219   : > { %v1730_v56 = vadd.f32 %v1729_v24, %v6227_v14  ;;  %v1731_v6 = vpop.f32.mrb[98].mxu0  ;;  %v6582_v24 = vld [vmem:[%s5708_s25 + $0x1b8] sm:$0xff]  }
 0x21a   : > { %v1732_v32 = vadd.f32 %v1731_v6, %v6223_v11  ;;  %v1733_v61 = vpop.f32.mrb[99].mxu0  ;;  %v2222_v5 = vmax.f32 %v1728_v50, 0.0  ;;  %v892_v6 = vpop.permute.xlu1 %891 }
 0x21b   : > { %v1734_v20 = vadd.f32 %v1733_v61, %v6227_v14  ;;  %v2223_v54 = vmax.f32 %v1730_v56, 0.0 }
 0x21c   : > { %v2224_v29 = vmax.f32 %v1732_v32, 0.0  ;;  %1996 = vmatmul.mubr.bf16.gmra.mrb[204].mxu0 %v1119_v26  ;;  %v5431_v32 = vld [vmem:[%s7590_s3 + $0x98] sm:$0xff]  }
 0x21d   : > { %v2225_v41 = vmax.f32 %v1734_v20, 0.0  ;;  %4862 = vmatprep.mubr.msk.bf16.mxu0 %vm913_vm0, %v6565_v21  ;;  %3201 = vmatpush1.bf16.msra.mxu1 %v5431_v32 }
 0x21e   : > { %v2430_v49 = vpack.c.bf16 %v2224_v29, %v2222_v5  ;;  %3202 = vmatprep.subr.bf16.mxu1 %v5629_v4 }
 0x21f   : > { %v2431_v39 = vpack.c.bf16 %v2225_v41, %v2223_v54  ;;  %v1737_v17 = vpop.f32.mrb[100].mxu0 }
 0x220   : > { %v2538_v19 = vmax.bf16 %v2430_v49, %v6535_v52  ;;  %v1738_v15 = vadd.f32 %v1737_v17, %v6223_v11  ;;  %v1739_v18 = vpop.f32.mrb[101].mxu0  ;;  %v5616_v49 = vld [vmem:[%s5708_s25 + $0x198] sm:$0xff]  }
 0x221   : > { %v2539_v40 = vmax.bf16 %v2431_v39, %v6537_v23  ;;  %v1740_v16 = vadd.f32 %v1739_v18, %v6227_v14  ;;  %v1741_v58 = vpop.f32.mrb[102].mxu0  ;;  %v1127_v7 = vsel %vm913_vm0, %v5616_v49, %v892_v6 }
 0x222   : > { %v1742_v1 = vadd.f32 %v1741_v58, %v6223_v11  ;;  %v1743_v2 = vpop.f32.mrb[103].mxu0  ;;  %v2226_v33 = vmax.f32 %v1738_v15, 0.0 }
 0x223   : > { %v1744_v52 = vadd.f32 %v1743_v2, %v6227_v14  ;;  %v2227_v50 = vmax.f32 %v1740_v16, 0.0  ;;  %v6599_v16 = vld [vmem:[%s5708_s25 + $0x1c0] sm:$0xff]  }
 0x224   : > { %v2228_v31 = vmax.f32 %v1742_v1, 0.0  ;;  %2006 = vmatmul.mubr.bf16.gmra.mrb[208].mxu0 %v1123_v60 }
 0x225   : > { %v2229_v23 = vmax.f32 %v1744_v52, 0.0  ;;  %4863 = vmatprep.mubr.msk.bf16.mxu0 %vm913_vm0, %v6582_v24 }
 0x226   : > { %v2432_v56 = vpack.c.bf16 %v2228_v31, %v2226_v33 }
 0x227   : > { %v2433_v27 = vpack.c.bf16 %v2229_v23, %v2227_v50  ;;  %v1747_v26 = vpop.f32.mrb[104].mxu0 }
 0x228   : > { %v2540_v61 = vmax.bf16 %v2432_v56, %v6554_v13  ;;  %v1748_v20 = vadd.f32 %v1747_v26, %v6223_v11  ;;  %v1749_v5 = vpop.f32.mrb[105].mxu0  ;;  %v5618_v56 = vld [vmem:[%s5708_s25 + $0x1a0] sm:$0xff]  }
 0x229   : > { %v2541_v29 = vmax.bf16 %v2433_v27, %v6556_v62  ;;  %v1750_v54 = vadd.f32 %v1749_v5, %v6227_v14  ;;  %v1751_v41 = vpop.f32.mrb[106].mxu0  ;;  %v1131_v6 = vsel %vm913_vm0, %v5618_v56, %v894_v48 }
 0x22a   : > { %v1752_v39 = vadd.f32 %v1751_v41, %v6223_v11  ;;  %v1753_v17 = vpop.f32.mrb[107].mxu0  ;;  %v2230_v0 = vmax.f32 %v1748_v20, 0.0  ;;  %v6619_v41 = vld [vmem:[%s5708_s25 + $0x1c8] sm:$0xff]  }
 0x22b   : > { %v1754_v13 = vadd.f32 %v1753_v17, %v6227_v14  ;;  %v2231_v18 = vmax.f32 %v1750_v54, 0.0 }
 0x22c   : > { %v2232_v15 = vmax.f32 %v1752_v39, 0.0  ;;  %2016 = vmatmul.mubr.bf16.gmra.mrb[212].mxu0 %v1127_v7  ;;  %v896_v7 = vpop.permute.xlu1 %895 }
 0x22d   : > { %v2233_v62 = vmax.f32 %v1754_v13, 0.0  ;;  %4864 = vmatprep.mubr.msk.bf16.mxu0 %vm913_vm0, %v6599_v16  ;;  %v1135_v48 = vsel %vm913_vm0, %v6549_v46, %v896_v7  ;;  %v898_v46 = vpop.permute.xlu0 %897 }
 0x22e   : > { %v2434_v58 = vpack.c.bf16 %v2232_v15, %v2230_v0 }
 0x22f   : > { %v2435_v60 = vpack.c.bf16 %v2233_v62, %v2231_v18  ;;  %v1757_v1 = vpop.f32.mrb[108].mxu0 }
 0x230   : > { %v1758_v2 = vadd.f32 %v1757_v1, %v6223_v11  ;;  %v1759_v52 = vpop.f32.mrb[109].mxu0  ;;  %v6604_v33 = vmax.bf16 %v2538_v19, %v2434_v58  ;;  %v5432_v19 = vld [vmem:[%s7590_s3 + $0xa0] sm:$0xff]  }
 0x231   : > { %v1760_v31 = vadd.f32 %v1759_v52, %v6227_v14  ;;  %v1761_v50 = vpop.f32.mrb[110].mxu0  ;;  %v6607_v23 = vmax.bf16 %v2539_v40, %v2435_v60  ;;  %3203 = vmatpush1.bf16.msra.mxu1 %v5432_v19 }
 0x232   : > { %v1762_v27 = vadd.f32 %v1761_v50, %v6223_v11  ;;  %v1763_v26 = vpop.f32.mrb[111].mxu0  ;;  %v2234_v20 = vmax.f32 %v1758_v2, 0.0  ;;  %3204 = vmatprep.subr.bf16.mxu1 %v5629_v4 }
 0x233   : > { %v1764_v32 = vadd.f32 %v1763_v26, %v6227_v14  ;;  %3097 = vmatprep.mubr.bf16.mxu1 %v6607_v23  ;;  %v2235_v40 = vmax.f32 %v1760_v31, 0.0 }
 0x234   : > { %v2236_v5 = vmax.f32 %v1762_v27, 0.0  ;;  %2026 = vmatmul.mubr.bf16.gmra.mrb[216].mxu0 %v1131_v6  ;;  %3098 = vmatmul.mubr.bf16.gmra.mrb[40].mxu1 %v6604_v33  ;;  %v5433_v27 = vld [vmem:[%s7590_s3 + $0xa8] sm:$0xff]  }
 0x235   : > { %v2237_v54 = vmax.f32 %v1764_v32, 0.0  ;;  %4865 = vmatprep.mubr.msk.bf16.mxu0 %vm913_vm0, %v6619_v41  ;;  %3205 = vmatpush1.bf16.msra.mxu1 %v5433_v27 }
 0x236   : > { %v2436_v49 = vpack.c.bf16 %v2236_v5, %v2234_v20  ;;  %v1139_v5 = vsel %vm913_vm0, %v6565_v21, %v898_v46  ;;  %3206 = vmatprep.subr.bf16.mxu1 %v5629_v4 }
 0x237   : > { %v2437_v39 = vpack.c.bf16 %v2237_v54, %v2235_v40  ;;  %v1767_v17 = vpop.f32.mrb[112].mxu0 }
 0x238   : > { %v1768_v13 = vadd.f32 %v1767_v17, %v6223_v11  ;;  %v1769_v0 = vpop.f32.mrb[113].mxu0  ;;  %v6625_v15 = vmax.bf16 %v2540_v61, %v2436_v49 }
 0x239   : > { %v1770_v18 = vadd.f32 %v1769_v0, %v6227_v14  ;;  %v1771_v62 = vpop.f32.mrb[114].mxu0  ;;  %v6628_v58 = vmax.bf16 %v2541_v29, %v2437_v39 }
 0x23a   : > { %v1772_v60 = vadd.f32 %v1771_v62, %v6223_v11  ;;  %v1773_v1 = vpop.f32.mrb[115].mxu0  ;;  %v2238_v52 = vmax.f32 %v1768_v13, 0.0 }
 0x23b   : > { %v1774_v2 = vadd.f32 %v1773_v1, %v6227_v14  ;;  %3105 = vmatprep.mubr.bf16.mxu1 %v6628_v58  ;;  %v2239_v61 = vmax.f32 %v1770_v18, 0.0  ;;  %v900_v18 = vpop.permute.xlu1 %899 }
 0x23c   : > { %v2240_v31 = vmax.f32 %v1772_v60, 0.0  ;;  %2036 = vmatmul.mubr.bf16.gmra.mrb[220].mxu0 %v1135_v48  ;;  %3106 = vmatmul.mubr.bf16.gmra.mrb[44].mxu1 %v6625_v15  ;;  %v5434_v48 = vld [vmem:[%s7590_s3 + $0xb0] sm:$0xff]  }
 0x23d   : > { %v2241_v50 = vmax.f32 %v1774_v2, 0.0  ;;  %4866 = vmatprep.mubr.msk.bf16.mxu0 %vm913_vm0, %v6382_v35  ;;  %3207 = vmatpush1.bf16.msra.mxu1 %v5434_v48 }
 0x23e   : > { %v6638_v29 = vpack.c.bf16 %v2240_v31, %v2238_v52  ;;  %v1143_v31 = vsel %vm913_vm0, %v6582_v24, %v900_v18  ;;  %3208 = vmatprep.subr.bf16.mxu1 %v5629_v4 }
 0x23f   : > { %v6640_v56 = vpack.c.bf16 %v2241_v50, %v2239_v61  ;;  %v1777_v6 = vpop.f32.mrb[116].mxu0 }
 0x240   : > { %v1778_v26 = vadd.f32 %v1777_v6, %v6223_v11  ;;  %v1779_v32 = vpop.f32.mrb[117].mxu0 }
 0x241   : > { %v1780_v19 = vadd.f32 %v1779_v32, %v6227_v14  ;;  %v1781_v20 = vpop.f32.mrb[118].mxu0 }
 0x242   : > { %v1782_v40 = vadd.f32 %v1781_v20, %v6223_v11  ;;  %v1783_v54 = vpop.f32.mrb[119].mxu0  ;;  %v2242_v7 = vmax.f32 %v1778_v26, 0.0  ;;  %v902_v20 = vpop.permute.xlu0 %901 }
 0x243   : > { %v1784_v49 = vadd.f32 %v1783_v54, %v6227_v14  ;;  %v2243_v17 = vmax.f32 %v1780_v19, 0.0 }
 0x244   : > { %v2244_v39 = vmax.f32 %v1782_v40, 0.0  ;;  %2046 = vmatmul.mubr.bf16.gmra.mrb[224].mxu0 %v1139_v5 }
 0x245   : > { %v2245_v13 = vmax.f32 %v1784_v49, 0.0  ;;  %4867 = vmatprep.mubr.msk.bf16.mxu0 %vm913_vm0, %v6397_v63 }
 0x246   : > { %v6654_v0 = vpack.c.bf16 %v2244_v39, %v2242_v7 }
 0x247   : > { %v6656_v21 = vpack.c.bf16 %v2245_v13, %v2243_v17  ;;  %v1787_v62 = vpop.f32.mrb[120].mxu0  ;;  %v1147_v13 = vsel %vm913_vm0, %v6599_v16, %v902_v20  ;;  %v904_v16 = vpop.permute.xlu1 %903 }
 0x248   : > { %v1788_v60 = vadd.f32 %v1787_v62, %v6223_v11  ;;  %v1789_v1 = vpop.f32.mrb[121].mxu0 }
 0x249   : > { %v1790_v2 = vadd.f32 %v1789_v1, %v6227_v14  ;;  %v1791_v52 = vpop.f32.mrb[122].mxu0 }
 0x24a   : > { %v1792_v61 = vadd.f32 %v1791_v52, %v6223_v11  ;;  %v1793_v50 = vpop.f32.mrb[123].mxu0  ;;  %v2246_v6 = vmax.f32 %v1788_v60, 0.0 }
 0x24b   : > { %v1794_v46 = vadd.f32 %v1793_v50, %v6227_v14  ;;  %v2247_v26 = vmax.f32 %v1790_v2, 0.0 }
 0x24c   : > { %v2248_v27 = vmax.f32 %v1792_v61, 0.0  ;;  %2056 = vmatmul.mubr.bf16.gmra.mrb[228].mxu0 %v1143_v31 }
 0x24d   : > { %v2249_v32 = vmax.f32 %v1794_v46, 0.0  ;;  %4868 = vmatprep.mubr.msk.bf16.mxu0 %vm913_vm0, %v6412_v34 }
 0x24e   : > { %v2442_v19 = vpack.c.bf16 %v2248_v27, %v2246_v6 }
 0x24f   : > { %v2443_v5 = vpack.c.bf16 %v2249_v32, %v2247_v26  ;;  %v1797_v24 = vpop.f32.mrb[124].mxu0 }
 0x250   : > { %v2546_v40 = vmax.bf16 %v2442_v19, %v6638_v29  ;;  %v1798_v54 = vadd.f32 %v1797_v24, %v6223_v11  ;;  %v1799_v49 = vpop.f32.mrb[125].mxu0  ;;  %v5435_v29 = vld [vmem:[%s7590_s3 + $0xb8] sm:$0xff]   ;;  %v1151_v19 = vsel %vm913_vm0, %v6619_v41, %v904_v16 }
 0x251   : > { %v2547_v7 = vmax.bf16 %v2443_v5, %v6640_v56  ;;  %v1800_v39 = vadd.f32 %v1799_v49, %v6227_v14  ;;  %v1801_v17 = vpop.f32.mrb[126].mxu0  ;;  %3209 = vmatpush1.bf16.msra.mxu1 %v5435_v29 }
 0x252   : > { %v1802_v18 = vadd.f32 %v1801_v17, %v6223_v11  ;;  %v1803_v62 = vpop.f32.mrb[127].mxu0  ;;  %v2250_v60 = vmax.f32 %v1798_v54, 0.0  ;;  %3210 = vmatprep.subr.bf16.mxu1 %v5629_v4  ;;  %v906_v17 = vpop.permute.xlu0 %905 }
 0x253   : > { %v1804_v48 = vadd.f32 %v1803_v62, %v6227_v14  ;;  %v2251_v2 = vmax.f32 %v1800_v39, 0.0 }
 0x254   : > { %v2252_v1 = vmax.f32 %v1802_v18, 0.0  ;;  %2066 = vmatmul.mubr.bf16.gmra.mrb[232].mxu0 %v1147_v13 }
 0x255   : > { %v2253_v56 = vmax.f32 %v1804_v48, 0.0  ;;  %4869 = vmatprep.mubr.msk.bf16.mxu0 %vm913_vm0, %v6431_v47 }
 0x256   : > { %v2444_v52 = vpack.c.bf16 %v2252_v1, %v2250_v60 }
 0x257   : > { %v2445_v31 = vpack.c.bf16 %v2253_v56, %v2251_v2  ;;  %v1807_v61 = vpop.f32.mrb[128].mxu0  ;;  %v1155_v2 = vsel %vm913_vm0, %v6382_v35, %v906_v17 }
 0x258   : > { %v2548_v50 = vmax.bf16 %v2444_v52, %v6654_v0  ;;  %v1808_v46 = vadd.f32 %v1807_v61, %v6223_v11  ;;  %v1809_v6 = vpop.f32.mrb[129].mxu0 }
 0x259   : > { %v2549_v27 = vmax.bf16 %v2445_v31, %v6656_v21  ;;  %v1810_v26 = vadd.f32 %v1809_v6, %v6227_v14  ;;  %v1811_v32 = vpop.f32.mrb[130].mxu0 }
 0x25a   : > { %v1812_v20 = vadd.f32 %v1811_v32, %v6223_v11  ;;  %v1813_v5 = vpop.f32.mrb[131].mxu0  ;;  %v2254_v54 = vmax.f32 %v1808_v46, 0.0  ;;  %v908_v46 = vpop.permute.xlu1 %907 }
 0x25b   : > { %v1814_v24 = vadd.f32 %v1813_v5, %v6227_v14  ;;  %v2255_v0 = vmax.f32 %v1810_v26, 0.0 }
 0x25c   : > { %v2256_v49 = vmax.f32 %v1812_v20, 0.0  ;;  %2076 = vmatmul.mubr.bf16.gmra.mrb[236].mxu0 %v1151_v19 }
 0x25d   : > { %v2257_v39 = vmax.f32 %v1814_v24, 0.0  ;;  %4870 = vmatprep.mubr.msk.bf16.mxu0 %vm913_vm0, %v6450_v55  ;;  %v5436_v55 = vld [vmem:[%s7590_s3 + $0xc0] sm:$0xff]  }
 0x25e   : > { %v2446_v21 = vpack.c.bf16 %v2256_v49, %v2254_v54  ;;  %3211 = vmatpush1.bf16.msra.mxu1 %v5436_v55  ;;  %v1159_v49 = vsel %vm913_vm0, %v6397_v63, %v908_v46 }
 0x25f   : > { %v2447_v13 = vpack.c.bf16 %v2257_v39, %v2255_v0  ;;  %v1817_v18 = vpop.f32.mrb[132].mxu0  ;;  %3212 = vmatprep.subr.bf16.mxu1 %v5629_v4  ;;  %v5437_v39 = vld [vmem:[%s7590_s3 + $0xc8] sm:$0xff]  }
 0x260   : > { %v1818_v62 = vadd.f32 %v1817_v18, %v6223_v11  ;;  %v1819_v41 = vpop.f32.mrb[133].mxu0  ;;  %v6695_v48 = vmax.bf16 %v2546_v40, %v2446_v21  ;;  %v910_v18 = vpop.permute.xlu0 %909 }
 0x261   : > { %v1820_v29 = vadd.f32 %v1819_v41, %v6227_v14  ;;  %v1821_v60 = vpop.f32.mrb[134].mxu0  ;;  %v6698_v1 = vmax.bf16 %v2547_v7, %v2447_v13 }
 0x262   : > { %v1822_v56 = vadd.f32 %v1821_v60, %v6223_v11  ;;  %v1823_v52 = vpop.f32.mrb[135].mxu0  ;;  %v2258_v40 = vmax.f32 %v1818_v62, 0.0  ;;  %3213 = vmatpush1.bf16.msra.mxu1 %v5437_v39 }
 0x263   : > { %v1824_v16 = vadd.f32 %v1823_v52, %v6227_v14  ;;  %3113 = vmatprep.mubr.bf16.mxu1 %v6698_v1  ;;  %v2259_v7 = vmax.f32 %v1820_v29, 0.0  ;;  %3214 = vmatprep.subr.bf16.mxu1 %v5629_v4 }
 0x264   : > { %v2260_v31 = vmax.f32 %v1822_v56, 0.0  ;;  %3114 = vmatmul.mubr.bf16.gmra.mrb[48].mxu1 %v6695_v48  ;;  %2086 = vmatmul.mubr.bf16.gmra.mrb[240].mxu0 %v1155_v2  ;;  %v1163_v56 = vsel %vm913_vm0, %v6412_v34, %v910_v18  ;;  %v5438_v34 = vld [vmem:[%s7590_s3 + $0xd0] sm:$0xff]  }
 0x265   : > { %v2261_v61 = vmax.f32 %v1824_v16, 0.0  ;;  %4871 = vmatprep.mubr.msk.bf16.mxu0 %vm913_vm0, %v6467_v38 }
 0x266   : > { %v2448_v35 = vpack.c.bf16 %v2260_v31, %v2258_v40  ;;  %3215 = vmatpush1.bf16.msra.mxu1 %v5438_v34 }
 0x267   : > { %v2449_v6 = vpack.c.bf16 %v2261_v61, %v2259_v7  ;;  %v1827_v26 = vpop.f32.mrb[136].mxu0  ;;  %3216 = vmatprep.subr.bf16.mxu1 %v5629_v4 }
 0x268   : > { %v1828_v32 = vadd.f32 %v1827_v26, %v6223_v11  ;;  %v1829_v19 = vpop.f32.mrb[137].mxu0  ;;  %v6713_v20 = vmax.bf16 %v2548_v50, %v2448_v35 }
 0x269   : > { %v1830_v5 = vadd.f32 %v1829_v19, %v6227_v14  ;;  %v1831_v24 = vpop.f32.mrb[138].mxu0  ;;  %v6716_v54 = vmax.bf16 %v2549_v27, %v2449_v6  ;;  %v912_v6 = vpop.permute.xlu1 %911 }
 0x26a   : > { %v1832_v38 = vadd.f32 %v1831_v24, %v6223_v11  ;;  %v1833_v0 = vpop.f32.mrb[139].mxu0  ;;  %v2262_v50 = vmax.f32 %v1828_v32, 0.0 }
 0x26b   : > { %v1834_v21 = vadd.f32 %v1833_v0, %v6227_v14  ;;  %3121 = vmatprep.mubr.bf16.mxu1 %v6716_v54  ;;  %v2263_v27 = vmax.f32 %v1830_v5, 0.0 }
 0x26c   : > { %v2264_v17 = vmax.f32 %v1832_v38, 0.0  ;;  %3122 = vmatmul.mubr.bf16.gmra.mrb[52].mxu1 %v6713_v20  ;;  %2096 = vmatmul.mubr.bf16.gmra.mrb[244].mxu0 %v1159_v49  ;;  %v1167_v38 = vsel %vm913_vm0, %v6431_v47, %v912_v6  ;;  %v5439_v47 = vld [vmem:[%s7590_s3 + $0xd8] sm:$0xff]  }
 0x26d   : > { %v2265_v13 = vmax.f32 %v1834_v21, 0.0  ;;  %2105 = vmatprep.mubr.bf16.mxu0 %v5629_v4  ;;  %3217 = vmatpush1.bf16.msra.mxu1 %v5439_v47 }
 0x26e   : > { %v6728_v63 = vpack.c.bf16 %v2264_v17, %v2262_v50  ;;  %3218 = vmatprep.subr.bf16.mxu1 %v5629_v4 }
 0x26f   : > { %v6731_v62 = vpack.c.bf16 %v2265_v13, %v2263_v27  ;;  %v1837_v41 = vpop.f32.mrb[140].mxu0 }
 0x270   : > { %v1838_v29 = vadd.f32 %v1837_v41, %v6223_v11  ;;  %v1839_v60 = vpop.f32.mrb[141].mxu0 }
 0x271   : > { %v1840_v2 = vadd.f32 %v1839_v60, %v6227_v14  ;;  %v1841_v55 = vpop.f32.mrb[142].mxu0 }
 0x272   : > { %v1842_v52 = vadd.f32 %v1841_v55, %v6223_v11  ;;  %v1843_v16 = vpop.f32.mrb[143].mxu0  ;;  %v2266_v31 = vmax.f32 %v1838_v29, 0.0 }
 0x273   : > { %v1844_v40 = vadd.f32 %v1843_v16, %v6227_v14  ;;  %v2267_v61 = vmax.f32 %v1840_v2, 0.0 }
 0x274   : > { %v2268_v7 = vmax.f32 %v1842_v52, 0.0  ;;  %2106 = vmatmul.mubr.bf16.gmra.mrb[248].mxu0 %v1163_v56 }
 0x275   : > { %v2269_v35 = vmax.f32 %v1844_v40, 0.0  ;;  %2115 = vmatprep.mubr.bf16.mxu0 %v5629_v4 }
 0x276   : > { %v6740_v46 = vpack.c.bf16 %v2268_v7, %v2266_v31 }
 0x277   : > { %v6742_v26 = vpack.c.bf16 %v2269_v35, %v2267_v61  ;;  %v1847_v32 = vpop.f32.mrb[144].mxu0 }
 0x278   : > { %v1848_v19 = vadd.f32 %v1847_v32, %v6223_v11  ;;  %v1849_v5 = vpop.f32.mrb[145].mxu0 }
 0x279   : > { %v1850_v24 = vadd.f32 %v1849_v5, %v6227_v14  ;;  %v1851_v49 = vpop.f32.mrb[146].mxu0 }
 0x27a   : > { %v1852_v0 = vadd.f32 %v1851_v49, %v6223_v11  ;;  %v1853_v39 = vpop.f32.mrb[147].mxu0  ;;  %v2270_v50 = vmax.f32 %v1848_v19, 0.0 }
 0x27b   : > { %v1854_v21 = vadd.f32 %v1853_v39, %v6227_v14  ;;  %v2271_v27 = vmax.f32 %v1850_v24, 0.0 }
 0x27c   : > { %v2272_v17 = vmax.f32 %v1852_v0, 0.0  ;;  %2116 = vmatmul.mubr.bf16.gmra.mrb[252].mxu0 %v1167_v38 }
 0x27d   : > { %v2273_v13 = vmax.f32 %v1854_v21, 0.0 }
 0x27e   : > { %v2454_v18 = vpack.c.bf16 %v2272_v17, %v2270_v50  ;;  %v5440_v17 = vld [vmem:[%s7590_s3 + $0xe0] sm:$0xff]  }
 0x27f   : > { %v2455_v41 = vpack.c.bf16 %v2273_v13, %v2271_v27  ;;  %v1857_v29 = vpop.f32.mrb[148].mxu0  ;;  %3219 = vmatpush1.bf16.msra.mxu1 %v5440_v17 }
 0x280   : > { %v2554_v60 = vmax.bf16 %v2454_v18, %v6728_v63  ;;  %v1858_v2 = vadd.f32 %v1857_v29, %v6223_v11  ;;  %v1859_v55 = vpop.f32.mrb[149].mxu0  ;;  %3220 = vmatprep.subr.bf16.mxu1 %v5629_v4 }
 0x281   : > { %v2555_v56 = vmax.bf16 %v2455_v41, %v6731_v62  ;;  %v1860_v52 = vadd.f32 %v1859_v55, %v6227_v14  ;;  %v1861_v16 = vpop.f32.mrb[150].mxu0 }
 0x282   : > { %v1862_v40 = vadd.f32 %v1861_v16, %v6223_v11  ;;  %v1863_v31 = vpop.f32.mrb[151].mxu0  ;;  %v2274_v61 = vmax.f32 %v1858_v2, 0.0 }
 0x283   : > { %v1864_v7 = vadd.f32 %v1863_v31, %v6227_v14  ;;  %v2275_v6 = vmax.f32 %v1860_v52, 0.0 }
 0x284   : > { %v2276_v35 = vmax.f32 %v1862_v40, 0.0 }
 0x285   : > { %v2277_v63 = vmax.f32 %v1864_v7, 0.0 }
 0x286   : > { %v2456_v32 = vpack.c.bf16 %v2276_v35, %v2274_v61 }
 0x287   : > { %v2457_v34 = vpack.c.bf16 %v2277_v63, %v2275_v6  ;;  %v1867_v19 = vpop.f32.mrb[152].mxu0 }
 0x288   : > { %v2556_v62 = vmax.bf16 %v2456_v32, %v6740_v46  ;;  %v1868_v5 = vadd.f32 %v1867_v19, %v6223_v11  ;;  %v1869_v24 = vpop.f32.mrb[153].mxu0 }
 0x289   : > { %v2557_v49 = vmax.bf16 %v2457_v34, %v6742_v26  ;;  %v1870_v38 = vadd.f32 %v1869_v24, %v6227_v14  ;;  %v1871_v0 = vpop.f32.mrb[154].mxu0 }
 0x28a   : > { %v1872_v39 = vadd.f32 %v1871_v0, %v6223_v11  ;;  %v1873_v21 = vpop.f32.mrb[155].mxu0  ;;  %v2278_v27 = vmax.f32 %v1868_v5, 0.0 }
 0x28b   : > { %v1874_v50 = vadd.f32 %v1873_v21, %v6227_v14  ;;  %v2279_v46 = vmax.f32 %v1870_v38, 0.0  ;;  %v5441_v21 = vld [vmem:[%s7590_s3 + $0xe8] sm:$0xff]  }
 0x28c   : > { %v2280_v13 = vmax.f32 %v1872_v39, 0.0  ;;  %3221 = vmatpush1.bf16.msra.mxu1 %v5441_v21 }
 0x28d   : > { %v2281_v18 = vmax.f32 %v1874_v50, 0.0  ;;  %3222 = vmatprep.subr.bf16.mxu1 %v5629_v4 }
 0x28e   : > { %v2458_v41 = vpack.c.bf16 %v2280_v13, %v2278_v27 }
 0x28f   : > { %v2459_v26 = vpack.c.bf16 %v2281_v18, %v2279_v46  ;;  %v1877_v29 = vpop.f32.mrb[156].mxu0 }
 0x290   : > { %v1878_v47 = vadd.f32 %v1877_v29, %v6223_v11  ;;  %v1879_v2 = vpop.f32.mrb[157].mxu0  ;;  %v6775_v55 = vmax.bf16 %v2554_v60, %v2458_v41  ;;  %v5442_v29 = vld [vmem:[%s7590_s3 + $0xf0] sm:$0xff]  }
 0x291   : > { %v1880_v52 = vadd.f32 %v1879_v2, %v6227_v14  ;;  %v1881_v16 = vpop.f32.mrb[158].mxu0  ;;  %v6778_v40 = vmax.bf16 %v2555_v56, %v2459_v26  ;;  %3223 = vmatpush1.bf16.msra.mxu1 %v5442_v29 }
 0x292   : > { %v1882_v31 = vadd.f32 %v1881_v16, %v6223_v11  ;;  %v1883_v7 = vpop.f32.mrb[159].mxu0  ;;  %v2282_v35 = vmax.f32 %v1878_v47, 0.0  ;;  %3224 = vmatprep.subr.bf16.mxu1 %v5629_v4 }
 0x293   : > { %v1884_v61 = vadd.f32 %v1883_v7, %v6227_v14  ;;  %3129 = vmatprep.mubr.bf16.mxu1 %v6778_v40  ;;  %v2283_v63 = vmax.f32 %v1880_v52, 0.0 }
 0x294   : > { %v2284_v6 = vmax.f32 %v1882_v31, 0.0  ;;  %3130 = vmatmul.mubr.bf16.gmra.mrb[56].mxu1 %v6775_v55 }
 0x295   : > { %v2285_v32 = vmax.f32 %v1884_v61, 0.0 }
 0x296   : > { %v2460_v60 = vpack.c.bf16 %v2284_v6, %v2282_v35 }
 0x297   : > { %v2461_v34 = vpack.c.bf16 %v2285_v32, %v2283_v63  ;;  %v1887_v19 = vpop.f32.mrb[160].mxu0 }
 0x298   : > { %v1888_v5 = vadd.f32 %v1887_v19, %v6223_v11  ;;  %v1889_v56 = vpop.f32.mrb[161].mxu0  ;;  %v6785_v24 = vmax.bf16 %v2556_v62, %v2460_v60 }
 0x299   : > { %v1890_v38 = vadd.f32 %v1889_v56, %v6227_v14  ;;  %v1891_v0 = vpop.f32.mrb[162].mxu0  ;;  %v6788_v39 = vmax.bf16 %v2557_v49, %v2461_v34 }
 0x29a   : > { %v1892_v50 = vadd.f32 %v1891_v0, %v6223_v11  ;;  %v1893_v17 = vpop.f32.mrb[163].mxu0  ;;  %v2286_v13 = vmax.f32 %v1888_v5, 0.0  ;;  %v5443_v5 = vld [vmem:[%s7590_s3 + $0xf8] sm:$0xff]  }
 0x29b   : > { %v1894_v27 = vadd.f32 %v1893_v17, %v6227_v14  ;;  %3137 = vmatprep.mubr.bf16.mxu1 %v6788_v39  ;;  %v2287_v49 = vmax.f32 %v1890_v38, 0.0  ;;  %3225 = vmatpush1.bf16.msra.mxu1 %v5443_v5 }
 0x29c   : > { %v2288_v62 = vmax.f32 %v1892_v50, 0.0  ;;  %3138 = vmatmul.mubr.bf16.gmra.mrb[60].mxu1 %v6785_v24  ;;  %3403 = vmatprep.subr.bf16.mxu1 %v5629_v4 }
 0x29d   : > { %v2289_v46 = vmax.f32 %v1894_v27, 0.0 }
 0x29e   : > { %v6798_v18 = vpack.c.bf16 %v2288_v62, %v2286_v13 }
 0x29f   : > { %v6800_v41 = vpack.c.bf16 %v2289_v46, %v2287_v49  ;;  %v1897_v26 = vpop.f32.mrb[164].mxu0 }
 0x2a0   : > { %v1898_v47 = vadd.f32 %v1897_v26, %v6223_v11  ;;  %v1899_v2 = vpop.f32.mrb[165].mxu0 }
 0x2a1   : > { %v1900_v52 = vadd.f32 %v1899_v2, %v6227_v14  ;;  %v1901_v16 = vpop.f32.mrb[166].mxu0 }
 0x2a2   : > { %v1902_v31 = vadd.f32 %v1901_v16, %v6223_v11  ;;  %v1903_v7 = vpop.f32.mrb[167].mxu0  ;;  %v2290_v35 = vmax.f32 %v1898_v47, 0.0 }
 0x2a3   : > { %v1904_v61 = vadd.f32 %v1903_v7, %v6227_v14  ;;  %v2291_v63 = vmax.f32 %v1900_v52, 0.0 }
 0x2a4   : > { %v2292_v6 = vmax.f32 %v1902_v31, 0.0 }
 0x2a5   : > { %v2293_v32 = vmax.f32 %v1904_v61, 0.0 }
 0x2a6   : > { %v6810_v60 = vpack.c.bf16 %v2292_v6, %v2290_v35 }
 0x2a7   : > { %v6812_v34 = vpack.c.bf16 %v2293_v32, %v2291_v63  ;;  %v1907_v19 = vpop.f32.mrb[168].mxu0 }
 0x2a8   : > { %v1908_v56 = vadd.f32 %v1907_v19, %v6223_v11  ;;  %v1909_v38 = vpop.f32.mrb[169].mxu0 }
 0x2a9   : > { %v1910_v0 = vadd.f32 %v1909_v38, %v6227_v14  ;;  %v1911_v21 = vpop.f32.mrb[170].mxu0 }
 0x2aa   : > { %v1912_v50 = vadd.f32 %v1911_v21, %v6223_v11  ;;  %v1913_v17 = vpop.f32.mrb[171].mxu0  ;;  %v2294_v13 = vmax.f32 %v1908_v56, 0.0 }
 0x2ab   : > { %v1914_v27 = vadd.f32 %v1913_v17, %v6227_v14  ;;  %v2295_v49 = vmax.f32 %v1910_v0, 0.0 }
 0x2ac   : > { %v2296_v62 = vmax.f32 %v1912_v50, 0.0 }
 0x2ad   : > { %v2297_v46 = vmax.f32 %v1914_v27, 0.0 }
 0x2ae   : > { %v2466_v26 = vpack.c.bf16 %v2296_v62, %v2294_v13 }
 0x2af   : > { %v2467_v29 = vpack.c.bf16 %v2297_v46, %v2295_v49  ;;  %v1917_v47 = vpop.f32.mrb[172].mxu0 }
 0x2b0   : > { %v2562_v2 = vmax.bf16 %v2466_v26, %v6798_v18  ;;  %v1918_v52 = vadd.f32 %v1917_v47, %v6223_v11  ;;  %v1919_v16 = vpop.f32.mrb[173].mxu0 }
 0x2b1   : > { %v2563_v31 = vmax.bf16 %v2467_v29, %v6800_v41  ;;  %v1920_v7 = vadd.f32 %v1919_v16, %v6227_v14  ;;  %v1921_v61 = vpop.f32.mrb[174].mxu0 }
 0x2b2   : > { %v1922_v35 = vadd.f32 %v1921_v61, %v6223_v11  ;;  %v1923_v6 = vpop.f32.mrb[175].mxu0  ;;  %v2298_v32 = vmax.f32 %v1918_v52, 0.0 }
 0x2b3   : > { %v1924_v63 = vadd.f32 %v1923_v6, %v6227_v14  ;;  %v2299_v5 = vmax.f32 %v1920_v7, 0.0 }
 0x2b4   : > { %v2300_v19 = vmax.f32 %v1922_v35, 0.0 }
 0x2b5   : > { %v2301_v56 = vmax.f32 %v1924_v63, 0.0 }
 0x2b6   : > { %v2468_v38 = vpack.c.bf16 %v2300_v19, %v2298_v32 }
 0x2b7   : > { %v2469_v0 = vpack.c.bf16 %v2301_v56, %v2299_v5  ;;  %v1927_v18 = vpop.f32.mrb[176].mxu0 }
 0x2b8   : > { %v2564_v21 = vmax.bf16 %v2468_v38, %v6810_v60  ;;  %v1928_v50 = vadd.f32 %v1927_v18, %v6223_v11  ;;  %v1929_v41 = vpop.f32.mrb[177].mxu0 }
 0x2b9   : > { %v2565_v17 = vmax.bf16 %v2469_v0, %v6812_v34  ;;  %v1930_v27 = vadd.f32 %v1929_v41, %v6227_v14  ;;  %v1931_v13 = vpop.f32.mrb[178].mxu0 }
 0x2ba   : > { %v1932_v62 = vadd.f32 %v1931_v13, %v6223_v11  ;;  %v1933_v49 = vpop.f32.mrb[179].mxu0  ;;  %v2302_v26 = vmax.f32 %v1928_v50, 0.0 }
 0x2bb   : > { %v1934_v46 = vadd.f32 %v1933_v49, %v6227_v14  ;;  %v2303_v47 = vmax.f32 %v1930_v27, 0.0 }
 0x2bc   : > { %v2304_v29 = vmax.f32 %v1932_v62, 0.0 }
 0x2bd   : > { %v2305_v52 = vmax.f32 %v1934_v46, 0.0 }
 0x2be   : > { %v2470_v16 = vpack.c.bf16 %v2304_v29, %v2302_v26 }
 0x2bf   : > { %v2471_v7 = vpack.c.bf16 %v2305_v52, %v2303_v47  ;;  %v1937_v60 = vpop.f32.mrb[180].mxu0 }
 0x2c0   : > { %v1938_v61 = vadd.f32 %v1937_v60, %v6223_v11  ;;  %v1939_v35 = vpop.f32.mrb[181].mxu0  ;;  %v6835_v6 = vmax.bf16 %v2562_v2, %v2470_v16 }
 0x2c1   : > { %v1940_v34 = vadd.f32 %v1939_v35, %v6227_v14  ;;  %v1941_v63 = vpop.f32.mrb[182].mxu0  ;;  %v6838_v32 = vmax.bf16 %v2563_v31, %v2471_v7 }
 0x2c2   : > { %v1942_v19 = vadd.f32 %v1941_v63, %v6223_v11  ;;  %v1943_v5 = vpop.f32.mrb[183].mxu0  ;;  %v2306_v38 = vmax.f32 %v1938_v61, 0.0 }
 0x2c3   : > { %v1944_v56 = vadd.f32 %v1943_v5, %v6227_v14  ;;  %3145 = vmatprep.mubr.bf16.mxu1 %v6838_v32  ;;  %v2307_v18 = vmax.f32 %v1940_v34, 0.0 }
 0x2c4   : > { %v2308_v0 = vmax.f32 %v1942_v19, 0.0  ;;  %3146 = vmatmul.mubr.bf16.gmra.mrb[64].mxu1 %v6835_v6 }
 0x2c5   : > { %v2309_v50 = vmax.f32 %v1944_v56, 0.0 }
 0x2c6   : > { %v2472_v2 = vpack.c.bf16 %v2308_v0, %v2306_v38 }
 0x2c7   : > { %v2473_v41 = vpack.c.bf16 %v2309_v50, %v2307_v18  ;;  %v1947_v27 = vpop.f32.mrb[184].mxu0 }
 0x2c8   : > { %v1948_v13 = vadd.f32 %v1947_v27, %v6223_v11  ;;  %v1949_v31 = vpop.f32.mrb[185].mxu0  ;;  %v6845_v62 = vmax.bf16 %v2564_v21, %v2472_v2 }
 0x2c9   : > { %v1950_v49 = vadd.f32 %v1949_v31, %v6227_v14  ;;  %v1951_v46 = vpop.f32.mrb[186].mxu0  ;;  %v6848_v26 = vmax.bf16 %v2565_v17, %v2473_v41 }
 0x2ca   : > { %v1952_v29 = vadd.f32 %v1951_v46, %v6223_v11  ;;  %v1953_v47 = vpop.f32.mrb[187].mxu0  ;;  %v2310_v16 = vmax.f32 %v1948_v13, 0.0 }
 0x2cb   : > { %v1954_v52 = vadd.f32 %v1953_v47, %v6227_v14  ;;  %3153 = vmatprep.mubr.bf16.mxu1 %v6848_v26  ;;  %v2311_v60 = vmax.f32 %v1950_v49, 0.0 }
 0x2cc   : > { %v2312_v7 = vmax.f32 %v1952_v29, 0.0  ;;  %3154 = vmatmul.mubr.bf16.gmra.mrb[68].mxu1 %v6845_v62 }
 0x2cd   : > { %v2313_v61 = vmax.f32 %v1954_v52, 0.0 }
 0x2ce   : > { %v6854_v21 = vpack.c.bf16 %v2312_v7, %v2310_v16 }
 0x2cf   : > { %v6856_v35 = vpack.c.bf16 %v2313_v61, %v2311_v60  ;;  %v1957_v34 = vpop.f32.mrb[188].mxu0 }
 0x2d0   : > { %v1958_v17 = vadd.f32 %v1957_v34, %v6223_v11  ;;  %v1959_v63 = vpop.f32.mrb[189].mxu0 }
 0x2d1   : > { %v1960_v19 = vadd.f32 %v1959_v63, %v6227_v14  ;;  %v1961_v5 = vpop.f32.mrb[190].mxu0 }
 0x2d2   : > { %v1962_v56 = vadd.f32 %v1961_v5, %v6223_v11  ;;  %v1963_v38 = vpop.f32.mrb[191].mxu0  ;;  %v2314_v18 = vmax.f32 %v1958_v17, 0.0 }
 0x2d3   : > { %v1964_v0 = vadd.f32 %v1963_v38, %v6227_v14  ;;  %v2315_v2 = vmax.f32 %v1960_v19, 0.0 }
 0x2d4   : > { %v2316_v50 = vmax.f32 %v1962_v56, 0.0 }
 0x2d5   : > { %v2317_v41 = vmax.f32 %v1964_v0, 0.0 }
 0x2d6   : > { %v6862_v27 = vpack.c.bf16 %v2316_v50, %v2314_v18 }
 0x2d7   : > { %v6864_v13 = vpack.c.bf16 %v2317_v41, %v2315_v2  ;;  %v1967_v31 = vpop.f32.mrb[192].mxu0 }
 0x2d8   : > { %v1968_v49 = vadd.f32 %v1967_v31, %v6223_v11  ;;  %v1969_v46 = vpop.f32.mrb[193].mxu0 }
 0x2d9   : > { %v1970_v29 = vadd.f32 %v1969_v46, %v6227_v14  ;;  %v1971_v47 = vpop.f32.mrb[194].mxu0 }
 0x2da   : > { %v1972_v52 = vadd.f32 %v1971_v47, %v6223_v11  ;;  %v1973_v16 = vpop.f32.mrb[195].mxu0  ;;  %v2318_v60 = vmax.f32 %v1968_v49, 0.0 }
 0x2db   : > { %v1974_v7 = vadd.f32 %v1973_v16, %v6227_v14  ;;  %v2319_v34 = vmax.f32 %v1970_v29, 0.0 }
 0x2dc   : > { %v2320_v61 = vmax.f32 %v1972_v52, 0.0 }
 0x2dd   : > { %v2321_v17 = vmax.f32 %v1974_v7, 0.0 }
 0x2de   : > { %v2478_v63 = vpack.c.bf16 %v2320_v61, %v2318_v60 }
 0x2df   : > { %v2479_v19 = vpack.c.bf16 %v2321_v17, %v2319_v34  ;;  %v1977_v5 = vpop.f32.mrb[196].mxu0 }
 0x2e0   : > { %v2570_v56 = vmax.bf16 %v2478_v63, %v6854_v21  ;;  %v1978_v38 = vadd.f32 %v1977_v5, %v6223_v11  ;;  %v1979_v0 = vpop.f32.mrb[197].mxu0 }
 0x2e1   : > { %v2571_v18 = vmax.bf16 %v2479_v19, %v6856_v35  ;;  %v1980_v50 = vadd.f32 %v1979_v0, %v6227_v14  ;;  %v1981_v2 = vpop.f32.mrb[198].mxu0 }
 0x2e2   : > { %v1982_v41 = vadd.f32 %v1981_v2, %v6223_v11  ;;  %v1983_v31 = vpop.f32.mrb[199].mxu0  ;;  %v2322_v46 = vmax.f32 %v1978_v38, 0.0 }
 0x2e3   : > { %v1984_v49 = vadd.f32 %v1983_v31, %v6227_v14  ;;  %v2323_v47 = vmax.f32 %v1980_v50, 0.0 }
 0x2e4   : > { %v2324_v29 = vmax.f32 %v1982_v41, 0.0 }
 0x2e5   : > { %v2325_v52 = vmax.f32 %v1984_v49, 0.0 }
 0x2e6   : > { %v2480_v16 = vpack.c.bf16 %v2324_v29, %v2322_v46 }
 0x2e7   : > { %v2481_v7 = vpack.c.bf16 %v2325_v52, %v2323_v47  ;;  %v1987_v21 = vpop.f32.mrb[200].mxu0 }
 0x2e8   : > { %v2572_v60 = vmax.bf16 %v2480_v16, %v6862_v27  ;;  %v1988_v61 = vadd.f32 %v1987_v21, %v6223_v11  ;;  %v1989_v35 = vpop.f32.mrb[201].mxu0 }
 0x2e9   : > { %v2573_v34 = vmax.bf16 %v2481_v7, %v6864_v13  ;;  %v1990_v17 = vadd.f32 %v1989_v35, %v6227_v14  ;;  %v1991_v63 = vpop.f32.mrb[202].mxu0 }
 0x2ea   : > { %v1992_v19 = vadd.f32 %v1991_v63, %v6223_v11  ;;  %v1993_v5 = vpop.f32.mrb[203].mxu0  ;;  %v2326_v0 = vmax.f32 %v1988_v61, 0.0 }
 0x2eb   : > { %v1994_v38 = vadd.f32 %v1993_v5, %v6227_v14  ;;  %v2327_v2 = vmax.f32 %v1990_v17, 0.0 }
 0x2ec   : > { %v2328_v50 = vmax.f32 %v1992_v19, 0.0 }
 0x2ed   : > { %v2329_v41 = vmax.f32 %v1994_v38, 0.0 }
 0x2ee   : > { %v2482_v31 = vpack.c.bf16 %v2328_v50, %v2326_v0 }
 0x2ef   : > { %v2483_v49 = vpack.c.bf16 %v2329_v41, %v2327_v2  ;;  %v1997_v27 = vpop.f32.mrb[204].mxu0 }
 0x2f0   : > { %v1998_v46 = vadd.f32 %v1997_v27, %v6223_v11  ;;  %v1999_v29 = vpop.f32.mrb[205].mxu0  ;;  %v6883_v47 = vmax.bf16 %v2570_v56, %v2482_v31 }
 0x2f1   : > { %v2000_v13 = vadd.f32 %v1999_v29, %v6227_v14  ;;  %v2001_v52 = vpop.f32.mrb[206].mxu0  ;;  %v6886_v16 = vmax.bf16 %v2571_v18, %v2483_v49 }
 0x2f2   : > { %v2002_v7 = vadd.f32 %v2001_v52, %v6223_v11  ;;  %v2003_v21 = vpop.f32.mrb[207].mxu0  ;;  %v2330_v35 = vmax.f32 %v1998_v46, 0.0 }
 0x2f3   : > { %v2004_v61 = vadd.f32 %v2003_v21, %v6227_v14  ;;  %3161 = vmatprep.mubr.bf16.mxu1 %v6886_v16  ;;  %v2331_v63 = vmax.f32 %v2000_v13, 0.0 }
 0x2f4   : > { %v2332_v17 = vmax.f32 %v2002_v7, 0.0  ;;  %3162 = vmatmul.mubr.bf16.gmra.mrb[72].mxu1 %v6883_v47 }
 0x2f5   : > { %v2333_v19 = vmax.f32 %v2004_v61, 0.0 }
 0x2f6   : > { %v2484_v56 = vpack.c.bf16 %v2332_v17, %v2330_v35 }
 0x2f7   : > { %v2485_v5 = vpack.c.bf16 %v2333_v19, %v2331_v63  ;;  %v2007_v38 = vpop.f32.mrb[208].mxu0 }
 0x2f8   : > { %v2008_v0 = vadd.f32 %v2007_v38, %v6223_v11  ;;  %v2009_v18 = vpop.f32.mrb[209].mxu0  ;;  %v6893_v50 = vmax.bf16 %v2572_v60, %v2484_v56 }
 0x2f9   : > { %v2010_v2 = vadd.f32 %v2009_v18, %v6227_v14  ;;  %v2011_v41 = vpop.f32.mrb[210].mxu0  ;;  %v6896_v31 = vmax.bf16 %v2573_v34, %v2485_v5 }
 0x2fa   : > { %v2012_v49 = vadd.f32 %v2011_v41, %v6223_v11  ;;  %v2013_v27 = vpop.f32.mrb[211].mxu0  ;;  %v2334_v29 = vmax.f32 %v2008_v0, 0.0 }
 0x2fb   : > { %v2014_v46 = vadd.f32 %v2013_v27, %v6227_v14  ;;  %3169 = vmatprep.mubr.bf16.mxu1 %v6896_v31  ;;  %v2335_v52 = vmax.f32 %v2010_v2, 0.0 }
 0x2fc   : > { %v2336_v13 = vmax.f32 %v2012_v49, 0.0  ;;  %3170 = vmatmul.mubr.bf16.gmra.mrb[76].mxu1 %v6893_v50 }
 0x2fd   : > { %v2337_v7 = vmax.f32 %v2014_v46, 0.0 }
 0x2fe   : > { %v6902_v60 = vpack.c.bf16 %v2336_v13, %v2334_v29 }
 0x2ff   : > { %v6904_v21 = vpack.c.bf16 %v2337_v7, %v2335_v52  ;;  %v2017_v61 = vpop.f32.mrb[212].mxu0 }
 0x300   : > { %v2018_v34 = vadd.f32 %v2017_v61, %v6223_v11  ;;  %v2019_v35 = vpop.f32.mrb[213].mxu0 }
 0x301   : > { %v2020_v17 = vadd.f32 %v2019_v35, %v6227_v14  ;;  %v2021_v63 = vpop.f32.mrb[214].mxu0 }
 0x302   : > { %v2022_v19 = vadd.f32 %v2021_v63, %v6223_v11  ;;  %v2023_v56 = vpop.f32.mrb[215].mxu0  ;;  %v2338_v38 = vmax.f32 %v2018_v34, 0.0 }
 0x303   : > { %v2024_v5 = vadd.f32 %v2023_v56, %v6227_v14  ;;  %v2339_v18 = vmax.f32 %v2020_v17, 0.0 }
 0x304   : > { %v2340_v0 = vmax.f32 %v2022_v19, 0.0 }
 0x305   : > { %v2341_v2 = vmax.f32 %v2024_v5, 0.0 }
 0x306   : > { %v6910_v41 = vpack.c.bf16 %v2340_v0, %v2338_v38 }
 0x307   : > { %v6912_v49 = vpack.c.bf16 %v2341_v2, %v2339_v18  ;;  %v2027_v27 = vpop.f32.mrb[216].mxu0 }
 0x308   : > { %v2028_v46 = vadd.f32 %v2027_v27, %v6223_v11  ;;  %v2029_v29 = vpop.f32.mrb[217].mxu0 }
 0x309   : > { %v2030_v13 = vadd.f32 %v2029_v29, %v6227_v14  ;;  %v2031_v52 = vpop.f32.mrb[218].mxu0 }
 0x30a   : > { %v2032_v7 = vadd.f32 %v2031_v52, %v6223_v11  ;;  %v2033_v61 = vpop.f32.mrb[219].mxu0  ;;  %v2342_v34 = vmax.f32 %v2028_v46, 0.0 }
 0x30b   : > { %v2034_v35 = vadd.f32 %v2033_v61, %v6227_v14  ;;  %v2343_v17 = vmax.f32 %v2030_v13, 0.0 }
 0x30c   : > { %v2344_v63 = vmax.f32 %v2032_v7, 0.0 }
 0x30d   : > { %v2345_v19 = vmax.f32 %v2034_v35, 0.0 }
 0x30e   : > { %v2490_v56 = vpack.c.bf16 %v2344_v63, %v2342_v34 }
 0x30f   : > { %v2491_v5 = vpack.c.bf16 %v2345_v19, %v2343_v17  ;;  %v2037_v38 = vpop.f32.mrb[220].mxu0 }
 0x310   : > { %v2578_v0 = vmax.bf16 %v2490_v56, %v6902_v60  ;;  %v2038_v18 = vadd.f32 %v2037_v38, %v6223_v11  ;;  %v2039_v2 = vpop.f32.mrb[221].mxu0 }
 0x311   : > { %v2579_v27 = vmax.bf16 %v2491_v5, %v6904_v21  ;;  %v2040_v29 = vadd.f32 %v2039_v2, %v6227_v14  ;;  %v2041_v52 = vpop.f32.mrb[222].mxu0 }
 0x312   : > { %v2042_v9 = vadd.f32 %v2041_v52, %v6223_v11  ;;  %v2043_v61 = vpop.f32.mrb[223].mxu0  ;;  %v2346_v13 = vmax.f32 %v2038_v18, 0.0 }
 0x313   : > { %v2044_v46 = vadd.f32 %v2043_v61, %v6227_v14  ;;  %v2347_v35 = vmax.f32 %v2040_v29, 0.0 }
 0x314   : > { %v2348_v7 = vmax.f32 %v2042_v9, 0.0 }
 0x315   : > { %v2349_v34 = vmax.f32 %v2044_v46, 0.0 }
 0x316   : > { %v2492_v63 = vpack.c.bf16 %v2348_v7, %v2346_v13 }
 0x317   : > { %v2493_v17 = vpack.c.bf16 %v2349_v34, %v2347_v35  ;;  %v2047_v60 = vpop.f32.mrb[224].mxu0 }
 0x318   : > { %v2580_v19 = vmax.bf16 %v2492_v63, %v6910_v41  ;;  %v2048_v56 = vadd.f32 %v2047_v60, %v6223_v11  ;;  %v2049_v21 = vpop.f32.mrb[225].mxu0 }
 0x319   : > { %v2581_v5 = vmax.bf16 %v2493_v17, %v6912_v49  ;;  %v2050_v38 = vadd.f32 %v2049_v21, %v6227_v14  ;;  %v2051_v2 = vpop.f32.mrb[226].mxu0 }
 0x31a   : > { %v2052_v52 = vadd.f32 %v2051_v2, %v6223_v11  ;;  %v2053_v61 = vpop.f32.mrb[227].mxu0  ;;  %v2350_v18 = vmax.f32 %v2048_v56, 0.0 }
 0x31b   : > { %v2054_v9 = vadd.f32 %v2053_v61, %v6227_v14  ;;  %v2351_v46 = vmax.f32 %v2050_v38, 0.0 }
 0x31c   : > { %v2352_v29 = vmax.f32 %v2052_v52, 0.0 }
 0x31d   : > { %v2353_v13 = vmax.f32 %v2054_v9, 0.0 }
 0x31e   : > { %v2494_v7 = vpack.c.bf16 %v2352_v29, %v2350_v18 }
 0x31f   : > { %v2495_v35 = vpack.c.bf16 %v2353_v13, %v2351_v46  ;;  %v2057_v41 = vpop.f32.mrb[228].mxu0 }
 0x320   : > { %v2058_v34 = vadd.f32 %v2057_v41, %v6223_v11  ;;  %v2059_v63 = vpop.f32.mrb[229].mxu0  ;;  %v6931_v60 = vmax.bf16 %v2578_v0, %v2494_v7  ;;  %v5455_v0 = vld [vmem:[%s7592_s5 + $0x100] ss:$8 sps:$4 sm:$0xff]  }
 0x321   : > { %v2060_v49 = vadd.f32 %v2059_v63, %v6227_v14  ;;  %v2061_v17 = vpop.f32.mrb[230].mxu0  ;;  %v6934_v21 = vmax.bf16 %v2579_v27, %v2495_v35  ;;  %v5457_v27 = vld [vmem:[%s7592_s5 + $0x104] ss:$8 sps:$4 sm:$0xff]  }
 0x322   : > { %v2062_v2 = vadd.f32 %v2061_v17, %v6223_v11  ;;  %v2063_v61 = vpop.f32.mrb[231].mxu0  ;;  %v2354_v38 = vmax.f32 %v2058_v34, 0.0  ;;  %4347 = vmatprep.subr.bf16.mxu0 %v5457_v27 }
 0x323   : > { %v2064_v56 = vadd.f32 %v2063_v61, %v6227_v14  ;;  %3177 = vmatprep.mubr.bf16.mxu1 %v6934_v21  ;;  %v2355_v9 = vmax.f32 %v2060_v49, 0.0  ;;  %4348 = vmatpush1.bf16.msra.mxu0 %v5455_v0 }
 0x324   : > { %v2356_v52 = vmax.f32 %v2062_v2, 0.0  ;;  %3178 = vmatmul.mubr.bf16.gmra.mrb[80].mxu1 %v6931_v60 }
 0x325   : > { %v2357_v18 = vmax.f32 %v2064_v56, 0.0 }
 0x326   : > { %v2496_v29 = vpack.c.bf16 %v2356_v52, %v2354_v38 }
 0x327   : > { %v2497_v46 = vpack.c.bf16 %v2357_v18, %v2355_v9  ;;  %v2067_v13 = vpop.f32.mrb[232].mxu0 }
 0x328   : > { %v6946_v7 = vmax.bf16 %v2580_v19, %v2496_v29  ;;  %v2068_v35 = vadd.f32 %v2067_v13, %v6223_v11  ;;  %v2069_v41 = vpop.f32.mrb[233].mxu0  ;;  %v5444_v29 = vld [vmem:[%s7590_s3 + $0x100] sm:$0xff]  }
 0x329   : > { %v6949_v34 = vmax.bf16 %v2581_v5, %v2497_v46  ;;  %v2070_v63 = vadd.f32 %v2069_v41, %v6227_v14  ;;  %v2071_v17 = vpop.f32.mrb[234].mxu0 }
 0x32a   : > { %v2358_v2 = vmax.f32 %v2068_v35, 0.0  ;;  %v2072_v61 = vadd.f32 %v2071_v17, %v6223_v11  ;;  %v2073_v49 = vpop.f32.mrb[235].mxu0 }
 0x32b   : > { %3185 = vmatprep.mubr.bf16.mxu1 %v6949_v34  ;;  %v2359_v56 = vmax.f32 %v2070_v63, 0.0  ;;  %v2074_v38 = vadd.f32 %v2073_v49, %v6227_v14 }
 0x32c   : > { %3186 = vmatmul.mubr.bf16.gmra.mrb[84].mxu1 %v6946_v7  ;;  %v2360_v19 = vmax.f32 %v2072_v61, 0.0  ;;  %v5445_v61 = vld [vmem:[%s7590_s3 + $0x108] sm:$0xff]  }
 0x32d   : > { %3226 = vmatprep.mubr.bf16.mxu1 %v6261_v22  ;;  %v2361_v52 = vmax.f32 %v2074_v38, 0.0 }
 0x32e   : > { %v6957_v5 = vpack.c.bf16 %v2360_v19, %v2358_v2 }
 0x32f   : > { %v6959_v0 = vpack.c.bf16 %v2361_v52, %v2359_v56  ;;  %v2077_v27 = vpop.f32.mrb[236].mxu0 }
 0x330   : > { %v2078_v9 = vadd.f32 %v2077_v27, %v6223_v11  ;;  %v2079_v18 = vpop.f32.mrb[237].mxu0 }
 0x331   : > { %v2080_v46 = vadd.f32 %v2079_v18, %v6227_v14  ;;  %v2081_v13 = vpop.f32.mrb[238].mxu0 }
 0x332   : > { %v2362_v35 = vmax.f32 %v2078_v9, 0.0  ;;  %v2082_v41 = vadd.f32 %v2081_v13, %v6223_v11  ;;  %v2083_v22 = vpop.f32.mrb[239].mxu0 }
 0x333   : > { %v2363_v63 = vmax.f32 %v2080_v46, 0.0  ;;  %v2084_v17 = vadd.f32 %v2083_v22, %v6227_v14  ;;  %v5447_v22 = vld [vmem:[%s7590_s3 + $0x118] sm:$0xff]  }
 0x334   : > { %3227 = vmatmul.mubr.bf16.vlgmr.msra.gmra.mrb[0].mxu1 %v6258_v44  ;;  %v2364_v2 = vmax.f32 %v2082_v41, 0.0  ;;  %v5446_v44 = vld [vmem:[%s7590_s3 + $0x110] sm:$0xff]  }
 0x335   : > { %3404 = vmatpush1.bf16.msra.mxu1 %v5444_v29  ;;  %3234 = vmatprep.mubr.bf16.mxu1 %v6275_v37  ;;  %v2365_v49 = vmax.f32 %v2084_v17, 0.0 }
 0x336   : > { %3405 = vmatprep.subr.bf16.mxu1 %v5629_v4  ;;  %v6974_v56 = vpack.c.bf16 %v2364_v2, %v2362_v35 }
 0x337   : > { %v6976_v38 = vpack.c.bf16 %v2365_v49, %v2363_v63  ;;  %v2087_v19 = vpop.f32.mrb[240].mxu0 }
 0x338   : > { %v2088_v52 = vadd.f32 %v2087_v19, %v6223_v11  ;;  %v2089_v27 = vpop.f32.mrb[241].mxu0 }
 0x339   : > { %3406 = vmatpush1.bf16.msra.mxu1 %v5445_v61  ;;  %v2090_v37 = vadd.f32 %v2089_v27, %v6227_v14  ;;  %v2091_v9 = vpop.f32.mrb[242].mxu0 }
 0x33a   : > { %3407 = vmatprep.subr.bf16.mxu1 %v5629_v4  ;;  %v2366_v18 = vmax.f32 %v2088_v52, 0.0  ;;  %v2092_v29 = vadd.f32 %v2091_v9, %v6223_v11  ;;  %v2093_v46 = vpop.f32.mrb[243].mxu0 }
 0x33b   : > { %v2367_v13 = vmax.f32 %v2090_v37, 0.0  ;;  %v2094_v35 = vadd.f32 %v2093_v46, %v6227_v14 }
 0x33c   : > { %3235 = vmatmul.mubr.bf16.gmra.mrb[4].mxu1 %v6272_v30  ;;  %v2368_v41 = vmax.f32 %v2092_v29, 0.0  ;;  %v5448_v30 = vld [vmem:[%s7590_s3 + $0x120] sm:$0xff]  }
 0x33d   : > { %3242 = vmatprep.mubr.bf16.mxu1 %v6333_v43  ;;  %3408 = vmatpush1.bf16.msra.mxu1 %v5446_v44  ;;  %v2369_v63 = vmax.f32 %v2094_v35, 0.0  ;;  %v5461_v35 = vld [vmem:[%s7592_s5 + $0x110] ss:$8 sps:$4 sm:$0xff]  }
 0x33e   : > { %3409 = vmatprep.subr.bf16.mxu1 %v5629_v4  ;;  %v2502_v17 = vpack.c.bf16 %v2368_v41, %v2366_v18  ;;  %v5449_v41 = vld [vmem:[%s7590_s3 + $0x128] sm:$0xff]  }
 0x33f   : > { %v2503_v2 = vpack.c.bf16 %v2369_v63, %v2367_v13  ;;  %v2097_v61 = vpop.f32.mrb[244].mxu0 }
 0x340   : > { %v2586_v49 = vmax.bf16 %v2502_v17, %v6957_v5  ;;  %v2098_v19 = vadd.f32 %v2097_v61, %v6223_v11  ;;  %v2099_v52 = vpop.f32.mrb[245].mxu0 }
 0x341   : > { %3410 = vmatpush1.bf16.msra.mxu1 %v5447_v22  ;;  %v2587_v27 = vmax.bf16 %v2503_v2, %v6959_v0  ;;  %v2100_v44 = vadd.f32 %v2099_v52, %v6227_v14  ;;  %v2101_v37 = vpop.f32.mrb[246].mxu0  ;;  %v5463_v0 = vld [vmem:[%s7592_s5 + $0x114] ss:$8 sps:$4 sm:$0xff]  }
 0x342   : > { %3411 = vmatprep.subr.bf16.mxu1 %v5629_v4  ;;  %v2370_v9 = vmax.f32 %v2098_v19, 0.0  ;;  %v2102_v18 = vadd.f32 %v2101_v37, %v6223_v11  ;;  %v2103_v29 = vpop.f32.mrb[247].mxu0  ;;  %4349 = vmatprep.subr.bf16.mxu0 %v5463_v0 }
 0x343   : > { %v2371_v5 = vmax.f32 %v2100_v44, 0.0  ;;  %v2104_v46 = vadd.f32 %v2103_v29, %v6227_v14  ;;  %4350 = vmatpush1.bf16.msra.mxu0 %v5461_v35 }
 0x344   : > { %3243 = vmatmul.mubr.bf16.gmra.mrb[8].mxu1 %v6330_v8  ;;  %v2372_v13 = vmax.f32 %v2102_v18, 0.0 }
 0x345   : > { %3250 = vmatprep.mubr.bf16.mxu1 %v6347_v57  ;;  %3412 = vmatpush1.bf16.msra.mxu1 %v5448_v30  ;;  %v2373_v22 = vmax.f32 %v2104_v46, 0.0  ;;  %v5450_v30 = vld [vmem:[%s7590_s3 + $0x130] sm:$0xff]  }
 0x346   : > { %3413 = vmatprep.subr.bf16.mxu1 %v5629_v4  ;;  %v2504_v63 = vpack.c.bf16 %v2372_v13, %v2370_v9 }
 0x347   : > { %v2505_v17 = vpack.c.bf16 %v2373_v22, %v2371_v5  ;;  %v2107_v2 = vpop.f32.mrb[248].mxu0 }
 0x348   : > { %v2588_v61 = vmax.bf16 %v2504_v63, %v6974_v56  ;;  %v2108_v19 = vadd.f32 %v2107_v2, %v6223_v11  ;;  %v2109_v52 = vpop.f32.mrb[249].mxu0 }
 0x349   : > { %3414 = vmatpush1.bf16.msra.mxu1 %v5449_v41  ;;  %v2589_v44 = vmax.bf16 %v2505_v17, %v6976_v38  ;;  %v2110_v37 = vadd.f32 %v2109_v52, %v6227_v14  ;;  %v2111_v18 = vpop.f32.mrb[250].mxu0  ;;  %v5451_v38 = vld [vmem:[%s7590_s3 + $0x138] sm:$0xff]  }
 0x34a   : > { %3415 = vmatprep.subr.bf16.mxu1 %v5629_v4  ;;  %v2374_v9 = vmax.f32 %v2108_v19, 0.0  ;;  %v2112_v29 = vadd.f32 %v2111_v18, %v6223_v11  ;;  %v2113_v5 = vpop.f32.mrb[251].mxu0  ;;  %v5452_v19 = vld [vmem:[%s7590_s3 + $0x140] sm:$0xff]  }
 0x34b   : > { %v2375_v56 = vmax.f32 %v2110_v37, 0.0  ;;  %v2114_v46 = vadd.f32 %v2113_v5, %v6227_v14 }
 0x34c   : > { %3251 = vmatmul.mubr.bf16.gmra.mrb[12].mxu1 %v6344_v42  ;;  %v2376_v13 = vmax.f32 %v2112_v29, 0.0 }
 0x34d   : > { %3258 = vmatprep.mubr.bf16.mxu1 %v6420_v28  ;;  %3416 = vmatpush1.bf16.msra.mxu1 %v5450_v30  ;;  %v2377_v35 = vmax.f32 %v2114_v46, 0.0 }
 0x34e   : > { %3417 = vmatprep.subr.bf16.mxu1 %v5629_v4  ;;  %v2506_v0 = vpack.c.bf16 %v2376_v13, %v2374_v9 }
 0x34f   : > { %v2507_v41 = vpack.c.bf16 %v2377_v35, %v2375_v56  ;;  %v2117_v22 = vpop.f32.mrb[252].mxu0 }
 0x350   : > { %v2118_v63 = vadd.f32 %v2117_v22, %v6223_v11  ;;  %v2119_v17 = vpop.f32.mrb[253].mxu0  ;;  %v7031_v2 = vmax.bf16 %v2586_v49, %v2506_v0  ;;  %v5458_v0 = vld [vmem:[%s7590_s3 + $0x158] sm:$0xff]   ;;  %v5460_v22 = vld [vmem:[%s7590_s3 + $0x168] sm:$0xff]  }
 0x351   : > { %3418 = vmatpush1.bf16.msra.mxu1 %v5451_v38  ;;  %v2120_v52 = vadd.f32 %v2119_v17, %v6227_v14  ;;  %v2121_v30 = vpop.f32.mrb[254].mxu0  ;;  %v7037_v37 = vmax.bf16 %v2587_v27, %v2507_v41  ;;  %v5453_v27 = vld [vmem:[%s7590_s3 + $0x148] sm:$0xff]   ;;  %v5465_v17 = vld [vmem:[%s7590_s3 + $0x178] sm:$0xff]  }
 0x352   : > { %3419 = vmatprep.subr.bf16.mxu1 %v5629_v4  ;;  %v2378_v18 = vmax.f32 %v2118_v63, 0.0  ;;  %v2122_v9 = vadd.f32 %v2121_v30, %v6223_v11  ;;  %v2123_v29 = vpop.f32.mrb[255].mxu0  ;;  %v5468_v41 = vld [vmem:[%s7592_s5 + $0x124] ss:$8 sps:$4 sm:$0xff]   ;;  %v5464_v63 = vld [vmem:[%s7590_s3 + $0x170] sm:$0xff]  }
 0x353   : > { %v2379_v5 = vmax.f32 %v2120_v52, 0.0  ;;  %v2124_v49 = vadd.f32 %v2123_v29, %v6227_v14  ;;  %v5454_v14 = vld [vmem:[%s7590_s3 + $0x150] sm:$0xff]   ;;  %4351 = vmatprep.subr.bf16.mxu0 %v5468_v41  ;;  %v5472_v30 = vld [vmem:[%s7592_s5 + $0x140] ss:$8 sps:$4 sm:$0xff]  }
 0x354   : > { %3259 = vmatmul.mubr.bf16.gmra.mrb[16].mxu1 %v6417_v59  ;;  %v2380_v56 = vmax.f32 %v2122_v9, 0.0  ;;  %v5471_v52 = vld [vmem:[%s7592_s5 + $0x134] ss:$8 sps:$4 sm:$0xff]   ;;  %v5475_v9 = vld [vmem:[%s7592_s5 + $0x150] ss:$8 sps:$4 sm:$0xff]  }
 0x355   : > { %3266 = vmatprep.mubr.bf16.mxu1 %v6439_v51  ;;  %3420 = vmatpush1.bf16.msra.mxu1 %v5452_v19  ;;  %v2381_v46 = vmax.f32 %v2124_v49, 0.0  ;;  %v5469_v19 = vld [vmem:[%s7592_s5 + $0x130] ss:$8 sps:$4 sm:$0xff]   ;;  %v5477_v29 = vld [vmem:[%s7592_s5 + $0x154] ss:$8 sps:$4 sm:$0xff]  }
 0x356   : > { %3421 = vmatprep.subr.bf16.mxu1 %v5629_v4  ;;  %v2508_v13 = vpack.c.bf16 %v2380_v56, %v2378_v18  ;;  %v5474_v18 = vld [vmem:[%s7592_s5 + $0x144] ss:$8 sps:$4 sm:$0xff]   ;;  %v5511_v56 = vld [vmem:[%s7592_s5 + $0x1d0] ss:$8 sps:$4 sm:$0xff]   ;;  %v5514_v41 = vld [vmem:[%s7592_s5 + $0x40] ss:$8 sps:$4 sm:$0xff]  }
 0x357   : > { %v2509_v38 = vpack.c.bf16 %v2381_v46, %v2379_v5  ;;  %v5478_v5 = vld [vmem:[%s7592_s5 + $0x160] ss:$8 sps:$4 sm:$0xff]   ;;  %v5480_v49 = vld [vmem:[%s7592_s5 + $0x164] ss:$8 sps:$4 sm:$0xff]   ;;  %v5513_v46 = vld [vmem:[%s7592_s5 + $0x1d4] ss:$8 sps:$4 sm:$0xff]  }
 0x358   : > { %v7048_v11 = vmax.bf16 %v2588_v61, %v2508_v13  ;;  %v5459_v61 = vld [vmem:[%s7590_s3 + $0x160] sm:$0xff]  }
 0x359   : > { %3422 = vmatpush1.bf16.msra.mxu1 %v5453_v27  ;;  %v7053_v35 = vmax.bf16 %v2589_v44, %v2509_v38  ;;  %v5466_v44 = vld [vmem:[%s7592_s5 + $0x120] ss:$8 sps:$4 sm:$0xff]  }
 0x35a   : > { %3423 = vmatprep.subr.bf16.mxu1 %v5629_v4  ;;  %4352 = vmatpush1.bf16.msra.mxu0 %v5466_v44 }
 0x35b   : > { %4353 = vmatprep.subr.bf16.mxu0 %v5471_v52 }
 0x35c   : > { %3267 = vmatmul.mubr.bf16.gmra.mrb[20].mxu1 %v6436_v53 }
 0x35d   : > { %3274 = vmatprep.mubr.bf16.mxu1 %v6507_v36  ;;  %3424 = vmatpush1.bf16.msra.mxu1 %v5454_v14 }
 0x35e   : > { %3425 = vmatprep.subr.bf16.mxu1 %v5629_v4  ;;  %4354 = vmatpush1.bf16.msra.mxu0 %v5469_v19 }
 0x35f   : > { %4355 = vmatprep.subr.bf16.mxu0 %v5474_v18 }
 0x361   : > { %3426 = vmatpush1.bf16.msra.mxu1 %v5458_v0 }
 0x362   : > { %3427 = vmatprep.subr.bf16.mxu1 %v5629_v4  ;;  %4356 = vmatpush1.bf16.msra.mxu0 %v5472_v30 }
 0x363   : > { %4357 = vmatprep.subr.bf16.mxu0 %v5477_v29 }
 0x364   : > { %3275 = vmatmul.mubr.bf16.gmra.mrb[24].mxu1 %v6504_v10 }
 0x365   : > { %3282 = vmatprep.mubr.bf16.mxu1 %v6521_v45  ;;  %3428 = vmatpush1.bf16.msra.mxu1 %v5459_v61 }
 0x366   : > { %3429 = vmatprep.subr.bf16.mxu1 %v5629_v4  ;;  %4358 = vmatpush1.bf16.msra.mxu0 %v5475_v9 }
 0x367   : > { %4359 = vmatprep.subr.bf16.mxu0 %v5480_v49 }
 0x369   : > { %3430 = vmatpush1.bf16.msra.mxu1 %v5460_v22  ;;  %v5516_v22 = vld [vmem:[%s7592_s5 + $0x44] ss:$8 sps:$4 sm:$0xff]  }
 0x36a   : > { %3431 = vmatprep.subr.bf16.mxu1 %v5629_v4  ;;  %4360 = vmatpush1.bf16.msra.mxu0 %v5478_v5 }
 0x36c   : > { %3283 = vmatmul.mubr.bf16.gmra.mrb[28].mxu1 %v6518_v12 }
 0x36d   : > { %3290 = vmatprep.mubr.bf16.mxu1 %v6607_v23  ;;  %3432 = vmatpush1.bf16.msra.mxu1 %v5464_v63 }
 0x36e   : > { %3433 = vmatprep.subr.bf16.mxu1 %v5629_v4 }
 0x371   : > { %3434 = vmatpush1.bf16.msra.mxu1 %v5465_v17 }
 0x374   : > { %3291 = vmatmul.mubr.bf16.gmra.mrb[32].mxu1 %v6604_v33 }
 0x375   : > { %3298 = vmatprep.mubr.bf16.mxu1 %v6628_v58 }
 0x37c   : > { %3299 = vmatmul.mubr.bf16.gmra.mrb[36].mxu1 %v6625_v15 }
 0x37d   : > { %3306 = vmatprep.mubr.bf16.mxu1 %v6698_v1 }
 0x384   : > { %3307 = vmatmul.mubr.bf16.gmra.mrb[40].mxu1 %v6695_v48 }
 0x385   : > { %3314 = vmatprep.mubr.bf16.mxu1 %v6716_v54 }
 0x38c   : > { %3315 = vmatmul.mubr.bf16.gmra.mrb[44].mxu1 %v6713_v20 }
 0x38d   : > { %3322 = vmatprep.mubr.bf16.mxu1 %v6778_v40 }
 0x394   : > { %3323 = vmatmul.mubr.bf16.gmra.mrb[48].mxu1 %v6775_v55 }
 0x395   : > { %3330 = vmatprep.mubr.bf16.mxu1 %v6788_v39 }
 0x39c   : > { %3331 = vmatmul.mubr.bf16.gmra.mrb[52].mxu1 %v6785_v24 }
 0x39d   : > { %3338 = vmatprep.mubr.bf16.mxu1 %v6838_v32 }
 0x3a4   : > { %3339 = vmatmul.mubr.bf16.gmra.mrb[56].mxu1 %v6835_v6 }
 0x3a5   : > { %3346 = vmatprep.mubr.bf16.mxu1 %v6848_v26 }
 0x3ac   : > { %3347 = vmatmul.mubr.bf16.gmra.mrb[60].mxu1 %v6845_v62 }
 0x3ad   : > { %3354 = vmatprep.mubr.bf16.mxu1 %v6886_v16 }
 0x3b4   : > { %3355 = vmatmul.mubr.bf16.gmra.mrb[64].mxu1 %v6883_v47 }
 0x3b5   : > { %3362 = vmatprep.mubr.bf16.mxu1 %v6896_v31 }
 0x3bc   : > { %3363 = vmatmul.mubr.bf16.gmra.mrb[68].mxu1 %v6893_v50 }
 0x3bd   : > { %3370 = vmatprep.mubr.bf16.mxu1 %v6934_v21 }
 0x3c4   : > { %3371 = vmatmul.mubr.bf16.gmra.mrb[72].mxu1 %v6931_v60 }
 0x3c5   : > { %3378 = vmatprep.mubr.bf16.mxu1 %v6949_v34 }
 0x3cc   : > { %3379 = vmatmul.mubr.bf16.gmra.mrb[76].mxu1 %v6946_v7 }
 0x3cd   : > { %3386 = vmatprep.mubr.bf16.mxu1 %v7037_v37 }
 0x3d4   : > { %3387 = vmatmul.mubr.bf16.gmra.mrb[80].mxu1 %v7031_v2 }
 0x3d5   : > { %3394 = vmatprep.mubr.bf16.mxu1 %v7053_v35 }
 0x3dc   : > { %3395 = vmatmul.mubr.bf16.gmra.mrb[84].mxu1 %v7048_v11 }
 0x3dd   : > { %3435 = vmatprep.mubr.bf16.mxu1 %v6333_v43  ;;  %v5483_v43 = vld [vmem:[%s7592_s5 + $0x174] ss:$8 sps:$4 sm:$0xff]  }
 0x3de   : > { %4361 = vmatprep.subr.bf16.mxu0 %v5483_v43 }
 0x3e4   : > { %3436 = vmatmul.mubr.bf16.vlgmr.msra.gmra.mrb[0].mxu1 %v6330_v8  ;;  %v5481_v8 = vld [vmem:[%s7592_s5 + $0x170] ss:$8 sps:$4 sm:$0xff]  }
 0x3e5   : > { %3443 = vmatprep.mubr.bf16.mxu1 %v6347_v57  ;;  %4362 = vmatpush1.bf16.msra.mxu0 %v5481_v8  ;;  %v5486_v57 = vld [vmem:[%s7592_s5 + $0x184] ss:$8 sps:$4 sm:$0xff]  }
 0x3e6   : > { %4363 = vmatprep.subr.bf16.mxu0 %v5486_v57 }
 0x3ec   : > { %3444 = vmatmul.mubr.bf16.gmra.mrb[4].mxu1 %v6344_v42  ;;  %v5484_v42 = vld [vmem:[%s7592_s5 + $0x180] ss:$8 sps:$4 sm:$0xff]  }
 0x3ed   : > { %3451 = vmatprep.mubr.bf16.mxu1 %v6420_v28  ;;  %4364 = vmatpush1.bf16.msra.mxu0 %v5484_v42  ;;  %v5489_v28 = vld [vmem:[%s7592_s5 + $0x194] ss:$8 sps:$4 sm:$0xff]  }
 0x3ee   : > { %4365 = vmatprep.subr.bf16.mxu0 %v5489_v28  ;;  %v5517_v28 = vld [vmem:[%s7592_s5 + $0x50] ss:$8 sps:$4 sm:$0xff]  }
 0x3f4   : > { %3452 = vmatmul.mubr.bf16.gmra.mrb[8].mxu1 %v6417_v59  ;;  %v5487_v59 = vld [vmem:[%s7592_s5 + $0x190] ss:$8 sps:$4 sm:$0xff]  }
 0x3f5   : > { %3459 = vmatprep.mubr.bf16.mxu1 %v6439_v51  ;;  %4366 = vmatpush1.bf16.msra.mxu0 %v5487_v59  ;;  %v5492_v51 = vld [vmem:[%s7592_s5 + $0x1a4] ss:$8 sps:$4 sm:$0xff]  }
 0x3f6   : > { %4367 = vmatprep.subr.bf16.mxu0 %v5492_v51 }
 0x3fc   : > { %3460 = vmatmul.mubr.bf16.gmra.mrb[12].mxu1 %v6436_v53  ;;  %v5490_v53 = vld [vmem:[%s7592_s5 + $0x1a0] ss:$8 sps:$4 sm:$0xff]  }
 0x3fd   : > { %3467 = vmatprep.mubr.bf16.mxu1 %v6507_v36  ;;  %4368 = vmatpush1.bf16.msra.mxu0 %v5490_v53  ;;  %v5495_v36 = vld [vmem:[%s7592_s5 + $0x1b4] ss:$8 sps:$4 sm:$0xff]  }
 0x3fe   : > { %4369 = vmatprep.subr.bf16.mxu0 %v5495_v36  ;;  %v5519_v53 = vld [vmem:[%s7592_s5 + $0x54] ss:$8 sps:$4 sm:$0xff]  }
 0x404   : > { %3468 = vmatmul.mubr.bf16.gmra.mrb[16].mxu1 %v6504_v10  ;;  %v5493_v10 = vld [vmem:[%s7592_s5 + $0x1b0] ss:$8 sps:$4 sm:$0xff]  }
 0x405   : > { %3475 = vmatprep.mubr.bf16.mxu1 %v6521_v45  ;;  %4370 = vmatpush1.bf16.msra.mxu0 %v5493_v10  ;;  %v5498_v45 = vld [vmem:[%s7592_s5 + $0x4] ss:$8 sps:$4 sm:$0xff]  }
 0x406   : > { %4294 = vmatprep.subr.bf16.mxu1 %v5498_v45 }
 0x40c   : > { %3476 = vmatmul.mubr.bf16.gmra.mrb[20].mxu1 %v6518_v12  ;;  %v5496_v12 = vld [vmem:[%s7592_s5] ss:$8 sps:$4 sm:$0xff]  }
 0x40d   : > { %3483 = vmatprep.mubr.bf16.mxu1 %v6607_v23  ;;  %v5501_v23 = vld [vmem:[%s7592_s5 + $0x1c4] ss:$8 sps:$4 sm:$0xff]   ;;  %4295 = vmatpush1.bf16.msra.mxu1 %v5496_v12 }
 0x40e   : > { %4371 = vmatprep.subr.bf16.mxu0 %v5501_v23 }
 0x414   : > { %3484 = vmatmul.mubr.bf16.gmra.mrb[24].mxu1 %v6604_v33  ;;  %v5499_v33 = vld [vmem:[%s7592_s5 + $0x1c0] ss:$8 sps:$4 sm:$0xff]  }
 0x415   : > { %3491 = vmatprep.mubr.bf16.mxu1 %v6628_v58  ;;  %4372 = vmatpush1.bf16.msra.mxu0 %v5499_v33  ;;  %v7234_v58 = vld [vmem:[%s7591_s4] ss:$0 sm:$0xff] }
 0x416   : > { %4373 = vmatprep.subr.bf16.mxu0 %v5513_v46 }
 0x419   : > { %4374 = vmatpush1.bf16.msra.mxu0 %v5511_v56 }
 0x41c   : > { %3492 = vmatmul.mubr.bf16.gmra.mrb[28].mxu1 %v6625_v15  ;;  %v5504_v15 = vld [vmem:[%s7592_s5 + $0x14] ss:$8 sps:$4 sm:$0xff]  }
 0x41d   : > { %3499 = vmatprep.mubr.bf16.mxu1 %v6698_v1  ;;  %4296 = vmatprep.subr.bf16.mxu1 %v5504_v15 }
 0x424   : > { %3500 = vmatmul.mubr.bf16.gmra.mrb[32].mxu1 %v6695_v48 }
 0x425   : > { %3507 = vmatprep.mubr.bf16.mxu1 %v6716_v54 }
 0x42c   : > { %3508 = vmatmul.mubr.bf16.gmra.mrb[36].mxu1 %v6713_v20 }
 0x42d   : > { %3515 = vmatprep.mubr.bf16.mxu1 %v6778_v40 }
 0x434   : > { %3516 = vmatmul.mubr.bf16.gmra.mrb[40].mxu1 %v6775_v55 }
 0x435   : > { %3523 = vmatprep.mubr.bf16.mxu1 %v6788_v39  ;;  %v5507_v39 = vld [vmem:[%s7592_s5 + $0x24] ss:$8 sps:$4 sm:$0xff]  }
 0x43c   : > { %3524 = vmatmul.mubr.bf16.gmra.mrb[44].mxu1 %v6785_v24  ;;  %v5505_v24 = vld [vmem:[%s7592_s5 + $0x20] ss:$8 sps:$4 sm:$0xff]  }
 0x43d   : > { %3531 = vmatprep.mubr.bf16.mxu1 %v6838_v32 }
 0x444   : > { %3532 = vmatmul.mubr.bf16.gmra.mrb[48].mxu1 %v6835_v6 }
 0x445   : > { %3539 = vmatprep.mubr.bf16.mxu1 %v6848_v26 }
 0x44c   : > { %3540 = vmatmul.mubr.bf16.gmra.mrb[52].mxu1 %v6845_v62 }
 0x44d   : > { %3547 = vmatprep.mubr.bf16.mxu1 %v6886_v16 }
 0x454   : > { %3548 = vmatmul.mubr.bf16.gmra.mrb[56].mxu1 %v6883_v47 }
 0x455   : > { %3555 = vmatprep.mubr.bf16.mxu1 %v6896_v31 }
 0x45c   : > { %3556 = vmatmul.mubr.bf16.gmra.mrb[60].mxu1 %v6893_v50 }
 0x45d   : > { %3563 = vmatprep.mubr.bf16.mxu1 %v6934_v21 }
 0x464   : > { %3564 = vmatmul.mubr.bf16.gmra.mrb[64].mxu1 %v6931_v60 }
 0x465   : > { %3571 = vmatprep.mubr.bf16.mxu1 %v6949_v34 }
 0x46c   : > { %3572 = vmatmul.mubr.bf16.gmra.mrb[68].mxu1 %v6946_v7 }
 0x46d   : > { %3579 = vmatprep.mubr.bf16.mxu1 %v7037_v37  ;;  %v5510_v37 = vld [vmem:[%s7592_s5 + $0x34] ss:$8 sps:$4 sm:$0xff]  }
 0x474   : > { %3580 = vmatmul.mubr.bf16.gmra.mrb[72].mxu1 %v7031_v2  ;;  %v5508_v2 = vld [vmem:[%s7592_s5 + $0x30] ss:$8 sps:$4 sm:$0xff]  }
 0x475   : > { %3587 = vmatprep.mubr.bf16.mxu1 %v7053_v35 }
 0x47c   : > { %3588 = vmatmul.mubr.bf16.gmra.mrb[76].mxu1 %v7048_v11 }
 0x47d   : > { %3595 = vmatprep.mubr.bf16.mxu1 %v5629_v4 }
 0x484   : > { %3596 = vmatmul.mubr.bf16.gmra.mrb[80].mxu1 %v5629_v4 }
 0x485   : > { %3603 = vmatprep.mubr.bf16.mxu1 %v5629_v4 }
 0x48c   : > { %3604 = vmatmul.mubr.bf16.gmra.mrb[84].mxu1 %v5629_v4  ;;  %v5502_v4 = vld [vmem:[%s7592_s5 + $0x10] ss:$8 sps:$4 sm:$0xff]  }
 0x48d   : > { %4297 = vmatpush1.bf16.msra.mxu1 %v5502_v4 }
 0x48e   : > { %4298 = vmatprep.subr.bf16.mxu1 %v5507_v39  ;;  %v5525_v39 = vld [vmem:[%s7592_s5 + $0x1e4] ss:$8 sps:$4 sm:$0xff]  }
 0x48f   : > { %4375 = vmatprep.subr.bf16.mxu0 %v5525_v39  ;;  %v5540_v39 = vld [vmem:[%s7592_s5 + $0xa4] ss:$8 sps:$4 sm:$0xff]  }
 0x491   : > { %4299 = vmatpush1.bf16.msra.mxu1 %v5505_v24 }
 0x492   : > { %4300 = vmatprep.subr.bf16.mxu1 %v5510_v37 }
 0x495   : > { %4301 = vmatpush1.bf16.msra.mxu1 %v5508_v2  ;;  %v5529_v2 = vld [vmem:[%s7592_s5 + $0x80] ss:$8 sps:$4 sm:$0xff]  }
 0x496   : > { %4302 = vmatprep.subr.bf16.mxu1 %v5516_v22 }
 0x499   : > { %4303 = vmatpush1.bf16.msra.mxu1 %v5514_v41 }
 0x49a   : > { %4304 = vmatprep.subr.bf16.mxu1 %v5519_v53 }
 0x49d   : > { %4305 = vmatpush1.bf16.msra.mxu1 %v5517_v28  ;;  %v5535_v28 = vld [vmem:[%s7592_s5 + $0x1f0] ss:$8 sps:$4 sm:$0xff]  }
 0x4b7   : > { %v3437_v48 = vpop.f32.mrb[0].mxu1 }
 0x4b8   : > { %v5058_v1 = vadd.f32 %v7234_v58, %v3437_v48  ;;  %v3439_v20 = vpop.f32.mrb[1].mxu1 }
 0x4b9   : > { %v3440_v54 = vpop.f32.mrb[2].mxu1 }
 0x4ba   : > { %v5059_v55 = vadd.f32 %v7234_v58, %v3440_v54  ;;  %v3442_v40 = vpop.f32.mrb[3].mxu1  ;;  %v3612_v6 = vmax.f32 %v5058_v1, 0.0  ;;  %v5520_v54 = vld [vmem:[%s7592_s5 + $0x60] ss:$8 sps:$4 sm:$0xff]  }
 0x4bb   : > { %v5523_v40 = vld [vmem:[%s7592_s5 + $0x1e0] ss:$8 sps:$4 sm:$0xff]  }
 0x4bc   : > { %v3613_v32 = vmax.f32 %v5059_v55, 0.0  ;;  %v5522_v55 = vld [vmem:[%s7592_s5 + $0x64] ss:$8 sps:$4 sm:$0xff]   ;;  %4376 = vmatpush1.bf16.msra.mxu0 %v5523_v40 }
 0x4bd   : > { %4306 = vmatprep.subr.bf16.mxu1 %v5522_v55 }
 0x4be   : > { %v7244_v62 = vpack.c.bf16 %v3613_v32, %v3612_v6  ;;  %4307 = vmatpush1.bf16.msra.mxu1 %v5520_v54 }
 0x4bf   : > { %v3445_v26 = vpop.f32.mrb[4].mxu1 }
 0x4c0   : > { %v5060_v47 = vadd.f32 %v7234_v58, %v3445_v26  ;;  %v3447_v16 = vpop.f32.mrb[5].mxu1  ;;  %v5528_v26 = vld [vmem:[%s7592_s5 + $0x74] ss:$8 sps:$4 sm:$0xff]  }
 0x4c1   : > { %v3448_v50 = vpop.f32.mrb[6].mxu1  ;;  %v5526_v16 = vld [vmem:[%s7592_s5 + $0x70] ss:$8 sps:$4 sm:$0xff]   ;;  %4308 = vmatprep.subr.bf16.mxu1 %v5528_v26 }
 0x4c2   : > { %v5061_v31 = vadd.f32 %v7234_v58, %v3448_v50  ;;  %v3450_v60 = vpop.f32.mrb[7].mxu1  ;;  %v3614_v21 = vmax.f32 %v5060_v47, 0.0  ;;  %4309 = vmatpush1.bf16.msra.mxu1 %v5526_v16 }
 0x4c3   : > { %v5531_v60 = vld [vmem:[%s7592_s5 + $0x84] ss:$8 sps:$4 sm:$0xff]  }
 0x4c4   : > { %v3615_v7 = vmax.f32 %v5061_v31, 0.0  ;;  %4310 = vmatprep.subr.bf16.mxu1 %v5531_v60  ;;  %v5546_v60 = vld [vmem:[%s7592_s5 + $0xc4] ss:$8 sps:$4 sm:$0xff]  }
 0x4c6   : > { %v7248_v34 = vpack.c.bf16 %v3615_v7, %v3614_v21  ;;  %4311 = vmatpush1.bf16.msra.mxu1 %v5529_v2 }
 0x4c7   : > { %v3453_v27 = vpop.f32.mrb[8].mxu1 }
 0x4c8   : > { %v5062_v13 = vadd.f32 %v7234_v58, %v3453_v27  ;;  %v3455_v38 = vpop.f32.mrb[9].mxu1 }
 0x4c9   : > { %v3456_v11 = vpop.f32.mrb[10].mxu1 }
 0x4ca   : > { %v5063_v14 = vadd.f32 %v7234_v58, %v3456_v11  ;;  %v3458_v35 = vpop.f32.mrb[11].mxu1  ;;  %v3616_v0 = vmax.f32 %v5062_v13, 0.0 }
 0x4cc   : > { %v3617_v61 = vmax.f32 %v5063_v14, 0.0 }
 0x4ce   : > { %v7264_v44 = vpack.c.bf16 %v3617_v61, %v3616_v0 }
 0x4cf   : > { %v3461_v63 = vpop.f32.mrb[12].mxu1 }
 0x4d0   : > { %v5064_v17 = vadd.f32 %v7234_v58, %v3461_v63  ;;  %v3463_v19 = vpop.f32.mrb[13].mxu1 }
 0x4d1   : > { %v3464_v52 = vpop.f32.mrb[14].mxu1 }
 0x4d2   : > { %v5065_v30 = vadd.f32 %v7234_v58, %v3464_v52  ;;  %v3466_v18 = vpop.f32.mrb[15].mxu1  ;;  %v3618_v9 = vmax.f32 %v5064_v17, 0.0 }
 0x4d4   : > { %v3619_v29 = vmax.f32 %v5065_v30, 0.0 }
 0x4d6   : > { %v7274_v5 = vpack.c.bf16 %v3619_v29, %v3618_v9 }
 0x4d7   : > { %v3469_v49 = vpop.f32.mrb[16].mxu1 }
 0x4d8   : > { %v5066_v8 = vadd.f32 %v7234_v58, %v3469_v49  ;;  %v3471_v43 = vpop.f32.mrb[17].mxu1 }
 0x4d9   : > { %v3472_v42 = vpop.f32.mrb[18].mxu1 }
 0x4da   : > { %v5067_v57 = vadd.f32 %v7234_v58, %v3472_v42  ;;  %v3474_v59 = vpop.f32.mrb[19].mxu1  ;;  %v3620_v51 = vmax.f32 %v5066_v8, 0.0 }
 0x4db   : > { %v5534_v59 = vld [vmem:[%s7592_s5 + $0x94] ss:$8 sps:$4 sm:$0xff]  }
 0x4dc   : > { %v3621_v10 = vmax.f32 %v5067_v57, 0.0  ;;  %v5532_v57 = vld [vmem:[%s7592_s5 + $0x90] ss:$8 sps:$4 sm:$0xff]   ;;  %4312 = vmatprep.subr.bf16.mxu1 %v5534_v59 }
 0x4dd   : > { %4313 = vmatpush1.bf16.msra.mxu1 %v5532_v57  ;;  %v5558_v57 = vld [vmem:[%s7592_s5 + $0xe4] ss:$8 sps:$4 sm:$0xff]  }
 0x4de   : > { %v7284_v36 = vpack.c.bf16 %v3621_v10, %v3620_v51  ;;  %v5537_v10 = vld [vmem:[%s7592_s5 + $0x1f4] ss:$8 sps:$4 sm:$0xff]   ;;  %4314 = vmatprep.subr.bf16.mxu1 %v5540_v39 }
 0x4df   : > { %v3477_v12 = vpop.f32.mrb[20].mxu1  ;;  %4377 = vmatprep.subr.bf16.mxu0 %v5537_v10 }
 0x4e0   : > { %v5068_v45 = vadd.f32 %v7234_v58, %v3477_v12  ;;  %v3479_v33 = vpop.f32.mrb[21].mxu1  ;;  %4378 = vmatpush1.bf16.msra.mxu0 %v5535_v28 }
 0x4e1   : > { %v3480_v23 = vpop.f32.mrb[22].mxu1 }
 0x4e2   : > { %v5069_v4 = vadd.f32 %v7234_v58, %v3480_v23  ;;  %v3482_v15 = vpop.f32.mrb[23].mxu1  ;;  %v3622_v48 = vmax.f32 %v5068_v45, 0.0 }
 0x4e4   : > { %v3623_v1 = vmax.f32 %v5069_v4, 0.0 }
 0x4e6   : > { %v7288_v20 = vpack.c.bf16 %v3623_v1, %v3622_v48 }
 0x4e7   : > { %v3485_v24 = vpop.f32.mrb[24].mxu1 }
 0x4e8   : > { %v5070_v6 = vadd.f32 %v7234_v58, %v3485_v24  ;;  %v3487_v32 = vpop.f32.mrb[25].mxu1  ;;  %v5538_v24 = vld [vmem:[%s7592_s5 + $0xa0] ss:$8 sps:$4 sm:$0xff]  }
 0x4e9   : > { %v3488_v47 = vpop.f32.mrb[26].mxu1  ;;  %4315 = vmatpush1.bf16.msra.mxu1 %v5538_v24 }
 0x4ea   : > { %v5071_v50 = vadd.f32 %v7234_v58, %v3488_v47  ;;  %v3490_v31 = vpop.f32.mrb[27].mxu1  ;;  %v3624_v21 = vmax.f32 %v5070_v6, 0.0 }
 0x4eb   : > { %v5543_v31 = vld [vmem:[%s7592_s5 + $0xb4] ss:$8 sps:$4 sm:$0xff]  }
 0x4ec   : > { %v3625_v7 = vmax.f32 %v5071_v50, 0.0  ;;  %v5541_v50 = vld [vmem:[%s7592_s5 + $0xb0] ss:$8 sps:$4 sm:$0xff]   ;;  %4316 = vmatprep.subr.bf16.mxu1 %v5543_v31 }
 0x4ed   : > { %4317 = vmatpush1.bf16.msra.mxu1 %v5541_v50 }
 0x4ee   : > { %v7316_v37 = vpack.c.bf16 %v3625_v7, %v3624_v21  ;;  %4318 = vmatprep.subr.bf16.mxu1 %v5546_v60 }
 0x4ef   : > { %v3493_v56 = vpop.f32.mrb[28].mxu1 }
 0x4f0   : > { %v5072_v27 = vadd.f32 %v7234_v58, %v3493_v56  ;;  %v3495_v46 = vpop.f32.mrb[29].mxu1  ;;  %v5544_v56 = vld [vmem:[%s7592_s5 + $0xc0] ss:$8 sps:$4 sm:$0xff]  }
 0x4f1   : > { %v3496_v13 = vpop.f32.mrb[30].mxu1  ;;  %4319 = vmatpush1.bf16.msra.mxu1 %v5544_v56 }
 0x4f2   : > { %v5073_v38 = vadd.f32 %v7234_v58, %v3496_v13  ;;  %v3498_v11 = vpop.f32.mrb[31].mxu1  ;;  %v3626_v14 = vmax.f32 %v5072_v27, 0.0 }
 0x4f4   : > { %v3627_v35 = vmax.f32 %v5073_v38, 0.0 }
 0x4f6   : > { %v7320_v0 = vpack.c.bf16 %v3627_v35, %v3626_v14 }
 0x4f7   : > { %v3501_v61 = vpop.f32.mrb[32].mxu1 }
 0x4f8   : > { %v5074_v41 = vadd.f32 %v7234_v58, %v3501_v61  ;;  %v3503_v22 = vpop.f32.mrb[33].mxu1 }
 0x4f9   : > { %v3504_v63 = vpop.f32.mrb[34].mxu1 }
 0x4fa   : > { %v5075_v17 = vadd.f32 %v7234_v58, %v3504_v63  ;;  %v3506_v19 = vpop.f32.mrb[35].mxu1  ;;  %v3628_v52 = vmax.f32 %v5074_v41, 0.0 }
 0x4fc   : > { %v3629_v30 = vmax.f32 %v5075_v17, 0.0 }
 0x4fe   : > { %v7324_v18 = vpack.c.bf16 %v3629_v30, %v3628_v52 }
 0x4ff   : > { %v3509_v9 = vpop.f32.mrb[36].mxu1 }
 0x500   : > { %v5076_v29 = vadd.f32 %v7234_v58, %v3509_v9  ;;  %v3511_v49 = vpop.f32.mrb[37].mxu1  ;;  %v5549_v9 = vld [vmem:[%s7592_s5 + $0x204] ss:$8 sps:$4 sm:$0xff]  }
 0x501   : > { %v3512_v8 = vpop.f32.mrb[38].mxu1  ;;  %4400 = vmatprep.subr.bf16.mxu0 %v5549_v9 }
 0x502   : > { %v5077_v43 = vadd.f32 %v7234_v58, %v3512_v8  ;;  %v3514_v42 = vpop.f32.mrb[39].mxu1  ;;  %v3630_v53 = vmax.f32 %v5076_v29, 0.0  ;;  %v5550_v8 = vld [vmem:[%s7592_s5 + $0xd0] ss:$8 sps:$4 sm:$0xff]  }
 0x503   : > { %v5556_v42 = vld [vmem:[%s7592_s5 + $0xe0] ss:$8 sps:$4 sm:$0xff]  }
 0x504   : > { %v3631_v51 = vmax.f32 %v5077_v43, 0.0 }
 0x506   : > { %v7340_v12 = vpack.c.bf16 %v3631_v51, %v3630_v53 }
 0x507   : > { %v3517_v45 = vpop.f32.mrb[40].mxu1 }
 0x508   : > { %v5078_v33 = vadd.f32 %v7234_v58, %v3517_v45  ;;  %v3519_v23 = vpop.f32.mrb[41].mxu1 }
 0x509   : > { %v3520_v4 = vpop.f32.mrb[42].mxu1  ;;  %v5562_v23 = vld [vmem:[%s7592_s5 + $0xf0] ss:$8 sps:$4 sm:$0xff]  }
 0x50a   : > { %v5079_v15 = vadd.f32 %v7234_v58, %v3520_v4  ;;  %v3522_v48 = vpop.f32.mrb[43].mxu1  ;;  %v3632_v1 = vmax.f32 %v5078_v33, 0.0  ;;  %v5564_v4 = vld [vmem:[%s7592_s5 + $0xf4] ss:$8 sps:$4 sm:$0xff]  }
 0x50c   : > { %v3633_v54 = vmax.f32 %v5079_v15, 0.0 }
 0x50e   : > { %v3666_v55 = vpack.c.bf16 %v3633_v54, %v3632_v1 }
 0x50f   : > { %v3525_v40 = vpop.f32.mrb[44].mxu1 }
 0x510   : > { %v5080_v6 = vadd.f32 %v7234_v58, %v3525_v40  ;;  %v3527_v32 = vpop.f32.mrb[45].mxu1  ;;  %3692 = vrot.lane.b32.xlu1 %v3666_v55, %s5628_s11 }
 0x511   : > { %v3528_v26 = vpop.f32.mrb[46].mxu1 }
 0x512   : > { %v5081_v47 = vadd.f32 %v7234_v58, %v3528_v26  ;;  %v3530_v16 = vpop.f32.mrb[47].mxu1  ;;  %v3634_v21 = vmax.f32 %v5080_v6, 0.0 }
 0x514   : > { %v3635_v7 = vmax.f32 %v5081_v47, 0.0 }
 0x516   : > { %v3667_v2 = vpack.c.bf16 %v3635_v7, %v3634_v21 }
 0x517   : > { %v3533_v27 = vpop.f32.mrb[48].mxu1 }
 0x518   : > { %v5082_v46 = vadd.f32 %v7234_v58, %v3533_v27  ;;  %v3535_v13 = vpop.f32.mrb[49].mxu1  ;;  %3694 = vrot.lane.b32.xlu1 %v3667_v2, %s5628_s11 }
 0x519   : > { %v3536_v38 = vpop.f32.mrb[50].mxu1 }
 0x51a   : > { %v5083_v11 = vadd.f32 %v7234_v58, %v3536_v38  ;;  %v3538_v14 = vpop.f32.mrb[51].mxu1  ;;  %v3636_v35 = vmax.f32 %v5082_v46, 0.0 }
 0x51c   : > { %v3637_v61 = vmax.f32 %v5083_v11, 0.0  ;;  %3680 = vrot.lane.b32.xlu1 %v7264_v44, %s5628_s11  ;;  %v5552_v44 = vld [vmem:[%s7592_s5 + $0xd4] ss:$8 sps:$4 sm:$0xff]  }
 0x51d   : > { %4320 = vmatprep.subr.bf16.mxu1 %v5552_v44 }
 0x51e   : > { %v7370_v41 = vpack.c.bf16 %v3637_v61, %v3636_v35  ;;  %4321 = vmatpush1.bf16.msra.mxu1 %v5550_v8 }
 0x51f   : > { %v3541_v22 = vpop.f32.mrb[52].mxu1  ;;  %4322 = vmatprep.subr.bf16.mxu1 %v5558_v57 }
 0x520   : > { %v5084_v63 = vadd.f32 %v7234_v58, %v3541_v22  ;;  %v3543_v17 = vpop.f32.mrb[53].mxu1  ;;  %3688 = vrot.lane.b32.xlu1 %v7320_v0, %s5628_s11 }
 0x521   : > { %v3544_v19 = vpop.f32.mrb[54].mxu1 }
 0x522   : > { %v5085_v52 = vadd.f32 %v7234_v58, %v3544_v19  ;;  %v3546_v30 = vpop.f32.mrb[55].mxu1  ;;  %v3638_v29 = vmax.f32 %v5084_v63, 0.0  ;;  %4323 = vmatpush1.bf16.msra.mxu1 %v5556_v42 }
 0x523   : > { %4324 = vmatprep.subr.bf16.mxu1 %v5564_v4 }
 0x524   : > { %v3639_v49 = vmax.f32 %v5085_v52, 0.0 }
 0x526   : > { %v7385_v0 = vpack.c.bf16 %v3639_v49, %v3638_v29  ;;  %4325 = vmatpush1.bf16.msra.mxu1 %v5562_v23 }
 0x527   : > { %v3549_v43 = vpop.f32.mrb[56].mxu1 }
 0x528   : > { %v5086_v59 = vadd.f32 %v7234_v58, %v3549_v43  ;;  %v3551_v28 = vpop.f32.mrb[57].mxu1 }
 0x529   : > { %v3552_v53 = vpop.f32.mrb[58].mxu1 }
 0x52a   : > { %v5087_v51 = vadd.f32 %v7234_v58, %v3552_v53  ;;  %v3554_v10 = vpop.f32.mrb[59].mxu1  ;;  %v3640_v45 = vmax.f32 %v5086_v59, 0.0 }
 0x52c   : > { %v3641_v33 = vmax.f32 %v5087_v51, 0.0 }
 0x52e   : > { %v3670_v15 = vpack.c.bf16 %v3641_v33, %v3640_v45 }
 0x52f   : > { %v3557_v48 = vpop.f32.mrb[60].mxu1 }
 0x530   : > { %v5088_v1 = vadd.f32 %v7234_v58, %v3557_v48  ;;  %v3559_v54 = vpop.f32.mrb[61].mxu1  ;;  %3698 = vrot.lane.b32.xlu0 %v3670_v15, %s5628_s11 }
 0x531   : > { %v3560_v55 = vpop.f32.mrb[62].mxu1 }
 0x532   : > { %v5089_v40 = vadd.f32 %v7234_v58, %v3560_v55  ;;  %v3562_v24 = vpop.f32.mrb[63].mxu1  ;;  %v3642_v39 = vmax.f32 %v5088_v1, 0.0 }
 0x534   : > { %v3643_v6 = vmax.f32 %v5089_v40, 0.0 }
 0x536   : > { %v3671_v32 = vpack.c.bf16 %v3643_v6, %v3642_v39 }
 0x537   : > { %v3565_v26 = vpop.f32.mrb[64].mxu1 }
 0x538   : > { %v5090_v47 = vadd.f32 %v7234_v58, %v3565_v26  ;;  %v3567_v16 = vpop.f32.mrb[65].mxu1  ;;  %3700 = vrot.lane.b32.xlu0 %v3671_v32, %s5628_s11 }
 0x539   : > { %v3568_v50 = vpop.f32.mrb[66].mxu1 }
 0x53a   : > { %v5091_v31 = vadd.f32 %v7234_v58, %v3568_v50  ;;  %v3570_v60 = vpop.f32.mrb[67].mxu1  ;;  %v3644_v21 = vmax.f32 %v5090_v47, 0.0 }
 0x53c   : > { %v3645_v7 = vmax.f32 %v5091_v31, 0.0  ;;  %3686 = vrot.lane.b32.xlu0 %v7316_v37, %s5628_s11  ;;  %v5547_v31 = vld [vmem:[%s7592_s5 + $0x200] ss:$8 sps:$4 sm:$0xff]  }
 0x53e   : > { %v7409_v2 = vpack.c.bf16 %v3645_v7, %v3644_v21  ;;  %v5555_v21 = vld [vmem:[%s7592_s5 + $0x214] ss:$8 sps:$4 sm:$0xff]   ;;  %v5553_v7 = vld [vmem:[%s7592_s5 + $0x210] ss:$8 sps:$4 sm:$0xff]  }
 0x53f   : > { %v3573_v56 = vpop.f32.mrb[68].mxu1 }
 0x540   : > { %v5092_v27 = vadd.f32 %v7234_v58, %v3573_v56  ;;  %v3575_v46 = vpop.f32.mrb[69].mxu1  ;;  %v5561_v56 = vld [vmem:[%s7592_s5 + $0x224] ss:$8 sps:$4 sm:$0xff]  }
 0x541   : > { %v3576_v13 = vpop.f32.mrb[70].mxu1  ;;  %v5559_v46 = vld [vmem:[%s7592_s5 + $0x220] ss:$8 sps:$4 sm:$0xff]  }
 0x542   : > { %v5093_v38 = vadd.f32 %v7234_v58, %v3576_v13  ;;  %v3578_v11 = vpop.f32.mrb[71].mxu1  ;;  %v3646_v14 = vmax.f32 %v5092_v27, 0.0  ;;  %v5567_v13 = vld [vmem:[%s7592_s5 + $0x234] ss:$8 sps:$4 sm:$0xff]  }
 0x544   : > { %v3647_v35 = vmax.f32 %v5093_v38, 0.0 }
 0x546   : > { %v7413_v61 = vpack.c.bf16 %v3647_v35, %v3646_v14  ;;  %v5565_v35 = vld [vmem:[%s7592_s5 + $0x230] ss:$8 sps:$4 sm:$0xff]  }
 0x547   : > { %v3581_v22 = vpop.f32.mrb[72].mxu1 }
 0x548   : > { %v5094_v63 = vadd.f32 %v7234_v58, %v3581_v22  ;;  %v3583_v17 = vpop.f32.mrb[73].mxu1  ;;  %v5570_v22 = vld [vmem:[%s7592_s5 + $0x244] ss:$8 sps:$4 sm:$0xff]  }
 0x549   : > { %v3584_v19 = vpop.f32.mrb[74].mxu1  ;;  %v5568_v17 = vld [vmem:[%s7592_s5 + $0x240] ss:$8 sps:$4 sm:$0xff]  }
 0x54a   : > { %v5095_v37 = vadd.f32 %v7234_v58, %v3584_v19  ;;  %v3586_v52 = vpop.f32.mrb[75].mxu1  ;;  %v3648_v30 = vmax.f32 %v5094_v63, 0.0  ;;  %v5574_v19 = vld [vmem:[%s7592_s5 + $0x260] ss:$8 sps:$4 sm:$0xff]  }
 0x54b   : > { %v5577_v52 = vld [vmem:[%s7592_s5 + $0x270] ss:$8 sps:$4 sm:$0xff]  }
 0x54c   : > { %v3649_v9 = vmax.f32 %v5095_v37, 0.0  ;;  %v5579_v37 = vld [vmem:[%s7592_s5 + $0x274] ss:$8 sps:$4 sm:$0xff]  }
 0x54e   : > { %v3674_v44 = vpack.c.bf16 %v3649_v9, %v3648_v30  ;;  %v5582_v30 = vld [vmem:[%s7592_s5 + $0x284] ss:$8 sps:$4 sm:$0xff]  }
 0x54f   : > { %v3589_v29 = vpop.f32.mrb[76].mxu1 }
 0x550   : > { %v5096_v49 = vadd.f32 %v7234_v58, %v3589_v29  ;;  %v3591_v8 = vpop.f32.mrb[77].mxu1  ;;  %3704 = vrot.lane.b32.xlu0 %v3674_v44, %s5628_s11  ;;  %v5580_v44 = vld [vmem:[%s7592_s5 + $0x280] ss:$8 sps:$4 sm:$0xff]   ;;  %v5585_v29 = vld [vmem:[%s7592_s5 + $0x294] ss:$8 sps:$4 sm:$0xff]  }
 0x551   : > { %v3592_v43 = vpop.f32.mrb[78].mxu1  ;;  %v5583_v8 = vld [vmem:[%s7592_s5 + $0x290] ss:$8 sps:$4 sm:$0xff]  }
 0x552   : > { %v5097_v42 = vadd.f32 %v7234_v58, %v3592_v43  ;;  %v3594_v57 = vpop.f32.mrb[79].mxu1  ;;  %v3650_v59 = vmax.f32 %v5096_v49, 0.0 }
 0x553   : > { %v5586_v57 = vld [vmem:[%s7592_s5 + $0x2a0] ss:$8 sps:$4 sm:$0xff]  }
 0x554   : > { %v3651_v28 = vmax.f32 %v5097_v42, 0.0  ;;  %3682 = vrot.lane.b32.xlu0 %v7274_v5, %s5628_s11  ;;  %v5588_v42 = vld [vmem:[%s7592_s5 + $0x2a4] ss:$8 sps:$4 sm:$0xff]  }
 0x556   : > { %v3675_v53 = vpack.c.bf16 %v3651_v28, %v3650_v59  ;;  %v5591_v59 = vld [vmem:[%s7592_s5 + $0x2b4] ss:$8 sps:$4 sm:$0xff]  }
 0x557   : > { %v3597_v51 = vpop.f32.mrb[80].mxu1 }
 0x558   : > { %v5098_v10 = vadd.f32 %v7234_v58, %v3597_v51  ;;  %v3599_v45 = vpop.f32.mrb[81].mxu1  ;;  %3706 = vrot.lane.b32.xlu1 %v3675_v53, %s5628_s11 }
 0x559   : > { %v3600_v33 = vpop.f32.mrb[82].mxu1  ;;  %v5593_v45 = vld [vmem:[%s7594_s7] sm:$0xff]  }
 0x55a   : > { %v5099_v23 = vadd.f32 %v7234_v58, %v3600_v33  ;;  %v3602_v4 = vpop.f32.mrb[83].mxu1  ;;  %v3652_v15 = vmax.f32 %v5098_v10, 0.0  ;;  %v5592_v10 = vld [vmem:[%s7594_s7 + $0x40] sm:$0xff]   ;;  %v5595_v33 = vld [vmem:[%s7594_s7 + $0x8] sm:$0xff]  }
 0x55b   : > { %5030 = vmatprep.subr.bf16.mxu1 %v5592_v10  ;;  %v5598_v4 = vld [vmem:[%s7594_s7 + $0x58] sm:$0xff]  }
 0x55c   : > { %v3653_v48 = vmax.f32 %v5099_v23, 0.0  ;;  %v5597_v23 = vld [vmem:[%s7594_s7 + $0x10] sm:$0xff]  }
 0x55e   : > { %v3676_v1 = vpack.c.bf16 %v3653_v48, %v3652_v15  ;;  %v5599_v15 = vld [vmem:[%s7594_s7 + $0x18] sm:$0xff]   ;;  %v5600_v48 = vld [vmem:[%s7594_s7 + $0x60] sm:$0xff]  }
 0x55f   : > { %v3605_v54 = vpop.f32.mrb[84].mxu1 }
 0x560   : > { %v5100_v55 = vadd.f32 %v7234_v58, %v3605_v54  ;;  %v3607_v40 = vpop.f32.mrb[85].mxu1  ;;  %v5602_v54 = vld [vmem:[%s7594_s7 + $0x68] sm:$0xff]  }
 0x561   : > { %v3608_v24 = vpop.f32.mrb[86].mxu1  ;;  %v5604_v40 = vld [vmem:[%s7594_s7 + $0x70] sm:$0xff]  }
 0x562   : > { %v5101_v5 = vadd.f32 %v7234_v58, %v3608_v24  ;;  %v3610_v39 = vpop.f32.mrb[87].mxu1  ;;  %v3654_v6 = vmax.f32 %v5100_v55, 0.0  ;;  %v5603_v55 = vld [vmem:[%s7594_s7 + $0x28] sm:$0xff]   ;;  %v5605_v24 = vld [vmem:[%s7594_s7 + $0x30] sm:$0xff]  }
 0x563   : > { %v5607_v39 = vld [vmem:[%s7594_s7 + $0x38] sm:$0xff]  }
 0x564   : > { %v3655_v32 = vmax.f32 %v5101_v5, 0.0  ;;  %v5606_v5 = vld [vmem:[%s7594_s7 + $0x78] sm:$0xff]  }
 0x566   : > { %v7427_v26 = vpack.c.bf16 %v3655_v32, %v3654_v6 }
 0x582   : > { %v3693_v47 = vpop.permute.xlu1 %3692 }
 0x583   : > { %v3726_v58 = vsel %vm913_vm0, %v7324_v18, %v3693_v47 }
 0x58a   : > { %v3695_v16 = vpop.permute.xlu1 %3694 }
 0x58b   : > { %v3730_v38 = vsel %vm913_vm0, %v7340_v12, %v3695_v16 }
 0x5a2   : > { %v3699_v50 = vpop.permute.xlu0 %3698 }
 0x5a3   : > { %v3734_v60 = vsel %vm913_vm0, %v7370_v41, %v3699_v50  ;;  %v3681_v41 = vpop.permute.xlu1 %3680 }
 0x5a4   : > { %4379 = vmatprep.mubr.bf16.mxu0 %v3734_v60  ;;  %v3710_v12 = vsel %vm913_vm0, %v7244_v62, %v3681_v41  ;;  %v5571_v62 = vld [vmem:[%s7592_s5 + $0x250] ss:$8 sps:$4 sm:$0xff]  }
 0x5a5   : > { %4380 = vmatmul.mubr.bf16.vlgmr.msra.gmra.mrb[0].mxu0 %v3726_v58 }
 0x5a6   : > { %4401 = vmatpush1.bf16.msra.mxu0 %v5547_v31 }
 0x5a7   : > { %4402 = vmatprep.subr.bf16.mxu0 %v5555_v21  ;;  %v3689_v11 = vpop.permute.xlu1 %3688  ;;  %v3836_v21 = vld [vmem:[%s7593_s6] sm:$0x3] }
 0x5a8   : > { %v3722_v63 = vsel %vm913_vm0, %v7288_v20, %v3689_v11  ;;  %v5576_v20 = vld [vmem:[%s7592_s5 + $0x264] ss:$8 sps:$4 sm:$0xff]   ;;  %v3841_v58 = vrot.slane %v3836_v21, %v1197_v25 }
 0x5aa   : > { %4403 = vmatpush1.bf16.msra.mxu0 %v5553_v7  ;;  %v3701_v27 = vpop.permute.xlu0 %3700  ;;  %v7598_v7 = vsub.s32 1, %v6208_v3 }
 0x5ab   : > { %v3738_v18 = vsel %vm913_vm0, %v7385_v0, %v3701_v27  ;;  %4404 = vmatprep.subr.bf16.mxu0 %v5561_v56 }
 0x5ac   : > { %4389 = vmatprep.mubr.bf16.mxu0 %v3738_v18  ;;  %v3845_v56 = vrot.slane %v3836_v21, %v7598_v7 }
 0x5ad   : > { %4390 = vmatmul.mubr.bf16.gmra.mrb[4].mxu0 %v3730_v38 }
 0x5ae   : > { %4405 = vmatpush1.bf16.msra.mxu0 %v5559_v46  ;;  %5009 = vmatprep.mubr.msk.bf16.mxu0 %vm913_vm0, %v3676_v1  ;;  %v3687_v14 = vpop.permute.xlu0 %3686  ;;  %v5601_v1 = vld [vmem:[%s7594_s7 + $0x20] sm:$0xff]  }
 0x5af   : > { %v3718_v0 = vsel %vm913_vm0, %v7284_v36, %v3687_v14  ;;  %4406 = vmatprep.subr.bf16.mxu0 %v5567_v13  ;;  %v5573_v36 = vld [vmem:[%s7592_s5 + $0x254] ss:$8 sps:$4 sm:$0xff]  }
 0x5b0   : > { %4326 = vmatprep.mubr.bf16.mxu1 %v3718_v0 }
 0x5b1   : > { %4327 = vmatmul.mubr.bf16.vlgmr.msra.gmra.mrb[88].mxu1 %v3710_v12 }
 0x5b2   : > { %4407 = vmatpush1.bf16.msra.mxu0 %v5565_v35  ;;  %4336 = vmatprep.mubr.bf16.mxu1 %v3722_v63 }
 0x5b3   : > { %4408 = vmatprep.subr.bf16.mxu0 %v5570_v22  ;;  %5031 = vmatpush3.bf16.msra.mxu1 %v5593_v45  ;;  %v5011_v45 = vld [vmem:[%s7595_s8] ss:$0 sm:$0xff] }
 0x5b6   : > { %4409 = vmatpush1.bf16.msra.mxu0 %v5568_v17 }
 0x5b7   : > { %4410 = vmatprep.subr.bf16.mxu0 %v5573_v36 }
 0x5ba   : > { %4411 = vmatpush1.bf16.msra.mxu0 %v5571_v62 }
 0x5bb   : > { %4412 = vmatprep.subr.bf16.mxu0 %v5576_v20 }
 0x5be   : > { %4413 = vmatpush1.bf16.msra.mxu0 %v5574_v19 }
 0x5bf   : > { %4414 = vmatprep.subr.bf16.mxu0 %v5579_v37 }
 0x5c2   : > { %4415 = vmatpush1.bf16.msra.mxu0 %v5577_v52  ;;  %v3705_v9 = vpop.permute.xlu0 %3704 }
 0x5c3   : > { %4416 = vmatprep.subr.bf16.mxu0 %v5582_v30  ;;  %v3742_v28 = vsel %vm913_vm0, %v7409_v2, %v3705_v9  ;;  %v5594_v2 = vld [vmem:[%s7594_s7 + $0x48] sm:$0xff]  }
 0x5c4   : > { %5032 = vmatprep.subr.bf16.mxu1 %v5594_v2 }
 0x5c5   : > { %5033 = vmatpush3.bf16.msra.mxu1 %v5595_v33 }
 0x5c6   : > { %4417 = vmatpush1.bf16.msra.mxu0 %v5580_v44  ;;  %v3683_v49 = vpop.permute.xlu0 %3682 }
 0x5c7   : > { %v3714_v43 = vsel %vm913_vm0, %v7248_v34, %v3683_v49  ;;  %4418 = vmatprep.subr.bf16.mxu0 %v5585_v29  ;;  %v5589_v34 = vld [vmem:[%s7592_s5 + $0x2b0] ss:$8 sps:$4 sm:$0xff]  }
 0x5c8   : > { %4337 = vmatmul.mubr.bf16.gmra.mrb[92].mxu1 %v3714_v43 }
 0x5ca   : > { %4419 = vmatpush1.bf16.msra.mxu0 %v5583_v8  ;;  %v3707_v53 = vpop.permute.xlu1 %3706 }
 0x5cb   : > { %4420 = vmatprep.subr.bf16.mxu0 %v5588_v42  ;;  %v3746_v51 = vsel %vm913_vm0, %v7413_v61, %v3707_v53  ;;  %v5596_v61 = vld [vmem:[%s7594_s7 + $0x50] sm:$0xff]  }
 0x5cc   : > { %5034 = vmatprep.subr.bf16.mxu1 %v5596_v61 }
 0x5cd   : > { %5035 = vmatpush3.bf16.msra.mxu1 %v5597_v23 }
 0x5ce   : > { %4421 = vmatpush1.bf16.msra.mxu0 %v5586_v57  ;;  %5036 = vmatprep.subr.bf16.mxu1 %v5598_v4 }
 0x5cf   : > { %4422 = vmatprep.subr.bf16.mxu0 %v5591_v59 }
 0x5d1   : > { %5037 = vmatpush3.bf16.msra.mxu1 %v5599_v15 }
 0x5d2   : > { %4423 = vmatpush1.bf16.msra.mxu0 %v5589_v34  ;;  %5038 = vmatprep.subr.bf16.mxu1 %v5600_v48 }
 0x5d5   : > { %4433 = vmatmul.mubr.bf16.vlgmr.msra.gmra.mrb[0].mxu0 %v3742_v28  ;;  %5039 = vmatpush3.bf16.msra.mxu1 %v5601_v1 }
 0x5d6   : > { %5010 = vmatprep.mubr.msk.bf16.mxu0 %vm913_vm0, %v7427_v26  ;;  %5040 = vmatprep.subr.bf16.mxu1 %v5602_v54 }
 0x5d9   : > { %5041 = vmatpush3.bf16.msra.mxu1 %v5603_v55 }
 0x5da   : > { %5042 = vmatprep.subr.bf16.mxu1 %v5604_v40 }
 0x5dd   : > { %4443 = vmatmul.mubr.bf16.gmra.mrb[4].mxu0 %v3746_v51  ;;  %5043 = vmatpush3.bf16.msra.mxu1 %v5605_v24 }
 0x5de   : > { %5044 = vmatprep.subr.bf16.mxu1 %v5606_v5 }
 0x5e1   : > { %5045 = vmatpush3.bf16.msra.mxu1 %v5607_v39 }
 0x684   : > { %v4328_v6 = vpop.f32.mrb[88].mxu1 }
 0x685   : > { %v4330_v32 = vpop.f32.mrb[89].mxu1  ;;  %v4329_v41 = vadd.f32 %v4328_v6, %v3841_v58 }
 0x686   : > { %v4332_v26 = vpop.f32.mrb[90].mxu1  ;;  %v4331_v27 = vadd.f32 %v4330_v32, %v3845_v56 }
 0x687   : > { %v4334_v47 = vpop.f32.mrb[91].mxu1  ;;  %v4333_v18 = vadd.f32 %v4332_v26, %v3841_v58 }
 0x688   : > { %v4335_v11 = vadd.f32 %v4334_v47, %v3845_v56 }
 0x69b   : > { %v4338_v16 = vpop.f32.mrb[92].mxu1 }
 0x69c   : > { %v4340_v50 = vpop.f32.mrb[93].mxu1  ;;  %v4339_v25 = vadd.f32 %v4338_v16, %v3841_v58 }
 0x69d   : > { %v4342_v31 = vpop.f32.mrb[94].mxu1  ;;  %v4341_v3 = vadd.f32 %v4340_v50, %v3845_v56 }
 0x69e   : > { %v4344_v60 = vpop.f32.mrb[95].mxu1  ;;  %v4343_v52 = vadd.f32 %v4342_v31, %v3841_v58 }
 0x69f   : > { %v4345_v44 = vadd.f32 %v4344_v60, %v3845_v56 }
 0x6a8   : > { %v4434_v46 = vpop.f32.mrb[0].mxu0 }
 0x6a9   : > { %v5103_v13 = vadd.f32 %v4434_v46, %v4329_v41  ;;  %v4436_v38 = vpop.f32.mrb[1].mxu0 }
 0x6aa   : > { %v5105_v14 = vadd.f32 %v4436_v38, %v4331_v27  ;;  %v4438_v35 = vpop.f32.mrb[2].mxu0 }
 0x6ab   : > { %v5107_v0 = vadd.f32 %v4438_v35, %v4333_v18  ;;  %v4440_v22 = vpop.f32.mrb[3].mxu0  ;;  %v4453_v63 = vmax.f32 %v5103_v13, 0.0 }
 0x6ac   : > { %v5109_v12 = vadd.f32 %v4440_v22, %v4335_v11  ;;  %v4454_v36 = vmax.f32 %v5105_v14, 0.0 }
 0x6ad   : > { %v4455_v17 = vmax.f32 %v5107_v0, 0.0 }
 0x6ae   : > { %v4456_v62 = vmax.f32 %v5109_v12, 0.0 }
 0x6af   : > { %v4461_v20 = vpack.c.bf16 %v4455_v17, %v4453_v63 }
 0x6b0   : > { %v4462_v19 = vpack.c.bf16 %v4456_v62, %v4454_v36  ;;  %v4444_v37 = vpop.f32.mrb[4].mxu0 }
 0x6b1   : > { %v5111_v30 = vadd.f32 %v4444_v37, %v4339_v25  ;;  %v4446_v9 = vpop.f32.mrb[5].mxu0 }
 0x6b2   : > { %v5113_v29 = vadd.f32 %v4446_v9, %v4341_v3  ;;  %v4448_v49 = vpop.f32.mrb[6].mxu0  ;;  %4632 = vmatprep.mubr.bf16.mxu1 %v4462_v19 }
 0x6b3   : > { %v5115_v8 = vadd.f32 %v4448_v49, %v4343_v52  ;;  %v4450_v43 = vpop.f32.mrb[7].mxu0  ;;  %4633 = vmatmul.mubr.bf16.vlgmr.msra.gmra.mrb[96].mxu1 %v4461_v20  ;;  %v4457_v57 = vmax.f32 %v5111_v30, 0.0 }
 0x6b4   : > { %v5117_v42 = vadd.f32 %v4450_v43, %v4345_v44  ;;  %v4458_v34 = vmax.f32 %v5113_v29, 0.0 }
 0x6b5   : > { %v4459_v59 = vmax.f32 %v5115_v8, 0.0 }
 0x6b6   : > { %v4460_v28 = vmax.f32 %v5117_v42, 0.0 }
 0x6b7   : > { %v4463_v53 = vpack.c.bf16 %v4459_v59, %v4457_v57 }
 0x6b8   : > { %v4464_v51 = vpack.c.bf16 %v4460_v28, %v4458_v34 }
 0x6ba   : > { %4640 = vmatprep.mubr.bf16.mxu1 %v4464_v51 }
 0x6bb   : > { %4641 = vmatmul.mubr.bf16.gmra.mrb[100].mxu1 %v4463_v53 }
 0x786   : > { %v5046_v10 = vpop.f32.mrb[96].mxu1 }
 0x787   : > { %v5047_v2 = vpop.f32.mrb[97].mxu1 }
 0x788   : > { %v5048_v33 = vadd.f32 %v5047_v2, %v5046_v10  ;;  %v5049_v61 = vpop.f32.mrb[98].mxu1 }
 0x789   : > { %v5050_v23 = vpop.f32.mrb[99].mxu1 }
 0x78a   : > { %v4635_v4 = vadd.f32 %v5048_v33, %v5011_v45  ;;  %v5051_v15 = vadd.f32 %v5050_v23, %v5049_v61 }
 0x78c   : > { %4649 = vst [vmem:[%s334_s19] sm:$0xff] %v4635_v4  ;;  %v4638_v48 = vadd.f32 %v5051_v15, %v5011_v45 }
 0x78e   : > { %4650 = vst [vmem:[%s334_s19 + $0x8] sm:$0xff] %v4638_v48  ;;  %v5052_v1 = vpop.f32.mrb[100].mxu1 }
 0x78f   : > { %v5053_v54 = vpop.f32.mrb[101].mxu1 }
 0x790   : > { %v5054_v55 = vadd.f32 %v5053_v54, %v5052_v1  ;;  %v5055_v40 = vpop.f32.mrb[102].mxu1 }
 0x791   : > { %v5056_v24 = vpop.f32.mrb[103].mxu1 }
 0x792   : > { %v4643_v5 = vadd.f32 %v5054_v55, %v5011_v45  ;;  %v5057_v39 = vadd.f32 %v5056_v24, %v5055_v40 }
 0x794   : > { %4651 = vst [vmem:[%s334_s19 + $0x10] sm:$0xff] %v4643_v5  ;;  %v4646_v6 = vadd.f32 %v5057_v39, %v5011_v45 }
 0x796   : > { %4652 = vst [vmem:[%s334_s19 + $0x18] sm:$0xff] %v4646_v6 }
 0x797 PF: > { %s19_s30 = sadd.s32 1, %s5626_s30  }
 0x798   : > { %p16_p5 = scmp.ge.s32.totalorder %s19_s30, 4  }
 0x79a   :  { %18 = sbr.rel (!%p16_p5) target bundleno = 1 (0x1), region = 86 }

</bundles_post_ra>
